<compile_context>
chip_gen: v5e
topology: v5e:2x2
jax: 0.10.0
libtpu: 0.0.40
codegen_flags: <defaults>
</compile_context>

<pallas_src>
import jax
import jax.numpy as jnp
from jax.experimental import pallas as pl
from jax.experimental.pallas import tpu as pltpu

# ------------------------- small-shape configuration -------------------------
N_IMG = 2
C_IN = 32            # feature channels == res5 in_channels (out_channels // 2)
C_BOTTLE = 16        # bottleneck channels
C_OUT = 64           # res5 out_channels
NUM_CLASSES = 5
POOL_RES = 8         # pooler_resolution
SAMPLING_RATIO = 2
STRIDE = 16          # feature stride -> pooler_scale = 1/16
H_FEAT = W_FEAT = 16
R = 8                # total ROIs (4 per image, grouped image-major)
FIRST_STRIDE = 2     # res5 first-block stride (stride_in_1x1 = True, detectron2 default)


# ------------------------------ fused Pallas kernel ------------------------------

def _fused_res5_heads_kernel(g_ref, f_ref, t_ref, m_ref,
                             w1b1_ref, wsc_ref, w1b23_ref, w2_ref, w3_ref,
                             b1_ref, b2_ref, b3_ref, bsc_ref, wh_ref, bh_ref,
                             o_ref):
    """One grid step = one image: ROIAlign -> res5 -> mean pool -> heads, all in VMEM."""
    f32 = jnp.float32

    def mm(a, b):  # bf16 MXU matmul, f32 accumulation
        return jnp.dot(a.astype(jnp.bfloat16), b.astype(jnp.bfloat16),
                       preferred_element_type=f32)

    # --- ROIAlignV2 fused with block-0 stride-2 subsample (stride_in_1x1) ---
    # g already contains only the even-sub-grid interpolation rows:
    # g: (RPI*Q*Q, H*W), f: (H*W, C_IN) -> x_s: (RPI*Q*Q, C_IN)
    x_s = mm(g_ref[0], f_ref[0])

    def conv3x3(h, blk):                                  # h: (RPI*Q*Q, C_BOTTLE) f32
        acc = jnp.zeros_like(h)
        for k in range(9):
            # t_ref[k]: per-ROI zero-padded spatial shift (identity at k == 4)
            sh = h if k == 4 else mm(t_ref[k], h)
            acc = acc + mm(sh, w2_ref[blk * 9 + k])
        return acc + b2_ref[blk]

    # --- block 0: stride_in_1x1, projection shortcut (FrozenBN folded into w/b) ---
    shortcut = mm(x_s, wsc_ref[...]) + bsc_ref[...]                       # (RPI*Q*Q, C_OUT)
    h = jnp.maximum(mm(x_s, w1b1_ref[...]) + b1_ref[0], 0.0)              # 1x1 (stride folded)
    h = jnp.maximum(conv3x3(h, 0), 0.0)                                   # 3x3
    y = jnp.maximum(mm(h, w3_ref[0]) + b3_ref[0] + shortcut, 0.0)         # 1x1 + residual

    # --- blocks 1, 2: identity shortcut ---
    for blk in (1, 2):
        h = jnp.maximum(mm(y, w1b23_ref[blk - 1]) + b1_ref[blk], 0.0)
        h = jnp.maximum(conv3x3(h, blk), 0.0)
        y = jnp.maximum(mm(h, w3_ref[blk]) + b3_ref[blk] + y, 0.0)

    # --- spatial mean pool + fused FastRCNN heads (cls_score || bbox_pred, lane-padded) ---
    fp = mm(m_ref[...], y)                                # (RPI, C_OUT)
    o_ref[0] = (mm(fp, wh_ref[...]) + bh_ref[...]).astype(o_ref.dtype)


# ------------------- host-side static matrices (spatial plumbing) -------------------

def build_static_mats(rois_per_img, pool_res, stride):
    """0/1 matrices turning per-ROI 3x3 shifts and mean-pool into GEMMs."""
    q = pool_res // stride

    # 3x3 shift matrices on the q x q grid with per-ROI zero padding: (9, RPI*q*q, RPI*q*q)
    idx = jnp.arange(rois_per_img * q * q)
    pr, py, px = idx // (q * q), (idx // q) % q, idx % q
    shifts = []
    for dy in (-1, 0, 1):
        for dx in (-1, 0, 1):
            ys, xs = py + dy, px + dx
            valid = (ys >= 0) & (ys < q) & (xs >= 0) & (xs < q)
            src = pr * q * q + jnp.clip(ys, 0, q - 1) * q + jnp.clip(xs, 0, q - 1)
            shifts.append(jax.nn.one_hot(src, rois_per_img * q * q, dtype=jnp.float32)
                          * valid[:, None].astype(jnp.float32))
    shift = jnp.stack(shifts, axis=0)

    # spatial mean-pool matrix: (RPI, RPI*q*q), block-diagonal 1/(q*q)
    cols = jnp.arange(rois_per_img * q * q)
    mean = (jnp.arange(rois_per_img)[:, None] == cols[None, :] // (q * q))
    mean = mean.astype(jnp.float32) / float(q * q)
    return shift, mean


# ----------------------- ROIAlignV2 interpolation matrices -----------------------

def _axis_interp(c0, c1, out_size, in_size, sampling_ratio):
    roi_len = c1 - c0
    bin_len = roi_len / out_size
    p = jnp.arange(out_size, dtype=jnp.float32)
    i = jnp.arange(sampling_ratio, dtype=jnp.float32)
    coords = (c0[:, None, None]
              + p[None, :, None] * bin_len[:, None, None]
              + (i[None, None, :] + 0.5) * bin_len[:, None, None] / sampling_ratio)
    valid = (coords >= -1.0) & (coords <= in_size)
    c = jnp.maximum(coords, 0.0)
    low = jnp.floor(c)
    at_edge = low >= in_size - 1
    low = jnp.where(at_edge, in_size - 1.0, low)
    high = jnp.where(at_edge, in_size - 1.0, low + 1.0)
    c = jnp.where(at_edge, in_size - 1.0, c)
    lw = c - low
    hw = 1.0 - lw
    oh_low = jax.nn.one_hot(low.astype(jnp.int32), in_size, dtype=jnp.float32) * hw[..., None]
    oh_high = jax.nn.one_hot(high.astype(jnp.int32), in_size, dtype=jnp.float32) * lw[..., None]
    wgt = (oh_low + oh_high) * valid[..., None].astype(jnp.float32)
    return wgt.sum(axis=2) / sampling_ratio          # (R, out_size, in_size)


def build_roi_interp(boxes, scale, out_size, sampling_ratio, h, w):
    # ROIAlignV2 (aligned=True): subtract 0.5 after scaling boxes to feature coords.
    x0 = boxes[:, 0] * scale - 0.5
    y0 = boxes[:, 1] * scale - 0.5
    x1 = boxes[:, 2] * scale - 0.5
    y1 = boxes[:, 3] * scale - 0.5
    my = _axis_interp(y0, y1, out_size, h, sampling_ratio)   # (R, P, H)
    mx = _axis_interp(x0, x1, out_size, w, sampling_ratio)   # (R, P, W)
    # G[r, p*P + q, y*W + x] = My[r, p, y] * Mx[r, q, x]  (separable bilinear average)
    g = (my[:, :, None, :, None] * mx[:, None, :, None, :]).reshape(
        boxes.shape[0], out_size * out_size, h * w)
    return g


# ------------------------ FrozenBN folding & weight packing ------------------------

def _fold_bn(w, bn, eps=1e-5):
    # FrozenBatchNorm2d: y = (x - mean) / sqrt(var + eps) * gamma + beta, folded into conv.
    scale = bn["gamma"] / jnp.sqrt(bn["var"] + eps)          # (Cout,)
    return w * scale[:, None, None, None], bn["beta"] - bn["mean"] * scale


def _mat1x1(w):  # (Cout, Cin, 1, 1) -> (Cin, Cout)
    return jnp.transpose(w[:, :, 0, 0])


def _mat3x3(w):  # (Cout, Cin, 3, 3) -> (9, Cin, Cout), k = ky*3 + kx
    return jnp.transpose(w, (2, 3, 1, 0)).reshape(9, w.shape[1], w.shape[0])


def _prepare_kernel_params(params, dtype=jnp.bfloat16):
    blocks = params["res5"]
    w1s, b1s, w2s, b2s, w3s, b3s = [], [], [], [], [], []
    for blk in blocks:
        w1, b1 = _fold_bn(blk["w1"], blk["bn1"])
        w2, b2 = _fold_bn(blk["w2"], blk["bn2"])
        w3, b3 = _fold_bn(blk["w3"], blk["bn3"])
        w1s.append(_mat1x1(w1)); b1s.append(b1)
        w2s.append(_mat3x3(w2)); b2s.append(b2)
        w3s.append(_mat1x1(w3)); b3s.append(b3)
    wsc, bsc = _fold_bn(blocks[0]["w_sc"], blocks[0]["bn_sc"])

    # Fused head weights, zero-padded to a 128-lane multiple for dense output stores.
    wh = jnp.concatenate([params["cls_w"], params["bbox_w"]], axis=1)
    bh = jnp.concatenate([params["cls_b"], params["bbox_b"]])
    num_out = wh.shape[1]
    head_pad = ((num_out + 127) // 128) * 128
    wh_pad = jnp.zeros((wh.shape[0], head_pad), jnp.float32).at[:, :num_out].set(wh)
    bh_pad = jnp.zeros((1, head_pad), jnp.float32).at[:, :num_out].set(bh[None, :])

    return {
        "w1_b1": w1s[0].astype(dtype),                        # (C_IN, C_BOTTLE)
        "w1_b23": jnp.stack(w1s[1:]).astype(dtype),           # (2, C_OUT, C_BOTTLE)
        "w2_all": jnp.concatenate(w2s, axis=0).astype(dtype), # (27, C_BOTTLE, C_BOTTLE)
        "w3_all": jnp.stack(w3s).astype(dtype),               # (3, C_BOTTLE, C_OUT)
        "wsc": _mat1x1(wsc).astype(dtype),                    # (C_IN, C_OUT)
        "b1_all": jnp.stack(b1s)[:, None, :],                 # (3, 1, C_BOTTLE) f32
        "b2_all": jnp.stack(b2s)[:, None, :],                 # (3, 1, C_BOTTLE) f32
        "b3_all": jnp.stack(b3s)[:, None, :],                 # (3, 1, C_OUT) f32
        "bsc": bsc[None, :],                                  # (1, C_OUT) f32
        "wh": wh_pad.astype(dtype),                           # (C_OUT, head_pad)
        "bh": bh_pad,                                         # (1, head_pad) f32
        "num_out": num_out,
        "head_pad": head_pad,
    }


# --------------------------------- forward -----------------------------------

def res5_roi_heads_forward(features_nchw, boxes, batch_idx, params,
                           pooler_resolution=POOL_RES,
                           sampling_ratio=SAMPLING_RATIO,
                           stride=STRIDE):
    n, c, h, w = features_nchw.shape
    r_total = boxes.shape[0]
    assert r_total % n == 0 and pooler_resolution % FIRST_STRIDE == 0
    rpi = r_total // n
    p = pooler_resolution
    q = p // FIRST_STRIDE
    del batch_idx  # ROIs are grouped image-major (detectron2 pooler ordering)

    bf = jnp.bfloat16
    feat = jnp.transpose(features_nchw, (0, 2, 3, 1)).reshape(n, h * w, c)

    # ROIAlignV2 interpolation matrix, with the block-0 stride-2 subsample folded in:
    # stride_in_1x1 means block 0's 1x1 conv AND its projection shortcut both have
    # stride 2, so only the even (y, x) sub-grid of the pooled map is ever read.
    g = build_roi_interp(boxes, 1.0 / stride, p, sampling_ratio, h, w)   # (R, p*p, h*w)
    yy, xx = jnp.meshgrid(jnp.arange(q), jnp.arange(q), indexing="ij")
    sub_rows = ((FIRST_STRIDE * yy) * p + FIRST_STRIDE * xx).reshape(-1)
    g = g[:, sub_rows, :].reshape(n, rpi * q * q, h * w)                 # (N, rpi*q*q, h*w)

    shift, mean = build_static_mats(rpi, p, FIRST_STRIDE)
    kp = _prepare_kernel_params(params)
    num_out, head_pad = kp["num_out"], kp["head_pad"]

    def fullspec(shape):
        return pl.BlockSpec(shape, lambda i, _n=len(shape): (0,) * _n)

    out = pl.pallas_call(
        _fused_res5_heads_kernel,
        out_shape=jax.ShapeDtypeStruct((n, rpi, head_pad), jnp.float32),
        grid=(n,),
        in_specs=[
            pl.BlockSpec((1, rpi * q * q, h * w), lambda i: (i, 0, 0)),   # G (per image)
            pl.BlockSpec((1, h * w, c), lambda i: (i, 0, 0)),             # features (per image)
            fullspec((9, rpi * q * q, rpi * q * q)),                      # 3x3 shifts
            fullspec((rpi, rpi * q * q)),                                 # mean pool
            fullspec(kp["w1_b1"].shape), fullspec(kp["wsc"].shape),
            fullspec(kp["w1_b23"].shape), fullspec(kp["w2_all"].shape),
            fullspec(kp["w3_all"].shape),
            fullspec(kp["b1_all"].shape), fullspec(kp["b2_all"].shape),
            fullspec(kp["b3_all"].shape), fullspec(kp["bsc"].shape),
            fullspec(kp["wh"].shape), fullspec(kp["bh"].shape),
        ],
        out_specs=pl.BlockSpec((1, rpi, head_pad), lambda i: (i, 0, 0)),
        compiler_params=pltpu.CompilerParams(dimension_semantics=("parallel",)),
    )(g.astype(bf), feat.astype(bf), shift.astype(bf), mean.astype(bf),
      kp["w1_b1"], kp["wsc"], kp["w1_b23"], kp["w2_all"], kp["w3_all"],
      kp["b1_all"], kp["b2_all"], kp["b3_all"], kp["bsc"], kp["wh"], kp["bh"])

    out = out.reshape(r_total, head_pad)[:, :num_out]
    nc1 = params["cls_w"].shape[1]
    pred_class_logits = out[:, :nc1]
    pred_proposal_deltas = out[:, nc1:]
    # TODO(synk): proposal matching/sampling, FastRCNNOutputs losses, NMS inference and
    # the mask head branch are host-side control logic and are not implemented here.
    return pred_class_logits, pred_proposal_deltas


# ------------------------------ parameter init --------------------------------

def _bn_params(c):
    # FrozenBatchNorm2d default buffers (identity transform).
    return {"gamma": jnp.ones((c,), jnp.float32), "beta": jnp.zeros((c,), jnp.float32),
            "mean": jnp.zeros((c,), jnp.float32), "var": jnp.ones((c,), jnp.float32)}


def init_params(key):
    keys = jax.random.split(key, 16)

    def conv_w(k, cout, cin, kh, kw, scale=0.1):
        return scale * jax.random.normal(k, (cout, cin, kh, kw), jnp.float32)

    res5 = [{
        "w1": conv_w(keys[0], C_BOTTLE, C_IN, 1, 1), "bn1": _bn_params(C_BOTTLE),
        "w2": conv_w(keys[1], C_BOTTLE, C_BOTTLE, 3, 3), "bn2": _bn_params(C_BOTTLE),
        "w3": conv_w(keys[2], C_OUT, C_BOTTLE, 1, 1), "bn3": _bn_params(C_OUT),
        "w_sc": conv_w(keys[3], C_OUT, C_IN, 1, 1), "bn_sc": _bn_params(C_OUT),
    }]
    for b in range(1, 3):
        res5.append({
            "w1": conv_w(keys[4 * b], C_BOTTLE, C_OUT, 1, 1), "bn1": _bn_params(C_BOTTLE),
            "w2": conv_w(keys[4 * b + 1], C_BOTTLE, C_BOTTLE, 3, 3), "bn2": _bn_params(C_BOTTLE),
            "w3": conv_w(keys[4 * b + 2], C_OUT, C_BOTTLE, 1, 1), "bn3": _bn_params(C_OUT),
        })
    return {
        "res5": res5,
        "cls_w": 0.01 * jax.random.normal(keys[12], (C_OUT, NUM_CLASSES + 1), jnp.float32),
        "cls_b": jnp.zeros((NUM_CLASSES + 1,), jnp.float32),
        "bbox_w": 0.001 * jax.random.normal(keys[13], (C_OUT, 4 * NUM_CLASSES), jnp.float32),
        "bbox_b": jnp.zeros((4 * NUM_CLASSES,), jnp.float32),
    }


# ----------------------------------- main --------------------------------------

if __name__ == "__main__":
    key = jax.random.PRNGKey(0)
    k_feat, k_box, k_param = jax.random.split(key, 3)

    features = jax.random.normal(k_feat, (N_IMG, C_IN, H_FEAT, W_FEAT), jnp.float32)

    img_size = float(H_FEAT * STRIDE)
    kx, ky, kw, kh = jax.random.split(k_box, 4)
    x1 = jax.random.uniform(kx, (R,), minval=0.0, maxval=img_size * 0.6)
    y1 = jax.random.uniform(ky, (R,), minval=0.0, maxval=img_size * 0.6)
    bw = jax.random.uniform(kw, (R,), minval=16.0, maxval=img_size * 0.4)
    bh = jax.random.uniform(kh, (R,), minval=16.0, maxval=img_size * 0.4)
    boxes = jnp.stack([x1, y1, x1 + bw, y1 + bh], axis=1)            # (R, 4) image coords
    batch_idx = jnp.repeat(jnp.arange(N_IMG, dtype=jnp.int32), R // N_IMG)

    params = init_params(k_param)

    fwd = jax.jit(res5_roi_heads_forward)
    logits, deltas = fwd(features, boxes, batch_idx, params)
    jax.block_until_ready((logits, deltas))

    assert logits.shape == (R, NUM_CLASSES + 1)
    assert deltas.shape == (R, 4 * NUM_CLASSES)
    assert bool(jnp.all(jnp.isfinite(logits))) and bool(jnp.all(jnp.isfinite(deltas)))
    print("KERNEL_OK")
</pallas_src>

<mosaic_0001>
module attributes {stable_mosaic.version = 11 : i64} {
  func.func @_fused_res5_heads_kernel(%arg0: i32, %arg1: memref<1x64x256xbf16, #tpu.memory_space<vmem>>, %arg2: memref<1x256x32xbf16, #tpu.memory_space<vmem>>, %arg3: memref<9x64x64xbf16, #tpu.memory_space<vmem>>, %arg4: memref<4x64xbf16, #tpu.memory_space<vmem>>, %arg5: memref<32x16xbf16, #tpu.memory_space<vmem>>, %arg6: memref<32x64xbf16, #tpu.memory_space<vmem>>, %arg7: memref<2x64x16xbf16, #tpu.memory_space<vmem>>, %arg8: memref<27x16x16xbf16, #tpu.memory_space<vmem>>, %arg9: memref<3x16x64xbf16, #tpu.memory_space<vmem>>, %arg10: memref<3x1x16xf32, #tpu.memory_space<vmem>>, %arg11: memref<3x1x16xf32, #tpu.memory_space<vmem>>, %arg12: memref<3x1x64xf32, #tpu.memory_space<vmem>>, %arg13: memref<1x64xf32, #tpu.memory_space<vmem>>, %arg14: memref<64x128xbf16, #tpu.memory_space<vmem>>, %arg15: memref<1x128xf32, #tpu.memory_space<vmem>>, %arg16: memref<1x4x128xf32, #tpu.memory_space<vmem>>) attributes {dimension_semantics = [#tpu.dimension_semantics<parallel>], iteration_bounds = array<i64: 2>, scalar_prefetch = 0 : i64, scratch_operands = 0 : i64, tpu.core_type = #tpu.core_type<tc>, window_params = [{transform_indices = @transform_0, window_bounds = array<i64: 1, 64, 256>}, {transform_indices = @transform_1, window_bounds = array<i64: 1, 256, 32>}, {pipeline_mode = #tpu.pipeline_mode<synchronous>, transform_indices = @transform_2, window_bounds = array<i64: 9, 64, 64>}, {pipeline_mode = #tpu.pipeline_mode<synchronous>, transform_indices = @transform_3, window_bounds = array<i64: 4, 64>}, {pipeline_mode = #tpu.pipeline_mode<synchronous>, transform_indices = @transform_4, window_bounds = array<i64: 32, 16>}, {pipeline_mode = #tpu.pipeline_mode<synchronous>, transform_indices = @transform_5, window_bounds = array<i64: 32, 64>}, {pipeline_mode = #tpu.pipeline_mode<synchronous>, transform_indices = @transform_6, window_bounds = array<i64: 2, 64, 16>}, {pipeline_mode = #tpu.pipeline_mode<synchronous>, transform_indices = @transform_7, window_bounds = array<i64: 27, 16, 16>}, {pipeline_mode = #tpu.pipeline_mode<synchronous>, transform_indices = @transform_8, window_bounds = array<i64: 3, 16, 64>}, {pipeline_mode = #tpu.pipeline_mode<synchronous>, transform_indices = @transform_9, window_bounds = array<i64: 3, 1, 16>}, {pipeline_mode = #tpu.pipeline_mode<synchronous>, transform_indices = @transform_10, window_bounds = array<i64: 3, 1, 16>}, {pipeline_mode = #tpu.pipeline_mode<synchronous>, transform_indices = @transform_11, window_bounds = array<i64: 3, 1, 64>}, {pipeline_mode = #tpu.pipeline_mode<synchronous>, transform_indices = @transform_12, window_bounds = array<i64: 1, 64>}, {pipeline_mode = #tpu.pipeline_mode<synchronous>, transform_indices = @transform_13, window_bounds = array<i64: 64, 128>}, {pipeline_mode = #tpu.pipeline_mode<synchronous>, transform_indices = @transform_14, window_bounds = array<i64: 1, 128>}, {transform_indices = @transform_15, window_bounds = array<i64: 1, 4, 128>}]} {
    %c0 = arith.constant 0 : index
    %c0_0 = arith.constant 0 : index
    %c0_1 = arith.constant 0 : index
    %0 = vector.load %arg1[%c0, %c0_0, %c0_1] : memref<1x64x256xbf16, #tpu.memory_space<vmem>>, vector<1x64x256xbf16>
    %1 = vector.shape_cast %0 : vector<1x64x256xbf16> to vector<64x256xbf16>
    %c0_2 = arith.constant 0 : index
    %c0_3 = arith.constant 0 : index
    %c0_4 = arith.constant 0 : index
    %2 = vector.load %arg2[%c0_2, %c0_3, %c0_4] : memref<1x256x32xbf16, #tpu.memory_space<vmem>>, vector<1x256x32xbf16>
    %3 = vector.shape_cast %2 : vector<1x256x32xbf16> to vector<256x32xbf16>
    %cst = arith.constant dense<0.000000e+00> : vector<64x32xf32>
    %4 = tpu.matmul %1, %3, %cst {dimension_numbers = #tpu.dot_dimension_numbers<[1], [0], [0], [1], [0, 0, 1, 1], [], []>} : vector<64x256xbf16>, vector<256x32xbf16>, vector<64x32xf32> -> vector<64x32xf32>
    %c0_5 = arith.constant 0 : index
    %c0_6 = arith.constant 0 : index
    %5 = vector.load %arg6[%c0_5, %c0_6] : memref<32x64xbf16, #tpu.memory_space<vmem>>, vector<32x64xbf16>
    %6 = arith.truncf %4 : vector<64x32xf32> to vector<64x32xbf16>
    %cst_7 = arith.constant dense<0.000000e+00> : vector<64x64xf32>
    %7 = tpu.matmul %6, %5, %cst_7 {dimension_numbers = #tpu.dot_dimension_numbers<[1], [0], [0], [1], [0, 0, 1, 1], [], []>} : vector<64x32xbf16>, vector<32x64xbf16>, vector<64x64xf32> -> vector<64x64xf32>
    %c0_8 = arith.constant 0 : index
    %c0_9 = arith.constant 0 : index
    %8 = vector.load %arg13[%c0_8, %c0_9] : memref<1x64xf32, #tpu.memory_space<vmem>>, vector<1x64xf32>
    %9 = vector.broadcast %8 : vector<1x64xf32> to vector<64x64xf32>
    %10 = arith.addf %7, %9 : vector<64x64xf32>
    %c0_10 = arith.constant 0 : index
    %c0_11 = arith.constant 0 : index
    %11 = vector.load %arg5[%c0_10, %c0_11] : memref<32x16xbf16, #tpu.memory_space<vmem>>, vector<32x16xbf16>
    %12 = arith.truncf %4 : vector<64x32xf32> to vector<64x32xbf16>
    %cst_12 = arith.constant dense<0.000000e+00> : vector<64x16xf32>
    %13 = tpu.matmul %12, %11, %cst_12 {dimension_numbers = #tpu.dot_dimension_numbers<[1], [0], [0], [1], [0, 0, 1, 1], [], []>} : vector<64x32xbf16>, vector<32x16xbf16>, vector<64x16xf32> -> vector<64x16xf32>
    %c0_13 = arith.constant 0 : index
    %c0_14 = arith.constant 0 : index
    %c0_15 = arith.constant 0 : index
    %14 = vector.load %arg10[%c0_13, %c0_14, %c0_15] : memref<3x1x16xf32, #tpu.memory_space<vmem>>, vector<1x1x16xf32>
    %15 = vector.shape_cast %14 : vector<1x1x16xf32> to vector<1x16xf32>
    %16 = vector.broadcast %15 : vector<1x16xf32> to vector<64x16xf32>
    %17 = arith.addf %13, %16 : vector<64x16xf32>
    %cst_16 = arith.constant 0.000000e+00 : f32
    %18 = vector.broadcast %cst_16 : f32 to vector<64x16xf32>
    %19 = arith.maximumf %17, %18 : vector<64x16xf32>
    %cst_17 = arith.constant 0.000000e+00 : f32
    %20 = vector.broadcast %cst_17 : f32 to vector<64x16xf32>
    %c0_18 = arith.constant 0 : index
    %c0_19 = arith.constant 0 : index
    %c0_20 = arith.constant 0 : index
    %21 = vector.load %arg3[%c0_18, %c0_19, %c0_20] : memref<9x64x64xbf16, #tpu.memory_space<vmem>>, vector<1x64x64xbf16>
    %22 = vector.shape_cast %21 : vector<1x64x64xbf16> to vector<64x64xbf16>
    %23 = arith.truncf %19 : vector<64x16xf32> to vector<64x16xbf16>
    %cst_21 = arith.constant dense<0.000000e+00> : vector<64x16xf32>
    %24 = tpu.matmul %22, %23, %cst_21 {dimension_numbers = #tpu.dot_dimension_numbers<[1], [0], [0], [1], [0, 0, 1, 1], [], []>} : vector<64x64xbf16>, vector<64x16xbf16>, vector<64x16xf32> -> vector<64x16xf32>
    %c0_22 = arith.constant 0 : index
    %c0_23 = arith.constant 0 : index
    %c0_24 = arith.constant 0 : index
    %25 = vector.load %arg8[%c0_22, %c0_23, %c0_24] : memref<27x16x16xbf16, #tpu.memory_space<vmem>>, vector<1x16x16xbf16>
    %26 = vector.shape_cast %25 : vector<1x16x16xbf16> to vector<16x16xbf16>
    %27 = arith.truncf %24 : vector<64x16xf32> to vector<64x16xbf16>
    %cst_25 = arith.constant dense<0.000000e+00> : vector<64x16xf32>
    %28 = tpu.matmul %27, %26, %cst_25 {dimension_numbers = #tpu.dot_dimension_numbers<[1], [0], [0], [1], [0, 0, 1, 1], [], []>} : vector<64x16xbf16>, vector<16x16xbf16>, vector<64x16xf32> -> vector<64x16xf32>
    %29 = arith.addf %20, %28 : vector<64x16xf32>
    %c1 = arith.constant 1 : index
    %c0_26 = arith.constant 0 : index
    %c0_27 = arith.constant 0 : index
    %30 = vector.load %arg3[%c1, %c0_26, %c0_27] : memref<9x64x64xbf16, #tpu.memory_space<vmem>>, vector<1x64x64xbf16>
    %31 = vector.shape_cast %30 : vector<1x64x64xbf16> to vector<64x64xbf16>
    %32 = arith.truncf %19 : vector<64x16xf32> to vector<64x16xbf16>
    %cst_28 = arith.constant dense<0.000000e+00> : vector<64x16xf32>
    %33 = tpu.matmul %31, %32, %cst_28 {dimension_numbers = #tpu.dot_dimension_numbers<[1], [0], [0], [1], [0, 0, 1, 1], [], []>} : vector<64x64xbf16>, vector<64x16xbf16>, vector<64x16xf32> -> vector<64x16xf32>
    %c1_29 = arith.constant 1 : index
    %c0_30 = arith.constant 0 : index
    %c0_31 = arith.constant 0 : index
    %34 = vector.load %arg8[%c1_29, %c0_30, %c0_31] : memref<27x16x16xbf16, #tpu.memory_space<vmem>>, vector<1x16x16xbf16>
    %35 = vector.shape_cast %34 : vector<1x16x16xbf16> to vector<16x16xbf16>
    %36 = arith.truncf %33 : vector<64x16xf32> to vector<64x16xbf16>
    %cst_32 = arith.constant dense<0.000000e+00> : vector<64x16xf32>
    %37 = tpu.matmul %36, %35, %cst_32 {dimension_numbers = #tpu.dot_dimension_numbers<[1], [0], [0], [1], [0, 0, 1, 1], [], []>} : vector<64x16xbf16>, vector<16x16xbf16>, vector<64x16xf32> -> vector<64x16xf32>
    %38 = arith.addf %29, %37 : vector<64x16xf32>
    %c2 = arith.constant 2 : index
    %c0_33 = arith.constant 0 : index
    %c0_34 = arith.constant 0 : index
    %39 = vector.load %arg3[%c2, %c0_33, %c0_34] : memref<9x64x64xbf16, #tpu.memory_space<vmem>>, vector<1x64x64xbf16>
    %40 = vector.shape_cast %39 : vector<1x64x64xbf16> to vector<64x64xbf16>
    %41 = arith.truncf %19 : vector<64x16xf32> to vector<64x16xbf16>
    %cst_35 = arith.constant dense<0.000000e+00> : vector<64x16xf32>
    %42 = tpu.matmul %40, %41, %cst_35 {dimension_numbers = #tpu.dot_dimension_numbers<[1], [0], [0], [1], [0, 0, 1, 1], [], []>} : vector<64x64xbf16>, vector<64x16xbf16>, vector<64x16xf32> -> vector<64x16xf32>
    %c2_36 = arith.constant 2 : index
    %c0_37 = arith.constant 0 : index
    %c0_38 = arith.constant 0 : index
    %43 = vector.load %arg8[%c2_36, %c0_37, %c0_38] : memref<27x16x16xbf16, #tpu.memory_space<vmem>>, vector<1x16x16xbf16>
    %44 = vector.shape_cast %43 : vector<1x16x16xbf16> to vector<16x16xbf16>
    %45 = arith.truncf %42 : vector<64x16xf32> to vector<64x16xbf16>
    %cst_39 = arith.constant dense<0.000000e+00> : vector<64x16xf32>
    %46 = tpu.matmul %45, %44, %cst_39 {dimension_numbers = #tpu.dot_dimension_numbers<[1], [0], [0], [1], [0, 0, 1, 1], [], []>} : vector<64x16xbf16>, vector<16x16xbf16>, vector<64x16xf32> -> vector<64x16xf32>
    %47 = arith.addf %38, %46 : vector<64x16xf32>
    %c3 = arith.constant 3 : index
    %c0_40 = arith.constant 0 : index
    %c0_41 = arith.constant 0 : index
    %48 = vector.load %arg3[%c3, %c0_40, %c0_41] : memref<9x64x64xbf16, #tpu.memory_space<vmem>>, vector<1x64x64xbf16>
    %49 = vector.shape_cast %48 : vector<1x64x64xbf16> to vector<64x64xbf16>
    %50 = arith.truncf %19 : vector<64x16xf32> to vector<64x16xbf16>
    %cst_42 = arith.constant dense<0.000000e+00> : vector<64x16xf32>
    %51 = tpu.matmul %49, %50, %cst_42 {dimension_numbers = #tpu.dot_dimension_numbers<[1], [0], [0], [1], [0, 0, 1, 1], [], []>} : vector<64x64xbf16>, vector<64x16xbf16>, vector<64x16xf32> -> vector<64x16xf32>
    %c3_43 = arith.constant 3 : index
    %c0_44 = arith.constant 0 : index
    %c0_45 = arith.constant 0 : index
    %52 = vector.load %arg8[%c3_43, %c0_44, %c0_45] : memref<27x16x16xbf16, #tpu.memory_space<vmem>>, vector<1x16x16xbf16>
    %53 = vector.shape_cast %52 : vector<1x16x16xbf16> to vector<16x16xbf16>
    %54 = arith.truncf %51 : vector<64x16xf32> to vector<64x16xbf16>
    %cst_46 = arith.constant dense<0.000000e+00> : vector<64x16xf32>
    %55 = tpu.matmul %54, %53, %cst_46 {dimension_numbers = #tpu.dot_dimension_numbers<[1], [0], [0], [1], [0, 0, 1, 1], [], []>} : vector<64x16xbf16>, vector<16x16xbf16>, vector<64x16xf32> -> vector<64x16xf32>
    %56 = arith.addf %47, %55 : vector<64x16xf32>
    %c4 = arith.constant 4 : index
    %c0_47 = arith.constant 0 : index
    %c0_48 = arith.constant 0 : index
    %57 = vector.load %arg8[%c4, %c0_47, %c0_48] : memref<27x16x16xbf16, #tpu.memory_space<vmem>>, vector<1x16x16xbf16>
    %58 = vector.shape_cast %57 : vector<1x16x16xbf16> to vector<16x16xbf16>
    %59 = arith.truncf %19 : vector<64x16xf32> to vector<64x16xbf16>
    %cst_49 = arith.constant dense<0.000000e+00> : vector<64x16xf32>
    %60 = tpu.matmul %59, %58, %cst_49 {dimension_numbers = #tpu.dot_dimension_numbers<[1], [0], [0], [1], [0, 0, 1, 1], [], []>} : vector<64x16xbf16>, vector<16x16xbf16>, vector<64x16xf32> -> vector<64x16xf32>
    %61 = arith.addf %56, %60 : vector<64x16xf32>
    %c5 = arith.constant 5 : index
    %c0_50 = arith.constant 0 : index
    %c0_51 = arith.constant 0 : index
    %62 = vector.load %arg3[%c5, %c0_50, %c0_51] : memref<9x64x64xbf16, #tpu.memory_space<vmem>>, vector<1x64x64xbf16>
    %63 = vector.shape_cast %62 : vector<1x64x64xbf16> to vector<64x64xbf16>
    %64 = arith.truncf %19 : vector<64x16xf32> to vector<64x16xbf16>
    %cst_52 = arith.constant dense<0.000000e+00> : vector<64x16xf32>
    %65 = tpu.matmul %63, %64, %cst_52 {dimension_numbers = #tpu.dot_dimension_numbers<[1], [0], [0], [1], [0, 0, 1, 1], [], []>} : vector<64x64xbf16>, vector<64x16xbf16>, vector<64x16xf32> -> vector<64x16xf32>
    %c5_53 = arith.constant 5 : index
    %c0_54 = arith.constant 0 : index
    %c0_55 = arith.constant 0 : index
    %66 = vector.load %arg8[%c5_53, %c0_54, %c0_55] : memref<27x16x16xbf16, #tpu.memory_space<vmem>>, vector<1x16x16xbf16>
    %67 = vector.shape_cast %66 : vector<1x16x16xbf16> to vector<16x16xbf16>
    %68 = arith.truncf %65 : vector<64x16xf32> to vector<64x16xbf16>
    %cst_56 = arith.constant dense<0.000000e+00> : vector<64x16xf32>
    %69 = tpu.matmul %68, %67, %cst_56 {dimension_numbers = #tpu.dot_dimension_numbers<[1], [0], [0], [1], [0, 0, 1, 1], [], []>} : vector<64x16xbf16>, vector<16x16xbf16>, vector<64x16xf32> -> vector<64x16xf32>
    %70 = arith.addf %61, %69 : vector<64x16xf32>
    %c6 = arith.constant 6 : index
    %c0_57 = arith.constant 0 : index
    %c0_58 = arith.constant 0 : index
    %71 = vector.load %arg3[%c6, %c0_57, %c0_58] : memref<9x64x64xbf16, #tpu.memory_space<vmem>>, vector<1x64x64xbf16>
    %72 = vector.shape_cast %71 : vector<1x64x64xbf16> to vector<64x64xbf16>
    %73 = arith.truncf %19 : vector<64x16xf32> to vector<64x16xbf16>
    %cst_59 = arith.constant dense<0.000000e+00> : vector<64x16xf32>
    %74 = tpu.matmul %72, %73, %cst_59 {dimension_numbers = #tpu.dot_dimension_numbers<[1], [0], [0], [1], [0, 0, 1, 1], [], []>} : vector<64x64xbf16>, vector<64x16xbf16>, vector<64x16xf32> -> vector<64x16xf32>
    %c6_60 = arith.constant 6 : index
    %c0_61 = arith.constant 0 : index
    %c0_62 = arith.constant 0 : index
    %75 = vector.load %arg8[%c6_60, %c0_61, %c0_62] : memref<27x16x16xbf16, #tpu.memory_space<vmem>>, vector<1x16x16xbf16>
    %76 = vector.shape_cast %75 : vector<1x16x16xbf16> to vector<16x16xbf16>
    %77 = arith.truncf %74 : vector<64x16xf32> to vector<64x16xbf16>
    %cst_63 = arith.constant dense<0.000000e+00> : vector<64x16xf32>
    %78 = tpu.matmul %77, %76, %cst_63 {dimension_numbers = #tpu.dot_dimension_numbers<[1], [0], [0], [1], [0, 0, 1, 1], [], []>} : vector<64x16xbf16>, vector<16x16xbf16>, vector<64x16xf32> -> vector<64x16xf32>
    %79 = arith.addf %70, %78 : vector<64x16xf32>
    %c7 = arith.constant 7 : index
    %c0_64 = arith.constant 0 : index
    %c0_65 = arith.constant 0 : index
    %80 = vector.load %arg3[%c7, %c0_64, %c0_65] : memref<9x64x64xbf16, #tpu.memory_space<vmem>>, vector<1x64x64xbf16>
    %81 = vector.shape_cast %80 : vector<1x64x64xbf16> to vector<64x64xbf16>
    %82 = arith.truncf %19 : vector<64x16xf32> to vector<64x16xbf16>
    %cst_66 = arith.constant dense<0.000000e+00> : vector<64x16xf32>
    %83 = tpu.matmul %81, %82, %cst_66 {dimension_numbers = #tpu.dot_dimension_numbers<[1], [0], [0], [1], [0, 0, 1, 1], [], []>} : vector<64x64xbf16>, vector<64x16xbf16>, vector<64x16xf32> -> vector<64x16xf32>
    %c7_67 = arith.constant 7 : index
    %c0_68 = arith.constant 0 : index
    %c0_69 = arith.constant 0 : index
    %84 = vector.load %arg8[%c7_67, %c0_68, %c0_69] : memref<27x16x16xbf16, #tpu.memory_space<vmem>>, vector<1x16x16xbf16>
    %85 = vector.shape_cast %84 : vector<1x16x16xbf16> to vector<16x16xbf16>
    %86 = arith.truncf %83 : vector<64x16xf32> to vector<64x16xbf16>
    %cst_70 = arith.constant dense<0.000000e+00> : vector<64x16xf32>
    %87 = tpu.matmul %86, %85, %cst_70 {dimension_numbers = #tpu.dot_dimension_numbers<[1], [0], [0], [1], [0, 0, 1, 1], [], []>} : vector<64x16xbf16>, vector<16x16xbf16>, vector<64x16xf32> -> vector<64x16xf32>
    %88 = arith.addf %79, %87 : vector<64x16xf32>
    %c8 = arith.constant 8 : index
    %c0_71 = arith.constant 0 : index
    %c0_72 = arith.constant 0 : index
    %89 = vector.load %arg3[%c8, %c0_71, %c0_72] : memref<9x64x64xbf16, #tpu.memory_space<vmem>>, vector<1x64x64xbf16>
    %90 = vector.shape_cast %89 : vector<1x64x64xbf16> to vector<64x64xbf16>
    %91 = arith.truncf %19 : vector<64x16xf32> to vector<64x16xbf16>
    %cst_73 = arith.constant dense<0.000000e+00> : vector<64x16xf32>
    %92 = tpu.matmul %90, %91, %cst_73 {dimension_numbers = #tpu.dot_dimension_numbers<[1], [0], [0], [1], [0, 0, 1, 1], [], []>} : vector<64x64xbf16>, vector<64x16xbf16>, vector<64x16xf32> -> vector<64x16xf32>
    %c8_74 = arith.constant 8 : index
    %c0_75 = arith.constant 0 : index
    %c0_76 = arith.constant 0 : index
    %93 = vector.load %arg8[%c8_74, %c0_75, %c0_76] : memref<27x16x16xbf16, #tpu.memory_space<vmem>>, vector<1x16x16xbf16>
    %94 = vector.shape_cast %93 : vector<1x16x16xbf16> to vector<16x16xbf16>
    %95 = arith.truncf %92 : vector<64x16xf32> to vector<64x16xbf16>
    %cst_77 = arith.constant dense<0.000000e+00> : vector<64x16xf32>
    %96 = tpu.matmul %95, %94, %cst_77 {dimension_numbers = #tpu.dot_dimension_numbers<[1], [0], [0], [1], [0, 0, 1, 1], [], []>} : vector<64x16xbf16>, vector<16x16xbf16>, vector<64x16xf32> -> vector<64x16xf32>
    %97 = arith.addf %88, %96 : vector<64x16xf32>
    %c0_78 = arith.constant 0 : index
    %c0_79 = arith.constant 0 : index
    %c0_80 = arith.constant 0 : index
    %98 = vector.load %arg11[%c0_78, %c0_79, %c0_80] : memref<3x1x16xf32, #tpu.memory_space<vmem>>, vector<1x1x16xf32>
    %99 = vector.shape_cast %98 : vector<1x1x16xf32> to vector<1x16xf32>
    %100 = vector.broadcast %99 : vector<1x16xf32> to vector<64x16xf32>
    %101 = arith.addf %97, %100 : vector<64x16xf32>
    %cst_81 = arith.constant 0.000000e+00 : f32
    %102 = vector.broadcast %cst_81 : f32 to vector<64x16xf32>
    %103 = arith.maximumf %101, %102 : vector<64x16xf32>
    %c0_82 = arith.constant 0 : index
    %c0_83 = arith.constant 0 : index
    %c0_84 = arith.constant 0 : index
    %104 = vector.load %arg9[%c0_82, %c0_83, %c0_84] : memref<3x16x64xbf16, #tpu.memory_space<vmem>>, vector<1x16x64xbf16>
    %105 = vector.shape_cast %104 : vector<1x16x64xbf16> to vector<16x64xbf16>
    %106 = arith.truncf %103 : vector<64x16xf32> to vector<64x16xbf16>
    %cst_85 = arith.constant dense<0.000000e+00> : vector<64x64xf32>
    %107 = tpu.matmul %106, %105, %cst_85 {dimension_numbers = #tpu.dot_dimension_numbers<[1], [0], [0], [1], [0, 0, 1, 1], [], []>} : vector<64x16xbf16>, vector<16x64xbf16>, vector<64x64xf32> -> vector<64x64xf32>
    %c0_86 = arith.constant 0 : index
    %c0_87 = arith.constant 0 : index
    %c0_88 = arith.constant 0 : index
    %108 = vector.load %arg12[%c0_86, %c0_87, %c0_88] : memref<3x1x64xf32, #tpu.memory_space<vmem>>, vector<1x1x64xf32>
    %109 = vector.shape_cast %108 : vector<1x1x64xf32> to vector<1x64xf32>
    %110 = vector.broadcast %109 : vector<1x64xf32> to vector<64x64xf32>
    %111 = arith.addf %107, %110 : vector<64x64xf32>
    %112 = arith.addf %111, %10 : vector<64x64xf32>
    %cst_89 = arith.constant 0.000000e+00 : f32
    %113 = vector.broadcast %cst_89 : f32 to vector<64x64xf32>
    %114 = arith.maximumf %112, %113 : vector<64x64xf32>
    %c0_90 = arith.constant 0 : index
    %c0_91 = arith.constant 0 : index
    %c0_92 = arith.constant 0 : index
    %115 = vector.load %arg7[%c0_90, %c0_91, %c0_92] : memref<2x64x16xbf16, #tpu.memory_space<vmem>>, vector<1x64x16xbf16>
    %116 = vector.shape_cast %115 : vector<1x64x16xbf16> to vector<64x16xbf16>
    %117 = arith.truncf %114 : vector<64x64xf32> to vector<64x64xbf16>
    %cst_93 = arith.constant dense<0.000000e+00> : vector<64x16xf32>
    %118 = tpu.matmul %117, %116, %cst_93 {dimension_numbers = #tpu.dot_dimension_numbers<[1], [0], [0], [1], [0, 0, 1, 1], [], []>} : vector<64x64xbf16>, vector<64x16xbf16>, vector<64x16xf32> -> vector<64x16xf32>
    %c1_94 = arith.constant 1 : index
    %c0_95 = arith.constant 0 : index
    %c0_96 = arith.constant 0 : index
    %119 = vector.load %arg10[%c1_94, %c0_95, %c0_96] : memref<3x1x16xf32, #tpu.memory_space<vmem>>, vector<1x1x16xf32>
    %120 = vector.shape_cast %119 : vector<1x1x16xf32> to vector<1x16xf32>
    %121 = vector.broadcast %120 : vector<1x16xf32> to vector<64x16xf32>
    %122 = arith.addf %118, %121 : vector<64x16xf32>
    %cst_97 = arith.constant 0.000000e+00 : f32
    %123 = vector.broadcast %cst_97 : f32 to vector<64x16xf32>
    %124 = arith.maximumf %122, %123 : vector<64x16xf32>
    %cst_98 = arith.constant 0.000000e+00 : f32
    %125 = vector.broadcast %cst_98 : f32 to vector<64x16xf32>
    %c0_99 = arith.constant 0 : index
    %c0_100 = arith.constant 0 : index
    %c0_101 = arith.constant 0 : index
    %126 = vector.load %arg3[%c0_99, %c0_100, %c0_101] : memref<9x64x64xbf16, #tpu.memory_space<vmem>>, vector<1x64x64xbf16>
    %127 = vector.shape_cast %126 : vector<1x64x64xbf16> to vector<64x64xbf16>
    %128 = arith.truncf %124 : vector<64x16xf32> to vector<64x16xbf16>
    %cst_102 = arith.constant dense<0.000000e+00> : vector<64x16xf32>
    %129 = tpu.matmul %127, %128, %cst_102 {dimension_numbers = #tpu.dot_dimension_numbers<[1], [0], [0], [1], [0, 0, 1, 1], [], []>} : vector<64x64xbf16>, vector<64x16xbf16>, vector<64x16xf32> -> vector<64x16xf32>
    %c9 = arith.constant 9 : index
    %c0_103 = arith.constant 0 : index
    %c0_104 = arith.constant 0 : index
    %130 = vector.load %arg8[%c9, %c0_103, %c0_104] : memref<27x16x16xbf16, #tpu.memory_space<vmem>>, vector<1x16x16xbf16>
    %131 = vector.shape_cast %130 : vector<1x16x16xbf16> to vector<16x16xbf16>
    %132 = arith.truncf %129 : vector<64x16xf32> to vector<64x16xbf16>
    %cst_105 = arith.constant dense<0.000000e+00> : vector<64x16xf32>
    %133 = tpu.matmul %132, %131, %cst_105 {dimension_numbers = #tpu.dot_dimension_numbers<[1], [0], [0], [1], [0, 0, 1, 1], [], []>} : vector<64x16xbf16>, vector<16x16xbf16>, vector<64x16xf32> -> vector<64x16xf32>
    %134 = arith.addf %125, %133 : vector<64x16xf32>
    %c1_106 = arith.constant 1 : index
    %c0_107 = arith.constant 0 : index
    %c0_108 = arith.constant 0 : index
    %135 = vector.load %arg3[%c1_106, %c0_107, %c0_108] : memref<9x64x64xbf16, #tpu.memory_space<vmem>>, vector<1x64x64xbf16>
    %136 = vector.shape_cast %135 : vector<1x64x64xbf16> to vector<64x64xbf16>
    %137 = arith.truncf %124 : vector<64x16xf32> to vector<64x16xbf16>
    %cst_109 = arith.constant dense<0.000000e+00> : vector<64x16xf32>
    %138 = tpu.matmul %136, %137, %cst_109 {dimension_numbers = #tpu.dot_dimension_numbers<[1], [0], [0], [1], [0, 0, 1, 1], [], []>} : vector<64x64xbf16>, vector<64x16xbf16>, vector<64x16xf32> -> vector<64x16xf32>
    %c10 = arith.constant 10 : index
    %c0_110 = arith.constant 0 : index
    %c0_111 = arith.constant 0 : index
    %139 = vector.load %arg8[%c10, %c0_110, %c0_111] : memref<27x16x16xbf16, #tpu.memory_space<vmem>>, vector<1x16x16xbf16>
    %140 = vector.shape_cast %139 : vector<1x16x16xbf16> to vector<16x16xbf16>
    %141 = arith.truncf %138 : vector<64x16xf32> to vector<64x16xbf16>
    %cst_112 = arith.constant dense<0.000000e+00> : vector<64x16xf32>
    %142 = tpu.matmul %141, %140, %cst_112 {dimension_numbers = #tpu.dot_dimension_numbers<[1], [0], [0], [1], [0, 0, 1, 1], [], []>} : vector<64x16xbf16>, vector<16x16xbf16>, vector<64x16xf32> -> vector<64x16xf32>
    %143 = arith.addf %134, %142 : vector<64x16xf32>
    %c2_113 = arith.constant 2 : index
    %c0_114 = arith.constant 0 : index
    %c0_115 = arith.constant 0 : index
    %144 = vector.load %arg3[%c2_113, %c0_114, %c0_115] : memref<9x64x64xbf16, #tpu.memory_space<vmem>>, vector<1x64x64xbf16>
    %145 = vector.shape_cast %144 : vector<1x64x64xbf16> to vector<64x64xbf16>
    %146 = arith.truncf %124 : vector<64x16xf32> to vector<64x16xbf16>
    %cst_116 = arith.constant dense<0.000000e+00> : vector<64x16xf32>
    %147 = tpu.matmul %145, %146, %cst_116 {dimension_numbers = #tpu.dot_dimension_numbers<[1], [0], [0], [1], [0, 0, 1, 1], [], []>} : vector<64x64xbf16>, vector<64x16xbf16>, vector<64x16xf32> -> vector<64x16xf32>
    %c11 = arith.constant 11 : index
    %c0_117 = arith.constant 0 : index
    %c0_118 = arith.constant 0 : index
    %148 = vector.load %arg8[%c11, %c0_117, %c0_118] : memref<27x16x16xbf16, #tpu.memory_space<vmem>>, vector<1x16x16xbf16>
    %149 = vector.shape_cast %148 : vector<1x16x16xbf16> to vector<16x16xbf16>
    %150 = arith.truncf %147 : vector<64x16xf32> to vector<64x16xbf16>
    %cst_119 = arith.constant dense<0.000000e+00> : vector<64x16xf32>
    %151 = tpu.matmul %150, %149, %cst_119 {dimension_numbers = #tpu.dot_dimension_numbers<[1], [0], [0], [1], [0, 0, 1, 1], [], []>} : vector<64x16xbf16>, vector<16x16xbf16>, vector<64x16xf32> -> vector<64x16xf32>
    %152 = arith.addf %143, %151 : vector<64x16xf32>
    %c3_120 = arith.constant 3 : index
    %c0_121 = arith.constant 0 : index
    %c0_122 = arith.constant 0 : index
    %153 = vector.load %arg3[%c3_120, %c0_121, %c0_122] : memref<9x64x64xbf16, #tpu.memory_space<vmem>>, vector<1x64x64xbf16>
    %154 = vector.shape_cast %153 : vector<1x64x64xbf16> to vector<64x64xbf16>
    %155 = arith.truncf %124 : vector<64x16xf32> to vector<64x16xbf16>
    %cst_123 = arith.constant dense<0.000000e+00> : vector<64x16xf32>
    %156 = tpu.matmul %154, %155, %cst_123 {dimension_numbers = #tpu.dot_dimension_numbers<[1], [0], [0], [1], [0, 0, 1, 1], [], []>} : vector<64x64xbf16>, vector<64x16xbf16>, vector<64x16xf32> -> vector<64x16xf32>
    %c12 = arith.constant 12 : index
    %c0_124 = arith.constant 0 : index
    %c0_125 = arith.constant 0 : index
    %157 = vector.load %arg8[%c12, %c0_124, %c0_125] : memref<27x16x16xbf16, #tpu.memory_space<vmem>>, vector<1x16x16xbf16>
    %158 = vector.shape_cast %157 : vector<1x16x16xbf16> to vector<16x16xbf16>
    %159 = arith.truncf %156 : vector<64x16xf32> to vector<64x16xbf16>
    %cst_126 = arith.constant dense<0.000000e+00> : vector<64x16xf32>
    %160 = tpu.matmul %159, %158, %cst_126 {dimension_numbers = #tpu.dot_dimension_numbers<[1], [0], [0], [1], [0, 0, 1, 1], [], []>} : vector<64x16xbf16>, vector<16x16xbf16>, vector<64x16xf32> -> vector<64x16xf32>
    %161 = arith.addf %152, %160 : vector<64x16xf32>
    %c13 = arith.constant 13 : index
    %c0_127 = arith.constant 0 : index
    %c0_128 = arith.constant 0 : index
    %162 = vector.load %arg8[%c13, %c0_127, %c0_128] : memref<27x16x16xbf16, #tpu.memory_space<vmem>>, vector<1x16x16xbf16>
    %163 = vector.shape_cast %162 : vector<1x16x16xbf16> to vector<16x16xbf16>
    %164 = arith.truncf %124 : vector<64x16xf32> to vector<64x16xbf16>
    %cst_129 = arith.constant dense<0.000000e+00> : vector<64x16xf32>
    %165 = tpu.matmul %164, %163, %cst_129 {dimension_numbers = #tpu.dot_dimension_numbers<[1], [0], [0], [1], [0, 0, 1, 1], [], []>} : vector<64x16xbf16>, vector<16x16xbf16>, vector<64x16xf32> -> vector<64x16xf32>
    %166 = arith.addf %161, %165 : vector<64x16xf32>
    %c5_130 = arith.constant 5 : index
    %c0_131 = arith.constant 0 : index
    %c0_132 = arith.constant 0 : index
    %167 = vector.load %arg3[%c5_130, %c0_131, %c0_132] : memref<9x64x64xbf16, #tpu.memory_space<vmem>>, vector<1x64x64xbf16>
    %168 = vector.shape_cast %167 : vector<1x64x64xbf16> to vector<64x64xbf16>
    %169 = arith.truncf %124 : vector<64x16xf32> to vector<64x16xbf16>
    %cst_133 = arith.constant dense<0.000000e+00> : vector<64x16xf32>
    %170 = tpu.matmul %168, %169, %cst_133 {dimension_numbers = #tpu.dot_dimension_numbers<[1], [0], [0], [1], [0, 0, 1, 1], [], []>} : vector<64x64xbf16>, vector<64x16xbf16>, vector<64x16xf32> -> vector<64x16xf32>
    %c14 = arith.constant 14 : index
    %c0_134 = arith.constant 0 : index
    %c0_135 = arith.constant 0 : index
    %171 = vector.load %arg8[%c14, %c0_134, %c0_135] : memref<27x16x16xbf16, #tpu.memory_space<vmem>>, vector<1x16x16xbf16>
    %172 = vector.shape_cast %171 : vector<1x16x16xbf16> to vector<16x16xbf16>
    %173 = arith.truncf %170 : vector<64x16xf32> to vector<64x16xbf16>
    %cst_136 = arith.constant dense<0.000000e+00> : vector<64x16xf32>
    %174 = tpu.matmul %173, %172, %cst_136 {dimension_numbers = #tpu.dot_dimension_numbers<[1], [0], [0], [1], [0, 0, 1, 1], [], []>} : vector<64x16xbf16>, vector<16x16xbf16>, vector<64x16xf32> -> vector<64x16xf32>
    %175 = arith.addf %166, %174 : vector<64x16xf32>
    %c6_137 = arith.constant 6 : index
    %c0_138 = arith.constant 0 : index
    %c0_139 = arith.constant 0 : index
    %176 = vector.load %arg3[%c6_137, %c0_138, %c0_139] : memref<9x64x64xbf16, #tpu.memory_space<vmem>>, vector<1x64x64xbf16>
    %177 = vector.shape_cast %176 : vector<1x64x64xbf16> to vector<64x64xbf16>
    %178 = arith.truncf %124 : vector<64x16xf32> to vector<64x16xbf16>
    %cst_140 = arith.constant dense<0.000000e+00> : vector<64x16xf32>
    %179 = tpu.matmul %177, %178, %cst_140 {dimension_numbers = #tpu.dot_dimension_numbers<[1], [0], [0], [1], [0, 0, 1, 1], [], []>} : vector<64x64xbf16>, vector<64x16xbf16>, vector<64x16xf32> -> vector<64x16xf32>
    %c15 = arith.constant 15 : index
    %c0_141 = arith.constant 0 : index
    %c0_142 = arith.constant 0 : index
    %180 = vector.load %arg8[%c15, %c0_141, %c0_142] : memref<27x16x16xbf16, #tpu.memory_space<vmem>>, vector<1x16x16xbf16>
    %181 = vector.shape_cast %180 : vector<1x16x16xbf16> to vector<16x16xbf16>
    %182 = arith.truncf %179 : vector<64x16xf32> to vector<64x16xbf16>
    %cst_143 = arith.constant dense<0.000000e+00> : vector<64x16xf32>
    %183 = tpu.matmul %182, %181, %cst_143 {dimension_numbers = #tpu.dot_dimension_numbers<[1], [0], [0], [1], [0, 0, 1, 1], [], []>} : vector<64x16xbf16>, vector<16x16xbf16>, vector<64x16xf32> -> vector<64x16xf32>
    %184 = arith.addf %175, %183 : vector<64x16xf32>
    %c7_144 = arith.constant 7 : index
    %c0_145 = arith.constant 0 : index
    %c0_146 = arith.constant 0 : index
    %185 = vector.load %arg3[%c7_144, %c0_145, %c0_146] : memref<9x64x64xbf16, #tpu.memory_space<vmem>>, vector<1x64x64xbf16>
    %186 = vector.shape_cast %185 : vector<1x64x64xbf16> to vector<64x64xbf16>
    %187 = arith.truncf %124 : vector<64x16xf32> to vector<64x16xbf16>
    %cst_147 = arith.constant dense<0.000000e+00> : vector<64x16xf32>
    %188 = tpu.matmul %186, %187, %cst_147 {dimension_numbers = #tpu.dot_dimension_numbers<[1], [0], [0], [1], [0, 0, 1, 1], [], []>} : vector<64x64xbf16>, vector<64x16xbf16>, vector<64x16xf32> -> vector<64x16xf32>
    %c16 = arith.constant 16 : index
    %c0_148 = arith.constant 0 : index
    %c0_149 = arith.constant 0 : index
    %189 = vector.load %arg8[%c16, %c0_148, %c0_149] : memref<27x16x16xbf16, #tpu.memory_space<vmem>>, vector<1x16x16xbf16>
    %190 = vector.shape_cast %189 : vector<1x16x16xbf16> to vector<16x16xbf16>
    %191 = arith.truncf %188 : vector<64x16xf32> to vector<64x16xbf16>
    %cst_150 = arith.constant dense<0.000000e+00> : vector<64x16xf32>
    %192 = tpu.matmul %191, %190, %cst_150 {dimension_numbers = #tpu.dot_dimension_numbers<[1], [0], [0], [1], [0, 0, 1, 1], [], []>} : vector<64x16xbf16>, vector<16x16xbf16>, vector<64x16xf32> -> vector<64x16xf32>
    %193 = arith.addf %184, %192 : vector<64x16xf32>
    %c8_151 = arith.constant 8 : index
    %c0_152 = arith.constant 0 : index
    %c0_153 = arith.constant 0 : index
    %194 = vector.load %arg3[%c8_151, %c0_152, %c0_153] : memref<9x64x64xbf16, #tpu.memory_space<vmem>>, vector<1x64x64xbf16>
    %195 = vector.shape_cast %194 : vector<1x64x64xbf16> to vector<64x64xbf16>
    %196 = arith.truncf %124 : vector<64x16xf32> to vector<64x16xbf16>
    %cst_154 = arith.constant dense<0.000000e+00> : vector<64x16xf32>
    %197 = tpu.matmul %195, %196, %cst_154 {dimension_numbers = #tpu.dot_dimension_numbers<[1], [0], [0], [1], [0, 0, 1, 1], [], []>} : vector<64x64xbf16>, vector<64x16xbf16>, vector<64x16xf32> -> vector<64x16xf32>
    %c17 = arith.constant 17 : index
    %c0_155 = arith.constant 0 : index
    %c0_156 = arith.constant 0 : index
    %198 = vector.load %arg8[%c17, %c0_155, %c0_156] : memref<27x16x16xbf16, #tpu.memory_space<vmem>>, vector<1x16x16xbf16>
    %199 = vector.shape_cast %198 : vector<1x16x16xbf16> to vector<16x16xbf16>
    %200 = arith.truncf %197 : vector<64x16xf32> to vector<64x16xbf16>
    %cst_157 = arith.constant dense<0.000000e+00> : vector<64x16xf32>
    %201 = tpu.matmul %200, %199, %cst_157 {dimension_numbers = #tpu.dot_dimension_numbers<[1], [0], [0], [1], [0, 0, 1, 1], [], []>} : vector<64x16xbf16>, vector<16x16xbf16>, vector<64x16xf32> -> vector<64x16xf32>
    %202 = arith.addf %193, %201 : vector<64x16xf32>
    %c1_158 = arith.constant 1 : index
    %c0_159 = arith.constant 0 : index
    %c0_160 = arith.constant 0 : index
    %203 = vector.load %arg11[%c1_158, %c0_159, %c0_160] : memref<3x1x16xf32, #tpu.memory_space<vmem>>, vector<1x1x16xf32>
    %204 = vector.shape_cast %203 : vector<1x1x16xf32> to vector<1x16xf32>
    %205 = vector.broadcast %204 : vector<1x16xf32> to vector<64x16xf32>
    %206 = arith.addf %202, %205 : vector<64x16xf32>
    %cst_161 = arith.constant 0.000000e+00 : f32
    %207 = vector.broadcast %cst_161 : f32 to vector<64x16xf32>
    %208 = arith.maximumf %206, %207 : vector<64x16xf32>
    %c1_162 = arith.constant 1 : index
    %c0_163 = arith.constant 0 : index
    %c0_164 = arith.constant 0 : index
    %209 = vector.load %arg9[%c1_162, %c0_163, %c0_164] : memref<3x16x64xbf16, #tpu.memory_space<vmem>>, vector<1x16x64xbf16>
    %210 = vector.shape_cast %209 : vector<1x16x64xbf16> to vector<16x64xbf16>
    %211 = arith.truncf %208 : vector<64x16xf32> to vector<64x16xbf16>
    %cst_165 = arith.constant dense<0.000000e+00> : vector<64x64xf32>
    %212 = tpu.matmul %211, %210, %cst_165 {dimension_numbers = #tpu.dot_dimension_numbers<[1], [0], [0], [1], [0, 0, 1, 1], [], []>} : vector<64x16xbf16>, vector<16x64xbf16>, vector<64x64xf32> -> vector<64x64xf32>
    %c1_166 = arith.constant 1 : index
    %c0_167 = arith.constant 0 : index
    %c0_168 = arith.constant 0 : index
    %213 = vector.load %arg12[%c1_166, %c0_167, %c0_168] : memref<3x1x64xf32, #tpu.memory_space<vmem>>, vector<1x1x64xf32>
    %214 = vector.shape_cast %213 : vector<1x1x64xf32> to vector<1x64xf32>
    %215 = vector.broadcast %214 : vector<1x64xf32> to vector<64x64xf32>
    %216 = arith.addf %212, %215 : vector<64x64xf32>
    %217 = arith.addf %216, %114 : vector<64x64xf32>
    %cst_169 = arith.constant 0.000000e+00 : f32
    %218 = vector.broadcast %cst_169 : f32 to vector<64x64xf32>
    %219 = arith.maximumf %217, %218 : vector<64x64xf32>
    %c1_170 = arith.constant 1 : index
    %c0_171 = arith.constant 0 : index
    %c0_172 = arith.constant 0 : index
    %220 = vector.load %arg7[%c1_170, %c0_171, %c0_172] : memref<2x64x16xbf16, #tpu.memory_space<vmem>>, vector<1x64x16xbf16>
    %221 = vector.shape_cast %220 : vector<1x64x16xbf16> to vector<64x16xbf16>
    %222 = arith.truncf %219 : vector<64x64xf32> to vector<64x64xbf16>
    %cst_173 = arith.constant dense<0.000000e+00> : vector<64x16xf32>
    %223 = tpu.matmul %222, %221, %cst_173 {dimension_numbers = #tpu.dot_dimension_numbers<[1], [0], [0], [1], [0, 0, 1, 1], [], []>} : vector<64x64xbf16>, vector<64x16xbf16>, vector<64x16xf32> -> vector<64x16xf32>
    %c2_174 = arith.constant 2 : index
    %c0_175 = arith.constant 0 : index
    %c0_176 = arith.constant 0 : index
    %224 = vector.load %arg10[%c2_174, %c0_175, %c0_176] : memref<3x1x16xf32, #tpu.memory_space<vmem>>, vector<1x1x16xf32>
    %225 = vector.shape_cast %224 : vector<1x1x16xf32> to vector<1x16xf32>
    %226 = vector.broadcast %225 : vector<1x16xf32> to vector<64x16xf32>
    %227 = arith.addf %223, %226 : vector<64x16xf32>
    %cst_177 = arith.constant 0.000000e+00 : f32
    %228 = vector.broadcast %cst_177 : f32 to vector<64x16xf32>
    %229 = arith.maximumf %227, %228 : vector<64x16xf32>
    %cst_178 = arith.constant 0.000000e+00 : f32
    %230 = vector.broadcast %cst_178 : f32 to vector<64x16xf32>
    %c0_179 = arith.constant 0 : index
    %c0_180 = arith.constant 0 : index
    %c0_181 = arith.constant 0 : index
    %231 = vector.load %arg3[%c0_179, %c0_180, %c0_181] : memref<9x64x64xbf16, #tpu.memory_space<vmem>>, vector<1x64x64xbf16>
    %232 = vector.shape_cast %231 : vector<1x64x64xbf16> to vector<64x64xbf16>
    %233 = arith.truncf %229 : vector<64x16xf32> to vector<64x16xbf16>
    %cst_182 = arith.constant dense<0.000000e+00> : vector<64x16xf32>
    %234 = tpu.matmul %232, %233, %cst_182 {dimension_numbers = #tpu.dot_dimension_numbers<[1], [0], [0], [1], [0, 0, 1, 1], [], []>} : vector<64x64xbf16>, vector<64x16xbf16>, vector<64x16xf32> -> vector<64x16xf32>
    %c18 = arith.constant 18 : index
    %c0_183 = arith.constant 0 : index
    %c0_184 = arith.constant 0 : index
    %235 = vector.load %arg8[%c18, %c0_183, %c0_184] : memref<27x16x16xbf16, #tpu.memory_space<vmem>>, vector<1x16x16xbf16>
    %236 = vector.shape_cast %235 : vector<1x16x16xbf16> to vector<16x16xbf16>
    %237 = arith.truncf %234 : vector<64x16xf32> to vector<64x16xbf16>
    %cst_185 = arith.constant dense<0.000000e+00> : vector<64x16xf32>
    %238 = tpu.matmul %237, %236, %cst_185 {dimension_numbers = #tpu.dot_dimension_numbers<[1], [0], [0], [1], [0, 0, 1, 1], [], []>} : vector<64x16xbf16>, vector<16x16xbf16>, vector<64x16xf32> -> vector<64x16xf32>
    %239 = arith.addf %230, %238 : vector<64x16xf32>
    %c1_186 = arith.constant 1 : index
    %c0_187 = arith.constant 0 : index
    %c0_188 = arith.constant 0 : index
    %240 = vector.load %arg3[%c1_186, %c0_187, %c0_188] : memref<9x64x64xbf16, #tpu.memory_space<vmem>>, vector<1x64x64xbf16>
    %241 = vector.shape_cast %240 : vector<1x64x64xbf16> to vector<64x64xbf16>
    %242 = arith.truncf %229 : vector<64x16xf32> to vector<64x16xbf16>
    %cst_189 = arith.constant dense<0.000000e+00> : vector<64x16xf32>
    %243 = tpu.matmul %241, %242, %cst_189 {dimension_numbers = #tpu.dot_dimension_numbers<[1], [0], [0], [1], [0, 0, 1, 1], [], []>} : vector<64x64xbf16>, vector<64x16xbf16>, vector<64x16xf32> -> vector<64x16xf32>
    %c19 = arith.constant 19 : index
    %c0_190 = arith.constant 0 : index
    %c0_191 = arith.constant 0 : index
    %244 = vector.load %arg8[%c19, %c0_190, %c0_191] : memref<27x16x16xbf16, #tpu.memory_space<vmem>>, vector<1x16x16xbf16>
    %245 = vector.shape_cast %244 : vector<1x16x16xbf16> to vector<16x16xbf16>
    %246 = arith.truncf %243 : vector<64x16xf32> to vector<64x16xbf16>
    %cst_192 = arith.constant dense<0.000000e+00> : vector<64x16xf32>
    %247 = tpu.matmul %246, %245, %cst_192 {dimension_numbers = #tpu.dot_dimension_numbers<[1], [0], [0], [1], [0, 0, 1, 1], [], []>} : vector<64x16xbf16>, vector<16x16xbf16>, vector<64x16xf32> -> vector<64x16xf32>
    %248 = arith.addf %239, %247 : vector<64x16xf32>
    %c2_193 = arith.constant 2 : index
    %c0_194 = arith.constant 0 : index
    %c0_195 = arith.constant 0 : index
    %249 = vector.load %arg3[%c2_193, %c0_194, %c0_195] : memref<9x64x64xbf16, #tpu.memory_space<vmem>>, vector<1x64x64xbf16>
    %250 = vector.shape_cast %249 : vector<1x64x64xbf16> to vector<64x64xbf16>
    %251 = arith.truncf %229 : vector<64x16xf32> to vector<64x16xbf16>
    %cst_196 = arith.constant dense<0.000000e+00> : vector<64x16xf32>
    %252 = tpu.matmul %250, %251, %cst_196 {dimension_numbers = #tpu.dot_dimension_numbers<[1], [0], [0], [1], [0, 0, 1, 1], [], []>} : vector<64x64xbf16>, vector<64x16xbf16>, vector<64x16xf32> -> vector<64x16xf32>
    %c20 = arith.constant 20 : index
    %c0_197 = arith.constant 0 : index
    %c0_198 = arith.constant 0 : index
    %253 = vector.load %arg8[%c20, %c0_197, %c0_198] : memref<27x16x16xbf16, #tpu.memory_space<vmem>>, vector<1x16x16xbf16>
    %254 = vector.shape_cast %253 : vector<1x16x16xbf16> to vector<16x16xbf16>
    %255 = arith.truncf %252 : vector<64x16xf32> to vector<64x16xbf16>
    %cst_199 = arith.constant dense<0.000000e+00> : vector<64x16xf32>
    %256 = tpu.matmul %255, %254, %cst_199 {dimension_numbers = #tpu.dot_dimension_numbers<[1], [0], [0], [1], [0, 0, 1, 1], [], []>} : vector<64x16xbf16>, vector<16x16xbf16>, vector<64x16xf32> -> vector<64x16xf32>
    %257 = arith.addf %248, %256 : vector<64x16xf32>
    %c3_200 = arith.constant 3 : index
    %c0_201 = arith.constant 0 : index
    %c0_202 = arith.constant 0 : index
    %258 = vector.load %arg3[%c3_200, %c0_201, %c0_202] : memref<9x64x64xbf16, #tpu.memory_space<vmem>>, vector<1x64x64xbf16>
    %259 = vector.shape_cast %258 : vector<1x64x64xbf16> to vector<64x64xbf16>
    %260 = arith.truncf %229 : vector<64x16xf32> to vector<64x16xbf16>
    %cst_203 = arith.constant dense<0.000000e+00> : vector<64x16xf32>
    %261 = tpu.matmul %259, %260, %cst_203 {dimension_numbers = #tpu.dot_dimension_numbers<[1], [0], [0], [1], [0, 0, 1, 1], [], []>} : vector<64x64xbf16>, vector<64x16xbf16>, vector<64x16xf32> -> vector<64x16xf32>
    %c21 = arith.constant 21 : index
    %c0_204 = arith.constant 0 : index
    %c0_205 = arith.constant 0 : index
    %262 = vector.load %arg8[%c21, %c0_204, %c0_205] : memref<27x16x16xbf16, #tpu.memory_space<vmem>>, vector<1x16x16xbf16>
    %263 = vector.shape_cast %262 : vector<1x16x16xbf16> to vector<16x16xbf16>
    %264 = arith.truncf %261 : vector<64x16xf32> to vector<64x16xbf16>
    %cst_206 = arith.constant dense<0.000000e+00> : vector<64x16xf32>
    %265 = tpu.matmul %264, %263, %cst_206 {dimension_numbers = #tpu.dot_dimension_numbers<[1], [0], [0], [1], [0, 0, 1, 1], [], []>} : vector<64x16xbf16>, vector<16x16xbf16>, vector<64x16xf32> -> vector<64x16xf32>
    %266 = arith.addf %257, %265 : vector<64x16xf32>
    %c22 = arith.constant 22 : index
    %c0_207 = arith.constant 0 : index
    %c0_208 = arith.constant 0 : index
    %267 = vector.load %arg8[%c22, %c0_207, %c0_208] : memref<27x16x16xbf16, #tpu.memory_space<vmem>>, vector<1x16x16xbf16>
    %268 = vector.shape_cast %267 : vector<1x16x16xbf16> to vector<16x16xbf16>
    %269 = arith.truncf %229 : vector<64x16xf32> to vector<64x16xbf16>
    %cst_209 = arith.constant dense<0.000000e+00> : vector<64x16xf32>
    %270 = tpu.matmul %269, %268, %cst_209 {dimension_numbers = #tpu.dot_dimension_numbers<[1], [0], [0], [1], [0, 0, 1, 1], [], []>} : vector<64x16xbf16>, vector<16x16xbf16>, vector<64x16xf32> -> vector<64x16xf32>
    %271 = arith.addf %266, %270 : vector<64x16xf32>
    %c5_210 = arith.constant 5 : index
    %c0_211 = arith.constant 0 : index
    %c0_212 = arith.constant 0 : index
    %272 = vector.load %arg3[%c5_210, %c0_211, %c0_212] : memref<9x64x64xbf16, #tpu.memory_space<vmem>>, vector<1x64x64xbf16>
    %273 = vector.shape_cast %272 : vector<1x64x64xbf16> to vector<64x64xbf16>
    %274 = arith.truncf %229 : vector<64x16xf32> to vector<64x16xbf16>
    %cst_213 = arith.constant dense<0.000000e+00> : vector<64x16xf32>
    %275 = tpu.matmul %273, %274, %cst_213 {dimension_numbers = #tpu.dot_dimension_numbers<[1], [0], [0], [1], [0, 0, 1, 1], [], []>} : vector<64x64xbf16>, vector<64x16xbf16>, vector<64x16xf32> -> vector<64x16xf32>
    %c23 = arith.constant 23 : index
    %c0_214 = arith.constant 0 : index
    %c0_215 = arith.constant 0 : index
    %276 = vector.load %arg8[%c23, %c0_214, %c0_215] : memref<27x16x16xbf16, #tpu.memory_space<vmem>>, vector<1x16x16xbf16>
    %277 = vector.shape_cast %276 : vector<1x16x16xbf16> to vector<16x16xbf16>
    %278 = arith.truncf %275 : vector<64x16xf32> to vector<64x16xbf16>
    %cst_216 = arith.constant dense<0.000000e+00> : vector<64x16xf32>
    %279 = tpu.matmul %278, %277, %cst_216 {dimension_numbers = #tpu.dot_dimension_numbers<[1], [0], [0], [1], [0, 0, 1, 1], [], []>} : vector<64x16xbf16>, vector<16x16xbf16>, vector<64x16xf32> -> vector<64x16xf32>
    %280 = arith.addf %271, %279 : vector<64x16xf32>
    %c6_217 = arith.constant 6 : index
    %c0_218 = arith.constant 0 : index
    %c0_219 = arith.constant 0 : index
    %281 = vector.load %arg3[%c6_217, %c0_218, %c0_219] : memref<9x64x64xbf16, #tpu.memory_space<vmem>>, vector<1x64x64xbf16>
    %282 = vector.shape_cast %281 : vector<1x64x64xbf16> to vector<64x64xbf16>
    %283 = arith.truncf %229 : vector<64x16xf32> to vector<64x16xbf16>
    %cst_220 = arith.constant dense<0.000000e+00> : vector<64x16xf32>
    %284 = tpu.matmul %282, %283, %cst_220 {dimension_numbers = #tpu.dot_dimension_numbers<[1], [0], [0], [1], [0, 0, 1, 1], [], []>} : vector<64x64xbf16>, vector<64x16xbf16>, vector<64x16xf32> -> vector<64x16xf32>
    %c24 = arith.constant 24 : index
    %c0_221 = arith.constant 0 : index
    %c0_222 = arith.constant 0 : index
    %285 = vector.load %arg8[%c24, %c0_221, %c0_222] : memref<27x16x16xbf16, #tpu.memory_space<vmem>>, vector<1x16x16xbf16>
    %286 = vector.shape_cast %285 : vector<1x16x16xbf16> to vector<16x16xbf16>
    %287 = arith.truncf %284 : vector<64x16xf32> to vector<64x16xbf16>
    %cst_223 = arith.constant dense<0.000000e+00> : vector<64x16xf32>
    %288 = tpu.matmul %287, %286, %cst_223 {dimension_numbers = #tpu.dot_dimension_numbers<[1], [0], [0], [1], [0, 0, 1, 1], [], []>} : vector<64x16xbf16>, vector<16x16xbf16>, vector<64x16xf32> -> vector<64x16xf32>
    %289 = arith.addf %280, %288 : vector<64x16xf32>
    %c7_224 = arith.constant 7 : index
    %c0_225 = arith.constant 0 : index
    %c0_226 = arith.constant 0 : index
    %290 = vector.load %arg3[%c7_224, %c0_225, %c0_226] : memref<9x64x64xbf16, #tpu.memory_space<vmem>>, vector<1x64x64xbf16>
    %291 = vector.shape_cast %290 : vector<1x64x64xbf16> to vector<64x64xbf16>
    %292 = arith.truncf %229 : vector<64x16xf32> to vector<64x16xbf16>
    %cst_227 = arith.constant dense<0.000000e+00> : vector<64x16xf32>
    %293 = tpu.matmul %291, %292, %cst_227 {dimension_numbers = #tpu.dot_dimension_numbers<[1], [0], [0], [1], [0, 0, 1, 1], [], []>} : vector<64x64xbf16>, vector<64x16xbf16>, vector<64x16xf32> -> vector<64x16xf32>
    %c25 = arith.constant 25 : index
    %c0_228 = arith.constant 0 : index
    %c0_229 = arith.constant 0 : index
    %294 = vector.load %arg8[%c25, %c0_228, %c0_229] : memref<27x16x16xbf16, #tpu.memory_space<vmem>>, vector<1x16x16xbf16>
    %295 = vector.shape_cast %294 : vector<1x16x16xbf16> to vector<16x16xbf16>
    %296 = arith.truncf %293 : vector<64x16xf32> to vector<64x16xbf16>
    %cst_230 = arith.constant dense<0.000000e+00> : vector<64x16xf32>
    %297 = tpu.matmul %296, %295, %cst_230 {dimension_numbers = #tpu.dot_dimension_numbers<[1], [0], [0], [1], [0, 0, 1, 1], [], []>} : vector<64x16xbf16>, vector<16x16xbf16>, vector<64x16xf32> -> vector<64x16xf32>
    %298 = arith.addf %289, %297 : vector<64x16xf32>
    %c8_231 = arith.constant 8 : index
    %c0_232 = arith.constant 0 : index
    %c0_233 = arith.constant 0 : index
    %299 = vector.load %arg3[%c8_231, %c0_232, %c0_233] : memref<9x64x64xbf16, #tpu.memory_space<vmem>>, vector<1x64x64xbf16>
    %300 = vector.shape_cast %299 : vector<1x64x64xbf16> to vector<64x64xbf16>
    %301 = arith.truncf %229 : vector<64x16xf32> to vector<64x16xbf16>
    %cst_234 = arith.constant dense<0.000000e+00> : vector<64x16xf32>
    %302 = tpu.matmul %300, %301, %cst_234 {dimension_numbers = #tpu.dot_dimension_numbers<[1], [0], [0], [1], [0, 0, 1, 1], [], []>} : vector<64x64xbf16>, vector<64x16xbf16>, vector<64x16xf32> -> vector<64x16xf32>
    %c26 = arith.constant 26 : index
    %c0_235 = arith.constant 0 : index
    %c0_236 = arith.constant 0 : index
    %303 = vector.load %arg8[%c26, %c0_235, %c0_236] : memref<27x16x16xbf16, #tpu.memory_space<vmem>>, vector<1x16x16xbf16>
    %304 = vector.shape_cast %303 : vector<1x16x16xbf16> to vector<16x16xbf16>
    %305 = arith.truncf %302 : vector<64x16xf32> to vector<64x16xbf16>
    %cst_237 = arith.constant dense<0.000000e+00> : vector<64x16xf32>
    %306 = tpu.matmul %305, %304, %cst_237 {dimension_numbers = #tpu.dot_dimension_numbers<[1], [0], [0], [1], [0, 0, 1, 1], [], []>} : vector<64x16xbf16>, vector<16x16xbf16>, vector<64x16xf32> -> vector<64x16xf32>
    %307 = arith.addf %298, %306 : vector<64x16xf32>
    %c2_238 = arith.constant 2 : index
    %c0_239 = arith.constant 0 : index
    %c0_240 = arith.constant 0 : index
    %308 = vector.load %arg11[%c2_238, %c0_239, %c0_240] : memref<3x1x16xf32, #tpu.memory_space<vmem>>, vector<1x1x16xf32>
    %309 = vector.shape_cast %308 : vector<1x1x16xf32> to vector<1x16xf32>
    %310 = vector.broadcast %309 : vector<1x16xf32> to vector<64x16xf32>
    %311 = arith.addf %307, %310 : vector<64x16xf32>
    %cst_241 = arith.constant 0.000000e+00 : f32
    %312 = vector.broadcast %cst_241 : f32 to vector<64x16xf32>
    %313 = arith.maximumf %311, %312 : vector<64x16xf32>
    %c2_242 = arith.constant 2 : index
    %c0_243 = arith.constant 0 : index
    %c0_244 = arith.constant 0 : index
    %314 = vector.load %arg9[%c2_242, %c0_243, %c0_244] : memref<3x16x64xbf16, #tpu.memory_space<vmem>>, vector<1x16x64xbf16>
    %315 = vector.shape_cast %314 : vector<1x16x64xbf16> to vector<16x64xbf16>
    %316 = arith.truncf %313 : vector<64x16xf32> to vector<64x16xbf16>
    %cst_245 = arith.constant dense<0.000000e+00> : vector<64x64xf32>
    %317 = tpu.matmul %316, %315, %cst_245 {dimension_numbers = #tpu.dot_dimension_numbers<[1], [0], [0], [1], [0, 0, 1, 1], [], []>} : vector<64x16xbf16>, vector<16x64xbf16>, vector<64x64xf32> -> vector<64x64xf32>
    %c2_246 = arith.constant 2 : index
    %c0_247 = arith.constant 0 : index
    %c0_248 = arith.constant 0 : index
    %318 = vector.load %arg12[%c2_246, %c0_247, %c0_248] : memref<3x1x64xf32, #tpu.memory_space<vmem>>, vector<1x1x64xf32>
    %319 = vector.shape_cast %318 : vector<1x1x64xf32> to vector<1x64xf32>
    %320 = vector.broadcast %319 : vector<1x64xf32> to vector<64x64xf32>
    %321 = arith.addf %317, %320 : vector<64x64xf32>
    %322 = arith.addf %321, %219 : vector<64x64xf32>
    %cst_249 = arith.constant 0.000000e+00 : f32
    %323 = vector.broadcast %cst_249 : f32 to vector<64x64xf32>
    %324 = arith.maximumf %322, %323 : vector<64x64xf32>
    %c0_250 = arith.constant 0 : index
    %c0_251 = arith.constant 0 : index
    %325 = vector.load %arg4[%c0_250, %c0_251] : memref<4x64xbf16, #tpu.memory_space<vmem>>, vector<4x64xbf16>
    %326 = arith.truncf %324 : vector<64x64xf32> to vector<64x64xbf16>
    %cst_252 = arith.constant dense<0.000000e+00> : vector<4x64xf32>
    %327 = tpu.matmul %325, %326, %cst_252 {dimension_numbers = #tpu.dot_dimension_numbers<[1], [0], [0], [1], [0, 0, 1, 1], [], []>} : vector<4x64xbf16>, vector<64x64xbf16>, vector<4x64xf32> -> vector<4x64xf32>
    %c0_253 = arith.constant 0 : index
    %c0_254 = arith.constant 0 : index
    %328 = vector.load %arg14[%c0_253, %c0_254] : memref<64x128xbf16, #tpu.memory_space<vmem>>, vector<64x128xbf16>
    %329 = arith.truncf %327 : vector<4x64xf32> to vector<4x64xbf16>
    %cst_255 = arith.constant dense<0.000000e+00> : vector<4x128xf32>
    %330 = tpu.matmul %329, %328, %cst_255 {dimension_numbers = #tpu.dot_dimension_numbers<[1], [0], [0], [1], [0, 0, 1, 1], [], []>} : vector<4x64xbf16>, vector<64x128xbf16>, vector<4x128xf32> -> vector<4x128xf32>
    %c0_256 = arith.constant 0 : index
    %c0_257 = arith.constant 0 : index
    %331 = vector.load %arg15[%c0_256, %c0_257] : memref<1x128xf32, #tpu.memory_space<vmem>>, vector<1x128xf32>
    %332 = vector.broadcast %331 : vector<1x128xf32> to vector<4x128xf32>
    %333 = arith.addf %330, %332 : vector<4x128xf32>
    %c0_258 = arith.constant 0 : index
    %c0_259 = arith.constant 0 : index
    %c0_260 = arith.constant 0 : index
    %334 = vector.load %arg16[%c0_258, %c0_259, %c0_260] : memref<1x4x128xf32, #tpu.memory_space<vmem>>, vector<1x4x128xf32>
    %335 = vector.shape_cast %334 : vector<1x4x128xf32> to vector<4x128xf32>
    %336 = vector.shape_cast %333 : vector<4x128xf32> to vector<1x4x128xf32>
    tpu.vector_store %arg16[%c0_258, %c0_259, %c0_260], %336 {strides = array<i32>} : memref<1x4x128xf32, #tpu.memory_space<vmem>>, vector<1x4x128xf32>,
    return
  }
  func.func @transform_0(%arg0: i32) -> (i32, i32, i32) {
    %c0_i32 = arith.constant 0 : i32
    %c0_i32_0 = arith.constant 0 : i32
    %c0_i32_1 = arith.constant 0 : i32
    return %arg0, %c0_i32, %c0_i32_0 : i32, i32, i32
  }
  func.func @transform_1(%arg0: i32) -> (i32, i32, i32) {
    %c0_i32 = arith.constant 0 : i32
    %c0_i32_0 = arith.constant 0 : i32
    %c0_i32_1 = arith.constant 0 : i32
    return %arg0, %c0_i32, %c0_i32_0 : i32, i32, i32
  }
  func.func @transform_2(%arg0: i32) -> (i32, i32, i32) {
    %c0_i32 = arith.constant 0 : i32
    %c0_i32_0 = arith.constant 0 : i32
    %c0_i32_1 = arith.constant 0 : i32
    %c0_i32_2 = arith.constant 0 : i32
    return %c0_i32, %c0_i32_0, %c0_i32_1 : i32, i32, i32
  }
  func.func @transform_3(%arg0: i32) -> (i32, i32) {
    %c0_i32 = arith.constant 0 : i32
    %c0_i32_0 = arith.constant 0 : i32
    %c0_i32_1 = arith.constant 0 : i32
    return %c0_i32, %c0_i32_0 : i32, i32
  }
  func.func @transform_4(%arg0: i32) -> (i32, i32) {
    %c0_i32 = arith.constant 0 : i32
    %c0_i32_0 = arith.constant 0 : i32
    %c0_i32_1 = arith.constant 0 : i32
    return %c0_i32, %c0_i32_0 : i32, i32
  }
  func.func @transform_5(%arg0: i32) -> (i32, i32) {
    %c0_i32 = arith.constant 0 : i32
    %c0_i32_0 = arith.constant 0 : i32
    %c0_i32_1 = arith.constant 0 : i32
    return %c0_i32, %c0_i32_0 : i32, i32
  }
  func.func @transform_6(%arg0: i32) -> (i32, i32, i32) {
    %c0_i32 = arith.constant 0 : i32
    %c0_i32_0 = arith.constant 0 : i32
    %c0_i32_1 = arith.constant 0 : i32
    %c0_i32_2 = arith.constant 0 : i32
    return %c0_i32, %c0_i32_0, %c0_i32_1 : i32, i32, i32
  }
  func.func @transform_7(%arg0: i32) -> (i32, i32, i32) {
    %c0_i32 = arith.constant 0 : i32
    %c0_i32_0 = arith.constant 0 : i32
    %c0_i32_1 = arith.constant 0 : i32
    %c0_i32_2 = arith.constant 0 : i32
    return %c0_i32, %c0_i32_0, %c0_i32_1 : i32, i32, i32
  }
  func.func @transform_8(%arg0: i32) -> (i32, i32, i32) {
    %c0_i32 = arith.constant 0 : i32
    %c0_i32_0 = arith.constant 0 : i32
    %c0_i32_1 = arith.constant 0 : i32
    %c0_i32_2 = arith.constant 0 : i32
    return %c0_i32, %c0_i32_0, %c0_i32_1 : i32, i32, i32
  }
  func.func @transform_9(%arg0: i32) -> (i32, i32, i32) {
    %c0_i32 = arith.constant 0 : i32
    %c0_i32_0 = arith.constant 0 : i32
    %c0_i32_1 = arith.constant 0 : i32
    %c0_i32_2 = arith.constant 0 : i32
    return %c0_i32, %c0_i32_0, %c0_i32_1 : i32, i32, i32
  }
  func.func @transform_10(%arg0: i32) -> (i32, i32, i32) {
    %c0_i32 = arith.constant 0 : i32
    %c0_i32_0 = arith.constant 0 : i32
    %c0_i32_1 = arith.constant 0 : i32
    %c0_i32_2 = arith.constant 0 : i32
    return %c0_i32, %c0_i32_0, %c0_i32_1 : i32, i32, i32
  }
  func.func @transform_11(%arg0: i32) -> (i32, i32, i32) {
    %c0_i32 = arith.constant 0 : i32
    %c0_i32_0 = arith.constant 0 : i32
    %c0_i32_1 = arith.constant 0 : i32
    %c0_i32_2 = arith.constant 0 : i32
    return %c0_i32, %c0_i32_0, %c0_i32_1 : i32, i32, i32
  }
  func.func @transform_12(%arg0: i32) -> (i32, i32) {
    %c0_i32 = arith.constant 0 : i32
    %c0_i32_0 = arith.constant 0 : i32
    %c0_i32_1 = arith.constant 0 : i32
    return %c0_i32, %c0_i32_0 : i32, i32
  }
  func.func @transform_13(%arg0: i32) -> (i32, i32) {
    %c0_i32 = arith.constant 0 : i32
    %c0_i32_0 = arith.constant 0 : i32
    %c0_i32_1 = arith.constant 0 : i32
    return %c0_i32, %c0_i32_0 : i32, i32
  }
  func.func @transform_14(%arg0: i32) -> (i32, i32) {
    %c0_i32 = arith.constant 0 : i32
    %c0_i32_0 = arith.constant 0 : i32
    %c0_i32_1 = arith.constant 0 : i32
    return %c0_i32, %c0_i32_0 : i32, i32
  }
  func.func @transform_15(%arg0: i32) -> (i32, i32, i32) {
    %c0_i32 = arith.constant 0 : i32
    %c0_i32_0 = arith.constant 0 : i32
    %c0_i32_1 = arith.constant 0 : i32
    return %arg0, %c0_i32, %c0_i32_0 : i32, i32, i32
  }
}

</mosaic_0001>

<bundles_post_ra>
// kernel: res5_roi_heads_forward.1
= control target key start
LH: loop header
LB: loop body
LE: loop exit
PB: predicated region body
PF: predicated region fallthrough
CT: control target
= control target key end

     0   :  { %s5150_s18 = smov 0   ;;  %s6480_s0 = inlined_call_operand.vmem [shape: bf16[2,64,256], index: 0, kind: input, shape index: {}]   ;;  %s6481_s1 = inlined_call_operand.vmem [shape: bf16[2,256,32], index: 1, kind: input, shape index: {}]   ;;  %s6482_s2 = inlined_call_operand.vmem [shape: bf16[9,64,64], index: 2, kind: input, shape index: {}]   ;;  %s6483_s3 = inlined_call_operand.vmem [shape: bf16[4,64], index: 3, kind: input, shape index: {}]   ;;  %s6484_s4 = inlined_call_operand.vmem [shape: bf16[32,16], index: 4, kind: input, shape index: {}]   ;;  %s6485_s5 = inlined_call_operand.vmem [shape: bf16[32,64], index: 5, kind: input, shape index: {}]   ;;  %s6486_s6 = inlined_call_operand.vmem [shape: bf16[2,64,16], index: 6, kind: input, shape index: {}]   ;;  %s6487_s7 = inlined_call_operand.vmem [shape: bf16[27,16,16], index: 7, kind: input, shape index: {}]   ;;  %s6488_s8 = inlined_call_operand.vmem [shape: bf16[3,16,64], index: 8, kind: input, shape index: {}]   ;;  %s6489_s9 = inlined_call_operand.vmem [shape: f32[3,1,16], index: 9, kind: input, shape index: {}]   ;;  %s6490_s10 = inlined_call_operand.vmem [shape: f32[3,1,16], index: 10, kind: input, shape index: {}]   ;;  %s6491_s11 = inlined_call_operand.vmem [shape: f32[3,1,64], index: 11, kind: input, shape index: {}]   ;;  %s6492_s12 = inlined_call_operand.vmem [shape: f32[1,64], index: 12, kind: input, shape index: {}]   ;;  %s6493_s13 = inlined_call_operand.vmem [shape: bf16[64,128], index: 13, kind: input, shape index: {}]   ;;  %s6494_s14 = inlined_call_operand.vmem [shape: f32[1,128], index: 14, kind: input, shape index: {}]   ;;  %s6495_s15 = inlined_call_operand.vmem [shape: f32[2,4,128], index: 15, kind: output, shape index: {}]  }
   0x1 LB: > { %s4127_s19 = sadd.s32 4294967295, %s5068_s18   ;;  %p4131_p0 = scmp.ge.s32.totalorder %s5068_s18, 1  ;;  %s5068_s18 = sphi %s5150_s18, %s25_s18  }
   0x2   : > { %p447_p1 = scmp.lt.s32.totalorder %s5068_s18, 3 }
   0x4   : > { %p448_p2 = pnand %p4131_p0, %p447_p1 }
   0x6   : > { %451 = sbr.rel (%p448_p2) target bundleno = 3845 (0xf05), region = 80 }
   0xb   : > { %p499_p3 = scmp.lt.s32.totalorder %s4127_s19, 1  ;;  %v4934_v40 = vld [vmem:[%s6485_s5 + $0x8] sm:$0xff]  ;;  %v4933_v42 = vld [vmem:[%s6485_s5] sm:$0xff]  ;;  %vm772_vm0 = vcmask 261120   ;;  %vm903_vm1 = vcmask 523264   ;;  %vm1034_vm2 = vcmask 130048  }
   0xc   : > { %v4936_v41 = vld [vmem:[%s6484_s4 + $0x8] sm:$0xff]  ;;  %791 = vmatpush.bf16.msra.mxu2 %v4934_v40  ;;  %v4935_v43 = vld [vmem:[%s6484_s4] sm:$0xff] }
   0xd   : > { %s6560_s19 = smov (!%p499_p3, %s4127_s19), 1  ;;  %840 = vmatpush.bf16.msra.mxu3 %v4936_v41  ;;  %v5258_v40 = vld [vmem:[%s6482_s2 + $0x20] sm:$0xff]  ;;  %v5277_v41 = vld [vmem:[%s6482_s2 + $0x8] sm:$0xff] }
   0xe   : > { %s4908_s20 = sshll.u32 %s6560_s19, 7  ;;  %s4907_s24 = sshll.u32 %s6560_s19, 6 }
   0xf   : > { %s5164_s23 = scalar_lea.vmem %s6481_s1, %s4908_s20  ;;  %s5184_s27 = scalar_lea.vmem %s6480_s0, %s4907_s24 }
  0x10   : > { %v4924_v0 = vld [vmem:[%s5164_s23 + $0x38] sm:$0xff]  ;;  %v4923_v2 = vld [vmem:[%s5164_s23 + $0x30] sm:$0xff]  ;;  %v4922_v4 = vld [vmem:[%s5164_s23 + $0x28] sm:$0xff]  ;;  %792 = vmatpush.bf16.msra.mxu2 %v4933_v42 }
  0x11   : > { %v4932_v1 = vld [vmem:[%s5164_s23 + $0x78] sm:$0xff]  ;;  %690 = vmatpush.bf16.msra.mxu0 %v4924_v0  ;;  %v4931_v3 = vld [vmem:[%s5164_s23 + $0x70] sm:$0xff]  ;;  %v4930_v5 = vld [vmem:[%s5164_s23 + $0x68] sm:$0xff]  ;;  %841 = vmatpush.bf16.msra.mxu3 %v4935_v43 }
  0x12   : > { %719 = vmatpush.bf16.msra.mxu1 %v4932_v1  ;;  %v4921_v6 = vld [vmem:[%s5164_s23 + $0x20] sm:$0xff]  ;;  %v4920_v8 = vld [vmem:[%s5164_s23 + $0x18] sm:$0xff]  ;;  %v4919_v10 = vld [vmem:[%s5164_s23 + $0x10] sm:$0xff] }
  0x13   : > { %v4929_v7 = vld [vmem:[%s5164_s23 + $0x60] sm:$0xff]  ;;  %v4928_v9 = vld [vmem:[%s5164_s23 + $0x58] sm:$0xff]  ;;  %v4927_v11 = vld [vmem:[%s5164_s23 + $0x50] sm:$0xff] }
  0x14   : > { %v4918_v12 = vld [vmem:[%s5164_s23 + $0x8] sm:$0xff]  ;;  %v4917_v14 = vld [vmem:[%s5164_s23] sm:$0xff]  ;;  %v4147_v22 = vld [vmem:[%s5184_s27 + $0x10] sm:$0xf] }
  0x15   : > { %691 = vmatpush.bf16.msra.mxu0 %v4923_v2  ;;  %v4926_v13 = vld [vmem:[%s5164_s23 + $0x48] sm:$0xff]  ;;  %v4925_v15 = vld [vmem:[%s5164_s23 + $0x40] sm:$0xff]  ;;  %v4912_v23 = vld [vmem:[%s5184_s27 + $0x14] sm:$0xf0]  ;;  %s4136_s23 = sshll.u32 %s6560_s19, 2 }
  0x16   : > { %720 = vmatpush.bf16.msra.mxu1 %v4931_v3  ;;  %v4139_v16 = vld [vmem:[%s5184_s27] sm:$0xf]  ;;  %v4910_v17 = vld [vmem:[%s5184_s27 + $0x4] sm:$0xf0]  ;;  %v4909_v18 = vld [vmem:[%s5184_s27 + $0x4] sm:$0xf]  ;;  %v4148_v26 = vor.u32 %v4912_v23, %v4147_v22  ;;  %s512_s28 = scalar_lea.vmem %s6495_s15, %s4136_s23 }
  0x17   : > { %v4141_v19 = vld [vmem:[%s5184_s27 + $0x8] sm:$0xf0]  ;;  %v4140_v20 = vor.u32 %v4910_v17, %v4139_v16  ;;  %v4911_v24 = vld [vmem:[%s5184_s27 + $0x14] sm:$0xf]  ;;  %v4149_v25 = vld [vmem:[%s5184_s27 + $0x18] sm:$0xf0] }
  0x18   : > { %v4144_v21 = vor.u32 %v4909_v18, %v4141_v19  ;;  %v4152_v27 = vor.u32 %v4911_v24, %v4149_v25  ;;  %v4155_v28 = vld [vmem:[%s5184_s27 + $0x20] sm:$0xf]  ;;  %v4914_v29 = vld [vmem:[%s5184_s27 + $0x24] sm:$0xf0]  ;;  %v4913_v30 = vld [vmem:[%s5184_s27 + $0x24] sm:$0xf] }
  0x19   : > { %692 = vmatpush.bf16.msra.mxu0 %v4922_v4  ;;  %v4157_v31 = vld [vmem:[%s5184_s27 + $0x28] sm:$0xf0]  ;;  %v4156_v32 = vor.u32 %v4914_v29, %v4155_v28  ;;  %v4163_v34 = vld [vmem:[%s5184_s27 + $0x30] sm:$0xf]  ;;  %v4916_v35 = vld [vmem:[%s5184_s27 + $0x34] sm:$0xf0] }
  0x1a   : > { %721 = vmatpush.bf16.msra.mxu1 %v4930_v5  ;;  %v4160_v33 = vor.u32 %v4913_v30, %v4157_v31  ;;  %v4915_v36 = vld [vmem:[%s5184_s27 + $0x34] sm:$0xf]  ;;  %v4165_v37 = vld [vmem:[%s5184_s27 + $0x38] sm:$0xf0]  ;;  %v4164_v38 = vor.u32 %v4916_v35, %v4163_v34  ;;  %v5020_v16 = vld [vmem:[%s6489_s9] ss:$0 sm:$0xff] }
  0x1b   : > { %v4168_v39 = vor.u32 %v4915_v36, %v4165_v37  ;;  %v5282_v42 = vld [vmem:[%s6482_s2 + $0x28] sm:$0xff]  ;;  %v5292_v43 = vld [vmem:[%s6482_s2 + $0x10] sm:$0xff] }
  0x1d   : > { %693 = vmatpush.bf16.msra.mxu0 %v4921_v6 }
  0x1e   : > { %722 = vmatpush.bf16.msra.mxu1 %v4929_v7 }
  0x21   : > { %694 = vmatpush.bf16.msra.mxu0 %v4920_v8 }
  0x22   : > { %723 = vmatpush.bf16.msra.mxu1 %v4928_v9 }
  0x25   : > { %695 = vmatpush.bf16.msra.mxu0 %v4919_v10 }
  0x26   : > { %724 = vmatpush.bf16.msra.mxu1 %v4927_v11 }
  0x29   : > { %696 = vmatpush.bf16.msra.mxu0 %v4918_v12  ;;  %v4946_v12 = vld [vmem:[%s6487_s7 + $0x8] sm:$0xff] }
  0x2a   : > { %725 = vmatpush.bf16.msra.mxu1 %v4926_v13 }
  0x2d   : > { %697 = vmatpush.bf16.msra.mxu0 %v4917_v14 }
  0x2e   : > { %726 = vmatpush.bf16.msra.mxu1 %v4925_v15 }
  0x30   : > { %698 = vmatmul.bf16.vlgmr.msra.gmra.mxu0 %v4140_v20 }
  0x31   : > { %727 = vmatmul.bf16.vlgmr.msra.gmra.mxu1 %v4144_v21  ;;  %1054 = vmatpush.bf16.msrb.mxu0 %v4946_v12 }
  0x40   : > { %703 = vmatmul.bf16.gmra.mxu0 %v4148_v26 }
  0x41   : > { %732 = vmatmul.bf16.gmra.mxu1 %v4152_v27 }
  0x50   : > { %708 = vmatmul.bf16.gmra.mxu0 %v4156_v32 }
  0x51   : > { %737 = vmatmul.bf16.gmra.mxu1 %v4160_v33 }
  0x60   : > { %713 = vmatmul.bf16.gmra.mxu0 %v4164_v38  ;;  %v4951_v38 = vld [vmem:[%s6487_s7 + $0x10] sm:$0xff] }
  0x61   : > { %742 = vmatmul.bf16.gmra.mxu1 %v4168_v39  ;;  %v5253_v39 = vld [vmem:[%s6482_s2] sm:$0xff] }
  0xad   : > { %v699_v44 = vpop.f32.mrf.mxu0 }
  0xae   : > { %v728_v45 = vpop.f32.mrf.mxu1 }
  0xaf   : > { %v729_v48 = vadd.f32 %v728_v45, %v699_v44  ;;  %v5297_v44 = vld [vmem:[%s6482_s2 + $0x30] sm:$0xff]  ;;  %v5306_v45 = vld [vmem:[%s6482_s2 + $0x18] sm:$0xff] }
  0xb5   : > { %v701_v46 = vpop.f32.mrf.mxu0 }
  0xb6   : > { %v730_v47 = vpop.f32.mrf.mxu1 }
  0xb7   : > { %v731_v49 = vadd.f32 %v730_v47, %v701_v46  ;;  %v5311_v46 = vld [vmem:[%s6482_s2 + $0x38] sm:$0xff] }
  0xb9   : > { %v752_v50 = vpack.c.bf16 %v731_v49, %v729_v48  ;;  %v5322_v48 = vld [vmem:[%s6482_s2 + $0x40] sm:$0xff] }
  0xbb   : > { %4241 = vmatmul.msk.bf16.vlgmr.msra.gmra.mxu2 %vm772_vm0, %v752_v50  ;;  %4253 = vmatmul.msk.bf16.vlgmr.msra.gmra.mxu3 %vm772_vm0, %v752_v50 }
  0xbd   : > { %v704_v51 = vpop.f32.mrf.mxu0 }
  0xbe   : > { %v733_v52 = vpop.f32.mrf.mxu1 }
  0xbf   : > { %v734_v55 = vadd.f32 %v733_v52, %v704_v51  ;;  %v5333_v51 = vld [vmem:[%s6482_s2 + $0x48] sm:$0xff]  ;;  %v4957_v52 = vld [vmem:[%s6487_s7 + $0x20] sm:$0xff] }
  0xc5   : > { %v706_v53 = vpop.f32.mrf.mxu0 }
  0xc6   : > { %v735_v54 = vpop.f32.mrf.mxu1 }
  0xc7   : > { %v736_v56 = vadd.f32 %v735_v54, %v706_v53  ;;  %v5345_v54 = vld [vmem:[%s6482_s2 + $0x50] sm:$0xff] }
  0xc9   : > { %v753_v57 = vpack.c.bf16 %v736_v56, %v734_v55  ;;  %v4941_v56 = vld [vmem:[%s6487_s7] sm:$0xff] }
  0xca   : > { %1101 = vmatpush.bf16.msrb.mxu1 %v4941_v56 }
  0xcb   : > { %4242 = vmatmul.msk.bf16.gmra.mxu2 %vm772_vm0, %v753_v57  ;;  %4254 = vmatmul.msk.bf16.gmra.mxu3 %vm772_vm0, %v753_v57 }
  0xcd   : > { %v709_v58 = vpop.f32.mrf.mxu0 }
  0xce   : > { %v738_v59 = vpop.f32.mrf.mxu1 }
  0xcf   : > { %v739_v62 = vadd.f32 %v738_v59, %v709_v58  ;;  %v5359_v58 = vld [vmem:[%s6482_s2 + $0x58] sm:$0xff] }
  0xd0   : > { %6517 = vst [vmem:[#allocation2_spill] sm:$0xff] %v5359_v58  ;;  %v4956_v59 = vld [vmem:[%s6487_s7 + $0x18] sm:$0xff] }
  0xd1   : > { %1357 = vmatpush.bf16.msra.mxu1 %v4956_v59 }
  0xd5   : > { %v711_v60 = vpop.f32.mrf.mxu0 }
  0xd6   : > { %v740_v61 = vpop.f32.mrf.mxu1 }
  0xd7   : > { %v741_v63 = vadd.f32 %v740_v61, %v711_v60 }
  0xd9   : > { %v754_v0 = vpack.c.bf16 %v741_v63, %v739_v62 }
  0xdb   : > { %4243 = vmatmul.msk.bf16.gmra.mxu2 %vm772_vm0, %v754_v0  ;;  %4255 = vmatmul.msk.bf16.gmra.mxu3 %vm772_vm0, %v754_v0 }
  0xdd   : > { %v714_v1 = vpop.f32.mrf.mxu0 }
  0xde   : > { %v743_v2 = vpop.f32.mrf.mxu1 }
  0xdf   : > { %v744_v5 = vadd.f32 %v743_v2, %v714_v1 }
  0xe5   : > { %v716_v3 = vpop.f32.mrf.mxu0 }
  0xe6   : > { %v745_v4 = vpop.f32.mrf.mxu1 }
  0xe7   : > { %v746_v6 = vadd.f32 %v745_v4, %v716_v3 }
  0xe9   : > { %v755_v7 = vpack.c.bf16 %v746_v6, %v744_v5 }
  0xeb   : > { %4244 = vmatmul.msk.bf16.gmra.mxu2 %vm772_vm0, %v755_v7  ;;  %4256 = vmatmul.msk.bf16.gmra.mxu3 %vm772_vm0, %v755_v7 }
 0x13e   : > { %v843_v8 = vpop.f32.mrf.mxu3  ;;  %v5317_v47 = vpop.f32.mrf.mxu2 }
 0x13f   : > { %v844_v32 = vadd.f32 %v5020_v16, %v843_v8 }
 0x141   : > { %v863_v36 = vmax.f32 %v844_v32, 0.0 }
 0x146   : > { %v845_v9 = vpop.f32.mrf.mxu3  ;;  %v5324_v49 = vpop.f32.mrf.mxu2 }
 0x147   : > { %v846_v29 = vadd.f32 %v5020_v16, %v845_v9 }
 0x149   : > { %v864_v34 = vmax.f32 %v846_v29, 0.0 }
 0x14b   : > { %v5245_v37 = vpack.c.bf16 %v864_v34, %v863_v36 }
 0x14e   : > { %v848_v10 = vpop.f32.mrf.mxu3  ;;  %v5328_v50 = vpop.f32.mrf.mxu2 }
 0x14f   : > { %v849_v27 = vadd.f32 %v5020_v16, %v848_v10 }
 0x151   : > { %v865_v33 = vmax.f32 %v849_v27, 0.0 }
 0x156   : > { %v850_v11 = vpop.f32.mrf.mxu3  ;;  %v5340_v53 = vpop.f32.mrf.mxu2 }
 0x157   : > { %v851_v24 = vadd.f32 %v5020_v16, %v850_v11 }
 0x159   : > { %v866_v30 = vmax.f32 %v851_v24, 0.0 }
 0x15b   : > { %v5240_v35 = vpack.c.bf16 %v866_v30, %v865_v33  ;;  %v5413_v33 = vld [vmem:[%s6482_s2 + $0x70] sm:$0xff] }
 0x15c   : > { %6520 = vst [vmem:[#allocation5_spill] sm:$0xff] %v5413_v33 }
 0x15e   : > { %v853_v13 = vpop.f32.mrf.mxu3  ;;  %v5347_v55 = vpop.f32.mrf.mxu2 }
 0x15f   : > { %v854_v21 = vadd.f32 %v5020_v16, %v853_v13 }
 0x161   : > { %v867_v28 = vmax.f32 %v854_v21, 0.0 }
 0x166   : > { %v855_v14 = vpop.f32.mrf.mxu3  ;;  %v5354_v57 = vpop.f32.mrf.mxu2 }
 0x167   : > { %v856_v19 = vadd.f32 %v5020_v16, %v855_v14 }
 0x169   : > { %v868_v25 = vmax.f32 %v856_v19, 0.0 }
 0x16b   : > { %v5235_v31 = vpack.c.bf16 %v868_v25, %v867_v28  ;;  %v5404_v28 = vld [vmem:[%s6482_s2 + $0x68] sm:$0xff] }
 0x16c   : > { %6519 = vst [vmem:[#allocation4_spill] sm:$0xff] %v5404_v28 }
 0x16e   : > { %v858_v15 = vpop.f32.mrf.mxu3  ;;  %v5366_v60 = vpop.f32.mrf.mxu2 }
 0x16f   : > { %v859_v17 = vadd.f32 %v5020_v16, %v858_v15 }
 0x171   : > { %v869_v22 = vmax.f32 %v859_v17, 0.0 }
 0x176   : > { %v860_v18 = vpop.f32.mrf.mxu3  ;;  %v5368_v61 = vpop.f32.mrf.mxu2 }
 0x177   : > { %v861_v20 = vadd.f32 %v5020_v16, %v860_v18 }
 0x179   : > { %v870_v23 = vmax.f32 %v861_v20, 0.0 }
 0x17b   : > { %v5230_v26 = vpack.c.bf16 %v870_v23, %v869_v22  ;;  %v5393_v23 = vld [vmem:[%s6482_s2 + $0x60] sm:$0xff] }
 0x17c   : > { %6518 = vst [vmem:[#allocation3_spill] sm:$0xff] %v5393_v23 }
 0x17d   : > { %920 = vmatpush.bf16.msrb.mxu2 %v5230_v26  ;;  %996 = vmatpush.bf16.msrb.mxu3 %v5230_v26 }
 0x17e   : > { %1300 = vmatpush.bf16.msra.mxu0 %v5230_v26 }
 0x181   : > { %921 = vmatpush.bf16.msrb.mxu2 %v5235_v31  ;;  %997 = vmatpush.bf16.msrb.mxu3 %v5235_v31 }
 0x182   : > { %1301 = vmatpush.bf16.msra.mxu0 %v5235_v31 }
 0x185   : > { %922 = vmatpush.bf16.msrb.mxu2 %v5240_v35  ;;  %998 = vmatpush.bf16.msrb.mxu3 %v5240_v35 }
 0x186   : > { %1302 = vmatpush.bf16.msra.mxu0 %v5240_v35 }
 0x189   : > { %923 = vmatpush.bf16.msrb.mxu2 %v5245_v37  ;;  %999 = vmatpush.bf16.msrb.mxu3 %v5245_v37 }
 0x18a   : > { %1303 = vmatpush.bf16.msra.mxu0 %v5245_v37 }
 0x18c   : > { %4273 = vmatmul.msk.bf16.vlgmr.msrb.gmra.mxu2 %vm903_vm1, %v5253_v39  ;;  %4301 = vmatmul.msk.bf16.vlgmr.msrb.gmra.mxu3 %vm903_vm1, %v5258_v40 }
 0x18d   : > { %1168 = vmatpush.bf16.msra.mxu2 %v5230_v26  ;;  %1225 = vmatpush.bf16.msra.mxu3 %v4951_v38 }
 0x191   : > { %1490 = vmatpush.bf16.msrb.mxu3 %v5230_v26  ;;  %1169 = vmatpush.bf16.msra.mxu2 %v5235_v31 }
 0x195   : > { %1491 = vmatpush.bf16.msrb.mxu3 %v5235_v31  ;;  %1170 = vmatpush.bf16.msra.mxu2 %v5240_v35 }
 0x199   : > { %1492 = vmatpush.bf16.msrb.mxu3 %v5240_v35  ;;  %1171 = vmatpush.bf16.msra.mxu2 %v5245_v37 }
 0x19c   : > { %4274 = vmatmul.msk.bf16.gmra.mxu2 %vm903_vm1, %v5277_v41  ;;  %4302 = vmatmul.msk.bf16.gmra.mxu3 %vm903_vm1, %v5282_v42 }
 0x19d   : > { %1493 = vmatpush.bf16.msrb.mxu3 %v5245_v37  ;;  %1415 = vmatpush.bf16.msrb.mxu2 %v4957_v52  ;;  %v5421_v52 = vld [vmem:[%s6482_s2 + $0x78] sm:$0xff] }
 0x19e   : > { %6521 = vst [vmem:[#allocation6_spill] sm:$0xff] %v5421_v52 }
 0x1ac   : > { %4275 = vmatmul.msk.bf16.gmra.mxu2 %vm903_vm1, %v5292_v43  ;;  %4303 = vmatmul.msk.bf16.gmra.mxu3 %vm903_vm1, %v5297_v44 }
 0x1bc   : > { %4276 = vmatmul.msk.bf16.gmra.mxu2 %vm903_vm1, %v5306_v45  ;;  %4304 = vmatmul.msk.bf16.gmra.mxu3 %vm903_vm1, %v5311_v46 }
 0x1cc   : > { %4347 = vmatmul.msk.bf16.vlgmr.msra.gmra.mxu2 %vm903_vm1, %v5322_v48 }
 0x1dc   : > { %4348 = vmatmul.msk.bf16.gmra.mxu2 %vm903_vm1, %v5333_v51 }
 0x1ec   : > { %4349 = vmatmul.msk.bf16.gmra.mxu2 %vm903_vm1, %v5345_v54 }
 0x1fc   : > { %4350 = vmatmul.msk.bf16.gmra.mxu2 %vm903_vm1, %v5359_v58 }
 0x20c   : > { %4405 = vmatmul.msk.bf16.vlgmr.msrb.gmra.mxu2 %vm1034_vm2, %v5245_v37 }
 0x20f   : > { %v925_v62 = vpop.f32.mrf.mxu2  ;;  %v1001_v63 = vpop.f32.mrf.mxu3 }
 0x217   : > { %v927_v0 = vpop.f32.mrf.mxu2  ;;  %v1003_v1 = vpop.f32.mrf.mxu3 }
 0x218   : > { %v947_v2 = vpack.c.bf16 %v927_v0, %v925_v62  ;;  %v1024_v3 = vpack.c.bf16 %v1003_v1, %v1001_v63  ;;  %v5429_v62 = vld [vmem:[%s6482_s2 + $0xa0] sm:$0xff] }
 0x219   : > { %6522 = vst [vmem:[#allocation7_spill] sm:$0xff] %v5429_v62 }
 0x21a   : > { %4311 = vmatmul.msk.bf16.vlgmr.msrb.gmra.mxu0 %vm1034_vm2, %v1024_v3  ;;  %4319 = vmatmul.msk.bf16.vlgmr.msrb.gmra.mxu1 %vm1034_vm2, %v947_v2 }
 0x21b   : > { %1622 = vmatpush.bf16.msrb.mxu1 %v5230_v26 }
 0x21c   : > { %4406 = vmatmul.msk.bf16.gmra.mxu2 %vm1034_vm2, %v5240_v35 }
 0x21f   : > { %1623 = vmatpush.bf16.msrb.mxu1 %v5235_v31  ;;  %v930_v4 = vpop.f32.mrf.mxu2  ;;  %v1006_v5 = vpop.f32.mrf.mxu3 }
 0x223   : > { %1624 = vmatpush.bf16.msrb.mxu1 %v5240_v35 }
 0x227   : > { %1625 = vmatpush.bf16.msrb.mxu1 %v5245_v37  ;;  %v932_v6 = vpop.f32.mrf.mxu2  ;;  %v1008_v7 = vpop.f32.mrf.mxu3 }
 0x228   : > { %v948_v8 = vpack.c.bf16 %v932_v6, %v930_v4  ;;  %v1025_v9 = vpack.c.bf16 %v1008_v7, %v1006_v5  ;;  %v5440_v4 = vld [vmem:[%s6482_s2 + $0xa8] sm:$0xff] }
 0x229   : > { %6523 = vst [vmem:[#allocation8_spill] sm:$0xff] %v5440_v4 }
 0x22a   : > { %4312 = vmatmul.msk.bf16.gmra.mxu0 %vm1034_vm2, %v1025_v9  ;;  %4320 = vmatmul.msk.bf16.gmra.mxu1 %vm1034_vm2, %v948_v8 }
 0x22c   : > { %4407 = vmatmul.msk.bf16.gmra.mxu2 %vm1034_vm2, %v5235_v31 }
 0x22f   : > { %v935_v10 = vpop.f32.mrf.mxu2  ;;  %v1011_v11 = vpop.f32.mrf.mxu3 }
 0x237   : > { %v937_v12 = vpop.f32.mrf.mxu2  ;;  %v1013_v13 = vpop.f32.mrf.mxu3 }
 0x238   : > { %v949_v14 = vpack.c.bf16 %v937_v12, %v935_v10  ;;  %v1026_v15 = vpack.c.bf16 %v1013_v13, %v1011_v11  ;;  %v5451_v10 = vld [vmem:[%s6482_s2 + $0xb0] sm:$0xff] }
 0x239   : > { %6524 = vst [vmem:[#allocation9_spill] sm:$0xff] %v5451_v10 }
 0x23a   : > { %4313 = vmatmul.msk.bf16.gmra.mxu0 %vm1034_vm2, %v1026_v15  ;;  %4321 = vmatmul.msk.bf16.gmra.mxu1 %vm1034_vm2, %v949_v14 }
 0x23c   : > { %4408 = vmatmul.msk.bf16.gmra.mxu2 %vm1034_vm2, %v5230_v26 }
 0x23f   : > { %v940_v16 = vpop.f32.mrf.mxu2  ;;  %v1016_v17 = vpop.f32.mrf.mxu3 }
 0x247   : > { %v942_v18 = vpop.f32.mrf.mxu2  ;;  %v1018_v19 = vpop.f32.mrf.mxu3 }
 0x248   : > { %v950_v20 = vpack.c.bf16 %v942_v18, %v940_v16  ;;  %v1027_v21 = vpack.c.bf16 %v1018_v19, %v1016_v17  ;;  %v5462_v16 = vld [vmem:[%s6482_s2 + $0xb8] sm:$0xff] }
 0x249   : > { %6525 = vst [vmem:[#allocation10_spill] sm:$0xff] %v5462_v16 }
 0x24a   : > { %4314 = vmatmul.msk.bf16.gmra.mxu0 %vm1034_vm2, %v1027_v21  ;;  %4322 = vmatmul.msk.bf16.gmra.mxu1 %vm1034_vm2, %v950_v20 }
 0x24f   : > { %v1173_v22 = vpop.f32.mrf.mxu2 }
 0x257   : > { %v1175_v24 = vpop.f32.mrf.mxu2 }
 0x258   : > { %v1196_v25 = vpack.c.bf16 %v1175_v24, %v1173_v22 }
 0x25a   : > { %4357 = vmatmul.msk.bf16.vlgmr.msra.gmra.mxu3 %vm1034_vm2, %v1196_v25  ;;  %4385 = vmatmul.msk.bf16.vlgmr.msra.gmra.mxu0 %vm903_vm1, %v5393_v23 }
 0x25b   : > { %1754 = vmatpush.bf16.msra.mxu3 %v5230_v26 }
 0x25f   : > { %1755 = vmatpush.bf16.msra.mxu3 %v5235_v31  ;;  %v1178_v27 = vpop.f32.mrf.mxu2 }
 0x263   : > { %1756 = vmatpush.bf16.msra.mxu3 %v5240_v35 }
 0x267   : > { %1757 = vmatpush.bf16.msra.mxu3 %v5245_v37  ;;  %v1180_v29 = vpop.f32.mrf.mxu2 }
 0x268   : > { %v1197_v30 = vpack.c.bf16 %v1180_v29, %v1178_v27 }
 0x26a   : > { %4358 = vmatmul.msk.bf16.gmra.mxu3 %vm1034_vm2, %v1197_v30  ;;  %4386 = vmatmul.msk.bf16.gmra.mxu0 %vm903_vm1, %v5404_v28 }
 0x26f   : > { %v1183_v32 = vpop.f32.mrf.mxu2 }
 0x277   : > { %v1185_v34 = vpop.f32.mrf.mxu2 }
 0x278   : > { %v1198_v36 = vpack.c.bf16 %v1185_v34, %v1183_v32 }
 0x27a   : > { %4359 = vmatmul.msk.bf16.gmra.mxu3 %vm1034_vm2, %v1198_v36  ;;  %4387 = vmatmul.msk.bf16.gmra.mxu0 %vm903_vm1, %v5413_v33 }
 0x27f   : > { %v1188_v38 = vpop.f32.mrf.mxu2 }
 0x287   : > { %v1190_v56 = vpop.f32.mrf.mxu2 }
 0x288   : > { %v1199_v59 = vpack.c.bf16 %v1190_v56, %v1188_v38 }
 0x28a   : > { %4360 = vmatmul.msk.bf16.gmra.mxu3 %vm1034_vm2, %v1199_v59  ;;  %4388 = vmatmul.msk.bf16.gmra.mxu0 %vm903_vm1, %v5421_v52 }
 0x297   : > { %v1056_v63 = vpop.f32.mrf.mxu0  ;;  %v1103_v0 = vpop.f32.mrf.mxu1 }
 0x298   : > { %v1104_v1 = vadd.f32 %v1103_v0, %v1056_v63 }
 0x29a   : > { %4433 = vmatmul.msk.bf16.vlgmr.msrb.gmra.mxu3 %vm903_vm1, %v5429_v62 }
 0x29f   : > { %v5433_v2 = vpop.f32.mrf.mxu0  ;;  %v5435_v3 = vpop.f32.mrf.mxu1 }
 0x2a7   : > { %v1061_v5 = vpop.f32.mrf.mxu0  ;;  %v1108_v6 = vpop.f32.mrf.mxu1 }
 0x2a8   : > { %v1109_v7 = vadd.f32 %v1108_v6, %v1061_v5 }
 0x2aa   : > { %4434 = vmatmul.msk.bf16.gmra.mxu3 %vm903_vm1, %v5440_v4 }
 0x2af   : > { %v5444_v8 = vpop.f32.mrf.mxu0  ;;  %v5446_v9 = vpop.f32.mrf.mxu1 }
 0x2b7   : > { %v1066_v11 = vpop.f32.mrf.mxu0  ;;  %v1113_v12 = vpop.f32.mrf.mxu1 }
 0x2b8   : > { %v1114_v13 = vadd.f32 %v1113_v12, %v1066_v11 }
 0x2ba   : > { %4435 = vmatmul.msk.bf16.gmra.mxu3 %vm903_vm1, %v5451_v10 }
 0x2bf   : > { %v5455_v14 = vpop.f32.mrf.mxu0  ;;  %v5457_v15 = vpop.f32.mrf.mxu1 }
 0x2c7   : > { %v1071_v17 = vpop.f32.mrf.mxu0  ;;  %v1118_v18 = vpop.f32.mrf.mxu1 }
 0x2c8   : > { %v1119_v19 = vadd.f32 %v1118_v18, %v1071_v17 }
 0x2ca   : > { %4436 = vmatmul.msk.bf16.gmra.mxu3 %vm903_vm1, %v5462_v16 }
 0x2cf   : > { %v5466_v20 = vpop.f32.mrf.mxu0 }
 0x2d7   : > { %v1305_v21 = vpop.f32.mrf.mxu0 }
 0x2dd   : > { %v1227_v22 = vpop.f32.mrf.mxu3 }
 0x2de   : > { %v5468_v24 = vadd.f32 %v1227_v22, %v1104_v1 }
 0x2df   : > { %v1307_v25 = vpop.f32.mrf.mxu0 }
 0x2e0   : > { %v1328_v27 = vpack.c.bf16 %v1307_v25, %v1305_v21  ;;  %v5506_v21 = vld [vmem:[%s6482_s2 + $0xc0] sm:$0xff] }
 0x2e1   : > { %6528 = vst [vmem:[#allocation13_spill] sm:$0xff] %v5506_v21 }
 0x2e2   : > { %4395 = vmatmul.msk.bf16.vlgmr.msra.gmra.mxu1 %vm1034_vm2, %v1328_v27 }
 0x2e3   : > { %1886 = vmatpush.bf16.msra.mxu1 %v5230_v26 }
 0x2e5   : > { %v5472_v29 = vpop.f32.mrf.mxu3 }
 0x2e7   : > { %1887 = vmatpush.bf16.msra.mxu1 %v5235_v31  ;;  %v1310_v30 = vpop.f32.mrf.mxu0  ;;  %v5484_v31 = vld [vmem:[%s6482_s2 + $0xe0] sm:$0xff] }
 0x2e8   : > { %6526 = vst [vmem:[#allocation11_spill] sm:$0xff] %v5484_v31  ;;  %4509 = vmatmul.msk.bf16.vlgmr.msra.gmra.mxu3 %vm903_vm1, %v5484_v31 }
 0x2eb   : > { %1888 = vmatpush.bf16.msra.mxu1 %v5240_v35  ;;  %v4962_v35 = vld [vmem:[%s6487_s7 + $0x28] sm:$0xff] }
 0x2ec   : > { %1547 = vmatpush.bf16.msrb.mxu0 %v4962_v35 }
 0x2ed   : > { %v1232_v32 = vpop.f32.mrf.mxu3 }
 0x2ee   : > { %v1249_v34 = vadd.f32 %v1232_v32, %v1109_v7  ;;  %v5528_v32 = vld [vmem:[%s6482_s2 + $0xf8] sm:$0xff] }
 0x2ef   : > { %1889 = vmatpush.bf16.msra.mxu1 %v5245_v37  ;;  %v1312_v36 = vpop.f32.mrf.mxu0  ;;  %6531 = vst [vmem:[#allocation16_spill] sm:$0xff] %v5528_v32 }
 0x2f0   : > { %v1329_v38 = vpack.c.bf16 %v1312_v36, %v1310_v30  ;;  %v5521_v30 = vld [vmem:[%s6482_s2 + $0xc8] sm:$0xff] }
 0x2f1   : > { %6530 = vst [vmem:[#allocation15_spill] sm:$0xff] %v5521_v30 }
 0x2f2   : > { %4396 = vmatmul.msk.bf16.gmra.mxu1 %vm1034_vm2, %v1329_v38 }
 0x2f5   : > { %v5478_v56 = vpop.f32.mrf.mxu3 }
 0x2f7   : > { %v1315_v59 = vpop.f32.mrf.mxu0 }
 0x2fd   : > { %v1237_v63 = vpop.f32.mrf.mxu3 }
 0x2fe   : > { %v1251_v26 = vadd.f32 %v1237_v63, %v1114_v13  ;;  %v5497_v13 = vld [vmem:[%s6482_s2 + $0xe8] sm:$0xff]  ;;  %v5536_v63 = vld [vmem:[%s6482_s2 + $0xd0] sm:$0xff] }
 0x2ff   : > { %v1317_v0 = vpop.f32.mrf.mxu0  ;;  %6527 = vst [vmem:[#allocation12_spill] sm:$0xff] %v5497_v13  ;;  %4510 = vmatmul.msk.bf16.gmra.mxu3 %vm903_vm1, %v5497_v13 }
 0x300   : > { %v1330_v1 = vpack.c.bf16 %v1317_v0, %v1315_v59  ;;  %6532 = vst [vmem:[#allocation17_spill] sm:$0xff] %v5536_v63 }
 0x302   : > { %4397 = vmatmul.msk.bf16.gmra.mxu1 %vm1034_vm2, %v1330_v1 }
 0x305   : > { %v5491_v37 = vpop.f32.mrf.mxu3 }
 0x307   : > { %v1320_v5 = vpop.f32.mrf.mxu0 }
 0x30d   : > { %v1242_v6 = vpop.f32.mrf.mxu3 }
 0x30e   : > { %v1253_v7 = vadd.f32 %v1242_v6, %v1119_v19  ;;  %v5513_v19 = vld [vmem:[%s6482_s2 + $0xf0] sm:$0xff] }
 0x30f   : > { %v1322_v11 = vpop.f32.mrf.mxu0  ;;  %6529 = vst [vmem:[#allocation14_spill] sm:$0xff] %v5513_v19  ;;  %4511 = vmatmul.msk.bf16.gmra.mxu3 %vm903_vm1, %v5513_v19 }
 0x310   : > { %v1331_v12 = vpack.c.bf16 %v1322_v11, %v1320_v5  ;;  %v5544_v5 = vld [vmem:[%s6482_s2 + $0xd8] sm:$0xff] }
 0x311   : > { %6533 = vst [vmem:[#allocation18_spill] sm:$0xff] %v5544_v5 }
 0x312   : > { %4398 = vmatmul.msk.bf16.gmra.mxu1 %vm1034_vm2, %v1331_v12  ;;  %v5548_v12 = vpop.f32.mrf.mxu1 }
 0x315   : > { %v5501_v17 = vpop.f32.mrf.mxu3 }
 0x31d   : > { %v1495_v18 = vpop.f32.mrf.mxu3 }
 0x31f   : > { %4512 = vmatmul.msk.bf16.gmra.mxu3 %vm903_vm1, %v5528_v32 }
 0x322   : > { %4471 = vmatmul.msk.bf16.vlgmr.msrb.gmra.mxu1 %vm903_vm1, %v5506_v21 }
 0x325   : > { %v1497_v22 = vpop.f32.mrf.mxu3 }
 0x326   : > { %v1518_v25 = vpack.c.bf16 %v1497_v22, %v1495_v18  ;;  %v5554_v18 = vld [vmem:[%s6482_s2 + $0x100] sm:$0xff] }
 0x327   : > { %6534 = vst [vmem:[#allocation19_spill] sm:$0xff] %v5554_v18 }
 0x328   : > { %4443 = vmatmul.msk.bf16.vlgmr.msrb.gmra.mxu0 %vm1034_vm2, %v1518_v25 }
 0x32d   : > { %v1500_v27 = vpop.f32.mrf.mxu3 }
 0x332   : > { %4472 = vmatmul.msk.bf16.gmra.mxu1 %vm903_vm1, %v5521_v30 }
 0x335   : > { %v1502_v36 = vpop.f32.mrf.mxu3 }
 0x336   : > { %v1519_v38 = vpack.c.bf16 %v1502_v36, %v1500_v27  ;;  %v5564_v36 = vld [vmem:[%s6482_s2 + $0x108] sm:$0xff] }
 0x337   : > { %6535 = vst [vmem:[#allocation20_spill] sm:$0xff] %v5564_v36 }
 0x338   : > { %4444 = vmatmul.msk.bf16.gmra.mxu0 %vm1034_vm2, %v1519_v38 }
 0x33d   : > { %v1505_v59 = vpop.f32.mrf.mxu3 }
 0x342   : > { %4473 = vmatmul.msk.bf16.gmra.mxu1 %vm903_vm1, %v5536_v63 }
 0x345   : > { %v1507_v0 = vpop.f32.mrf.mxu3 }
 0x346   : > { %v1520_v1 = vpack.c.bf16 %v1507_v0, %v1505_v59 }
 0x348   : > { %4445 = vmatmul.msk.bf16.gmra.mxu0 %vm1034_vm2, %v1520_v1  ;;  %v5576_v1 = vld [vmem:[%s6482_s2 + $0x110] sm:$0xff] }
 0x349   : > { %6536 = vst [vmem:[#allocation21_spill] sm:$0xff] %v5576_v1 }
 0x34d   : > { %v1510_v35 = vpop.f32.mrf.mxu3 }
 0x352   : > { %4474 = vmatmul.msk.bf16.gmra.mxu1 %vm903_vm1, %v5544_v5 }
 0x355   : > { %v1512_v6 = vpop.f32.mrf.mxu3 }
 0x356   : > { %v1521_v11 = vpack.c.bf16 %v1512_v6, %v1510_v35 }
 0x358   : > { %4446 = vmatmul.msk.bf16.gmra.mxu0 %vm1034_vm2, %v1521_v11 }
 0x35f   : > { %v1359_v22 = vpop.f32.mrf.mxu1 }
 0x360   : > { %v1379_v25 = vadd.f32 %v1359_v22, %v5468_v24  ;;  %v4967_v24 = vld [vmem:[%s6487_s7 + $0x30] sm:$0xff]  ;;  %v5585_v22 = vld [vmem:[%s6482_s2 + $0x118] sm:$0xff] }
 0x361   : > { %1679 = vmatpush.bf16.msra.mxu2 %v4967_v24  ;;  %6537 = vst [vmem:[#allocation22_spill] sm:$0xff] %v5585_v22 }
 0x362   : > { %4547 = vmatmul.msk.bf16.vlgmr.msra.gmra.mxu1 %vm903_vm1, %v5554_v18 }
 0x367   : > { %v5559_v27 = vpop.f32.mrf.mxu1 }
 0x36b   : > { %v1759_v11 = vpop.f32.mrf.mxu3 }
 0x36f   : > { %v1364_v38 = vpop.f32.mrf.mxu1 }
 0x370   : > { %v1381_v59 = vadd.f32 %v1364_v38, %v1249_v34  ;;  %v4972_v38 = vld [vmem:[%s6487_s7 + $0x38] sm:$0xff] }
 0x371   : > { %1811 = vmatpush.bf16.msra.mxu0 %v4972_v38 }
 0x372   : > { %4548 = vmatmul.msk.bf16.gmra.mxu1 %vm903_vm1, %v5564_v36 }
 0x373   : > { %v1761_v18 = vpop.f32.mrf.mxu3 }
 0x377   : > { %v5568_v0 = vpop.f32.mrf.mxu1 }
 0x37f   : > { %v1369_v35 = vpop.f32.mrf.mxu1 }
 0x380   : > { %v1383_v6 = vadd.f32 %v1369_v35, %v1251_v26  ;;  %v1782_v26 = vpack.c.bf16 %v1761_v18, %v1759_v11  ;;  %v1417_v35 = vpop.f32.mrf.mxu2 }
 0x382   : > { %4549 = vmatmul.msk.bf16.gmra.mxu1 %vm903_vm1, %v5576_v1  ;;  %4519 = vmatmul.msk.bf16.vlgmr.msra.gmra.mxu0 %vm1034_vm2, %v1782_v26  ;;  %v1764_v5 = vpop.f32.mrf.mxu3 }
 0x387   : > { %v5580_v34 = vpop.f32.mrf.mxu1 }
 0x388   : > { %v5595_v21 = vpop.f32.mrf.mxu2 }
 0x38a   : > { %v1766_v30 = vpop.f32.mrf.mxu3 }
 0x38b   : > { %v1783_v32 = vpack.c.bf16 %v1766_v30, %v1764_v5 }
 0x38f   : > { %v1374_v24 = vpop.f32.mrf.mxu1 }
 0x390   : > { %v1385_v36 = vadd.f32 %v1374_v24, %v1253_v7  ;;  %v1437_v7 = vadd.f32 %v1417_v35, %v1379_v25  ;;  %v1422_v26 = vpop.f32.mrf.mxu2 }
 0x391   : > { %v1439_v10 = vadd.f32 %v1422_v26, %v1381_v59 }
 0x392   : > { %4550 = vmatmul.msk.bf16.gmra.mxu1 %vm903_vm1, %v5585_v22  ;;  %4520 = vmatmul.msk.bf16.gmra.mxu0 %vm1034_vm2, %v1783_v32  ;;  %v1769_v19 = vpop.f32.mrf.mxu3 }
 0x397   : > { %v5593_v1 = vpop.f32.mrf.mxu1 }
 0x398   : > { %v5602_v30 = vpop.f32.mrf.mxu2 }
 0x39a   : > { %v1771_v31 = vpop.f32.mrf.mxu3 }
 0x39b   : > { %v1784_v16 = vpack.c.bf16 %v1771_v31, %v1769_v19 }
 0x39f   : > { %v1627_v63 = vpop.f32.mrf.mxu1 }
 0x3a0   : > { %v1427_v31 = vpop.f32.mrf.mxu2 }
 0x3a2   : > { %4521 = vmatmul.msk.bf16.gmra.mxu0 %vm1034_vm2, %v1784_v16 }
 0x3a5   : > { %v1549_v24 = vpop.f32.mrf.mxu0 }
 0x3a6   : > { %v1569_v38 = vadd.f32 %v1549_v24, %v1437_v7  ;;  %v1774_v7 = vpop.f32.mrf.mxu3 }
 0x3a7   : > { %v1629_v18 = vpop.f32.mrf.mxu1 }
 0x3a8   : > { %v1650_v11 = vpack.c.bf16 %v1629_v18, %v1627_v63  ;;  %v4977_v63 = vld [vmem:[%s6487_s7 + $0x40] sm:$0xff]  ;;  %v1441_v18 = vadd.f32 %v1427_v31, %v1383_v6 }
 0x3a9   : > { %1943 = vmatpush.bf16.msrb.mxu2 %v4977_v63 }
 0x3aa   : > { %4481 = vmatmul.msk.bf16.vlgmr.msra.gmra.mxu2 %vm1034_vm2, %v1650_v11 }
 0x3ad   : > { %v5599_v22 = vpop.f32.mrf.mxu0 }
 0x3ae   : > { %v1776_v16 = vpop.f32.mrf.mxu3 }
 0x3af   : > { %v1632_v13 = vpop.f32.mrf.mxu1  ;;  %v1785_v59 = vpack.c.bf16 %v1776_v16, %v1774_v7 }
 0x3b2   : > { %4522 = vmatmul.msk.bf16.gmra.mxu0 %vm1034_vm2, %v1785_v59 }
 0x3b5   : > { %v1554_v32 = vpop.f32.mrf.mxu0 }
 0x3b6   : > { %v1571_v5 = vadd.f32 %v1554_v32, %v1439_v10  ;;  %v5611_v32 = vpop.f32.mrf.mxu2 }
 0x3b7   : > { %v1634_v25 = vpop.f32.mrf.mxu1 }
 0x3b8   : > { %v1651_v35 = vpack.c.bf16 %v1634_v25, %v1632_v13 }
 0x3ba   : > { %4482 = vmatmul.msk.bf16.gmra.mxu2 %vm1034_vm2, %v1651_v35 }
 0x3bd   : > { %v5608_v24 = vpop.f32.mrf.mxu0 }
 0x3be   : > { %v1432_v63 = vpop.f32.mrf.mxu2 }
 0x3bf   : > { %v1637_v19 = vpop.f32.mrf.mxu1  ;;  %v1443_v4 = vadd.f32 %v1432_v63, %v1385_v36 }
 0x3c5   : > { %v1559_v10 = vpop.f32.mrf.mxu0 }
 0x3c6   : > { %v1573_v11 = vadd.f32 %v1559_v10, %v1441_v18  ;;  %v5621_v36 = vpop.f32.mrf.mxu2 }
 0x3c7   : > { %v1639_v13 = vpop.f32.mrf.mxu1 }
 0x3c8   : > { %v1652_v26 = vpack.c.bf16 %v1639_v13, %v1637_v19 }
 0x3ca   : > { %4483 = vmatmul.msk.bf16.gmra.mxu2 %vm1034_vm2, %v1652_v26 }
 0x3cd   : > { %v5614_v25 = vpop.f32.mrf.mxu0 }
 0x3cf   : > { %v1642_v35 = vpop.f32.mrf.mxu1 }
 0x3d5   : > { %v1564_v62 = vpop.f32.mrf.mxu0 }
 0x3d6   : > { %v1575_v52 = vadd.f32 %v1564_v62, %v1443_v4 }
 0x3d7   : > { %v1644_v33 = vpop.f32.mrf.mxu1 }
 0x3d8   : > { %v1653_v7 = vpack.c.bf16 %v1644_v33, %v1642_v35 }
 0x3da   : > { %4484 = vmatmul.msk.bf16.gmra.mxu2 %vm1034_vm2, %v1653_v7 }
 0x3df   : > { %v1891_v6 = vpop.f32.mrf.mxu1 }
 0x3e7   : > { %v1893_v31 = vpop.f32.mrf.mxu1 }
 0x3e8   : > { %v1914_v16 = vpack.c.bf16 %v1893_v31, %v1891_v6 }
 0x3ea   : > { %4557 = vmatmul.msk.bf16.vlgmr.msrb.gmra.mxu2 %vm1034_vm2, %v1914_v16 }
 0x3ef   : > { %v1896_v19 = vpop.f32.mrf.mxu1 }
 0x3f7   : > { %v1898_v59 = vpop.f32.mrf.mxu1 }
 0x3f8   : > { %v1915_v18 = vpack.c.bf16 %v1898_v59, %v1896_v19 }
 0x3fa   : > { %4558 = vmatmul.msk.bf16.gmra.mxu2 %vm1034_vm2, %v1915_v18  ;;  %v4978_v18 = vld [vmem:[%s6488_s8] sm:$0xff] }
 0x3fb   : > { %2028 = vmatpush.bf16.msrb.mxu3 %v4978_v18 }
 0x3ff   : > { %v1901_v10 = vpop.f32.mrf.mxu1 }
 0x407   : > { %v1903_v13 = vpop.f32.mrf.mxu1 }
 0x408   : > { %v1916_v26 = vpack.c.bf16 %v1903_v13, %v1901_v10  ;;  %v5626_v10 = vpop.f32.mrf.mxu0 }
 0x40a   : > { %4559 = vmatmul.msk.bf16.gmra.mxu2 %vm1034_vm2, %v1916_v26 }
 0x40f   : > { %v1906_v62 = vpop.f32.mrf.mxu1 }
 0x410   : > { %v1813_v26 = vpop.f32.mrf.mxu0 }
 0x417   : > { %v1908_v4 = vpop.f32.mrf.mxu1 }
 0x418   : > { %v1917_v33 = vpack.c.bf16 %v1908_v4, %v1906_v62 }
 0x41a   : > { %4560 = vmatmul.msk.bf16.gmra.mxu2 %vm1034_vm2, %v1917_v33  ;;  %v1815_v33 = vpop.f32.mrf.mxu0 }
 0x422   : > { %v1818_v28 = vpop.f32.mrf.mxu0 }
 0x42d   : > { %v1681_v35 = vpop.f32.mrf.mxu2 }
 0x42e   : > { %v1701_v63 = vadd.f32 %v1681_v35, %v1569_v38  ;;  %v1106_v38 = vadd.f32 %v5435_v3, %v5433_v2  ;;  %v5641_v2 = vld [vmem:[%s6490_s10] ss:$0 sm:$0xff]  ;;  %v1111_v3 = vadd.f32 %v5446_v9, %v5444_v8 }
 0x430   : > { %v1833_v23 = vadd.f32 %v1813_v26, %v1701_v63 }
 0x435   : > { %v1683_v7 = vpop.f32.mrf.mxu2 }
 0x43d   : > { %v1686_v6 = vpop.f32.mrf.mxu2 }
 0x43e   : > { %v1703_v31 = vadd.f32 %v1686_v6, %v1571_v5 }
 0x445   : > { %v1688_v16 = vpop.f32.mrf.mxu2 }
 0x44d   : > { %v1691_v19 = vpop.f32.mrf.mxu2 }
 0x44e   : > { %v1705_v59 = vadd.f32 %v1691_v19, %v1573_v11  ;;  %v1248_v11 = vadd.f32 %v5472_v29, %v1106_v38 }
 0x450   : > { %v1380_v35 = vadd.f32 %v5559_v27, %v1248_v11  ;;  %v1250_v27 = vadd.f32 %v5478_v56, %v1111_v3 }
 0x452   : > { %v1438_v6 = vadd.f32 %v5595_v21, %v1380_v35 }
 0x454   : > { %v1570_v18 = vadd.f32 %v5599_v22, %v1438_v6  ;;  %v1382_v22 = vadd.f32 %v5568_v0, %v1250_v27  ;;  %v1116_v0 = vadd.f32 %v5457_v15, %v5455_v14 }
 0x455   : > { %v1693_v13 = vpop.f32.mrf.mxu2 }
 0x456   : > { %v1702_v58 = vadd.f32 %v1683_v7, %v1570_v18  ;;  %v1440_v11 = vadd.f32 %v5602_v30, %v1382_v22  ;;  %v1121_v22 = vadd.f32 %v5548_v12, %v5466_v20 }
 0x458   : > { %v1834_v29 = vadd.f32 %v1815_v33, %v1702_v58  ;;  %v1572_v8 = vadd.f32 %v5608_v24, %v1440_v11  ;;  %v1835_v58 = vadd.f32 %v1818_v28, %v1703_v31 }
 0x45a   : > { %v1704_v9 = vadd.f32 %v1688_v16, %v1572_v8 }
 0x45d   : > { %v1696_v62 = vpop.f32.mrf.mxu2 }
 0x45e   : > { %v5628_v4 = vadd.f32 %v1696_v62, %v1575_v52 }
 0x465   : > { %v5632_v5 = vpop.f32.mrf.mxu2 }
 0x46d   : > { %v1945_v19 = vpop.f32.mrf.mxu2 }
 0x46e   : > { %v1965_v52 = vadd.f32 %v1945_v19, %v1833_v23  ;;  %v1820_v23 = vpop.f32.mrf.mxu0 }
 0x46f   : > { %v1836_v19 = vadd.f32 %v1820_v23, %v1704_v9  ;;  %v1254_v23 = vadd.f32 %v5501_v17, %v1121_v22 }
 0x470   : > { %v1977_v21 = vadd.f32 %v5641_v2, %v1965_v52  ;;  %v1252_v52 = vadd.f32 %v5491_v37, %v1116_v0 }
 0x471   : > { %v1386_v11 = vadd.f32 %v5593_v1, %v1254_v23 }
 0x472   : > { %v1985_v7 = vmax.f32 %v1977_v21, 0.0 }
 0x475   : > { %v1947_v62 = vpop.f32.mrf.mxu2 }
 0x476   : > { %v1966_v38 = vadd.f32 %v1947_v62, %v1834_v29  ;;  %v1823_v33 = vpop.f32.mrf.mxu0  ;;  %v1384_v29 = vadd.f32 %v5580_v34, %v1252_v52 }
 0x477   : > { %v1837_v15 = vadd.f32 %v1823_v33, %v1705_v59  ;;  %v1444_v59 = vadd.f32 %v5621_v36, %v1386_v11 }
 0x478   : > { %v1978_v63 = vadd.f32 %v5641_v2, %v1966_v38  ;;  %v1442_v28 = vadd.f32 %v5611_v32, %v1384_v29  ;;  %v5019_v29 = vld [vmem:[%s6492_s12] ss:$0 sm:$0xff] }
 0x479   : > { %v1576_v20 = vadd.f32 %v5626_v10, %v1444_v59  ;;  %v4982_v10 = vld [vmem:[%s6486_s6 + $0x18] sm:$0xff] }
 0x47a   : > { %v1986_v26 = vmax.f32 %v1978_v63, 0.0  ;;  %v1574_v14 = vadd.f32 %v5614_v25, %v1442_v28  ;;  %2123 = vmatpush.bf16.msrb.mxu0 %v4982_v10  ;;  %v797_v28 = vadd.f32 %v5019_v29, %v5324_v49  ;;  %v800_v49 = vadd.f32 %v5019_v29, %v5328_v50 }
 0x47b   : > { %v1708_v12 = vadd.f32 %v5632_v5, %v1576_v20  ;;  %v4980_v5 = vld [vmem:[%s6486_s6 + $0x8] sm:$0xff] }
 0x47c   : > { %v1995_v35 = vpack.c.bf16 %v1986_v26, %v1985_v7  ;;  %v1706_v37 = vadd.f32 %v1693_v13, %v1574_v14 }
 0x47d   : > { %v1950_v6 = vpop.f32.mrf.mxu2 }
 0x47e   : > { %4565 = vmatmul.msk.bf16.vlgmr.msrb.gmra.mxu3 %vm1034_vm2, %v1995_v35  ;;  %v1967_v56 = vadd.f32 %v1950_v6, %v1835_v58  ;;  %v1825_v16 = vpop.f32.mrf.mxu0 }
 0x47f   : > { %v1838_v34 = vadd.f32 %v1825_v16, %v1706_v37 }
 0x480   : > { %v1979_v3 = vadd.f32 %v5641_v2, %v1967_v56 }
 0x482   : > { %v1987_v62 = vmax.f32 %v1979_v3, 0.0 }
 0x485   : > { %v1952_v18 = vpop.f32.mrf.mxu2 }
 0x486   : > { %v1968_v30 = vadd.f32 %v1952_v18, %v1836_v19  ;;  %v1828_v26 = vpop.f32.mrf.mxu0 }
 0x487   : > { %v1839_v17 = vadd.f32 %v1828_v26, %v5628_v4  ;;  %v4981_v4 = vld [vmem:[%s6486_s6 + $0x10] sm:$0xff] }
 0x488   : > { %v1980_v24 = vadd.f32 %v5641_v2, %v1968_v30  ;;  %2124 = vmatpush.bf16.msrb.mxu0 %v4981_v4  ;;  %v5022_v30 = vld [vmem:[%s6491_s11] ss:$0 sm:$0xff]  ;;  %v4984_v4 = vld [vmem:[%s6487_s7 + $0x50] sm:$0xff] }
 0x489   : > { %2257 = vmatpush.bf16.msra.mxu3 %v4984_v4 }
 0x48a   : > { %v1988_v27 = vmax.f32 %v1980_v24, 0.0 }
 0x48c   : > { %v1996_v31 = vpack.c.bf16 %v1988_v27, %v1987_v62  ;;  %2125 = vmatpush.bf16.msrb.mxu0 %v4980_v5  ;;  %v795_v62 = vadd.f32 %v5019_v29, %v5317_v47 }
 0x48d   : > { %v1955_v21 = vpop.f32.mrf.mxu2 }
 0x48e   : > { %4566 = vmatmul.msk.bf16.gmra.mxu3 %vm1034_vm2, %v1996_v31  ;;  %v1969_v38 = vadd.f32 %v1955_v21, %v1837_v15  ;;  %v1830_v58 = vpop.f32.mrf.mxu0 }
 0x48f   : > { %v1840_v56 = vadd.f32 %v1830_v58, %v1708_v12 }
 0x490   : > { %v1981_v7 = vadd.f32 %v5641_v2, %v1969_v38 }
 0x492   : > { %v1989_v35 = vmax.f32 %v1981_v7, 0.0 }
 0x495   : > { %v1957_v63 = vpop.f32.mrf.mxu2 }
 0x496   : > { %v1970_v32 = vadd.f32 %v1957_v63, %v1838_v34  ;;  %v802_v34 = vadd.f32 %v5019_v29, %v5340_v53  ;;  %v805_v53 = vadd.f32 %v5019_v29, %v5347_v55 }
 0x498   : > { %v1982_v25 = vadd.f32 %v5641_v2, %v1970_v32 }
 0x49a   : > { %v1990_v6 = vmax.f32 %v1982_v25, 0.0 }
 0x49c   : > { %v1997_v13 = vpack.c.bf16 %v1990_v6, %v1989_v35  ;;  %v807_v6 = vadd.f32 %v5019_v29, %v5354_v57  ;;  %v810_v57 = vadd.f32 %v5019_v29, %v5366_v60 }
 0x49d   : > { %v1960_v8 = vpop.f32.mrf.mxu2 }
 0x49e   : > { %4567 = vmatmul.msk.bf16.gmra.mxu3 %vm1034_vm2, %v1997_v13  ;;  %v1971_v9 = vadd.f32 %v1960_v8, %v1839_v17 }
 0x4a0   : > { %v1983_v33 = vadd.f32 %v5641_v2, %v1971_v9 }
 0x4a2   : > { %v1991_v36 = vmax.f32 %v1983_v33, 0.0 }
 0x4a5   : > { %v1962_v1 = vpop.f32.mrf.mxu2 }
 0x4a6   : > { %v1972_v0 = vadd.f32 %v1962_v1, %v1840_v56  ;;  %v812_v56 = vadd.f32 %v5019_v29, %v5368_v61 }
 0x4a8   : > { %v1984_v19 = vadd.f32 %v5641_v2, %v1972_v0  ;;  %v4979_v2 = vld [vmem:[%s6486_s6] sm:$0xff] }
 0x4a9   : > { %2126 = vmatpush.bf16.msrb.mxu0 %v4979_v2 }
 0x4aa   : > { %v1992_v18 = vmax.f32 %v1984_v19, 0.0 }
 0x4ac   : > { %v1998_v52 = vpack.c.bf16 %v1992_v18, %v1991_v36 }
 0x4ae   : > { %4568 = vmatmul.msk.bf16.gmra.mxu3 %vm1034_vm2, %v1998_v52 }
 0x501   : > { %v2030_v3 = vpop.f32.mrf.mxu3 }
 0x502   : > { %v2031_v24 = vadd.f32 %v5022_v30, %v2030_v3 }
 0x504   : > { %v5695_v31 = vadd.f32 %v2031_v24, %v795_v62 }
 0x506   : > { %v2058_v14 = vmax.f32 %v5695_v31, 0.0 }
 0x509   : > { %v2032_v27 = vpop.f32.mrf.mxu3 }
 0x50a   : > { %v2033_v16 = vadd.f32 %v5022_v30, %v2032_v27 }
 0x50c   : > { %v5697_v21 = vadd.f32 %v2033_v16, %v797_v28 }
 0x50e   : > { %v2059_v15 = vmax.f32 %v5697_v21, 0.0 }
 0x510   : > { %v2074_v37 = vpack.c.bf16 %v2059_v15, %v2058_v14 }
 0x511   : > { %v2035_v38 = vpop.f32.mrf.mxu3 }
 0x512   : > { %4586 = vmatmul.msk.bf16.vlgmr.msrb.gmra.mxu0 %vm903_vm1, %v2074_v37  ;;  %v2036_v47 = vadd.f32 %v5022_v30, %v2035_v38 }
 0x514   : > { %v5708_v63 = vadd.f32 %v2036_v47, %v800_v49 }
 0x516   : > { %v2060_v32 = vmax.f32 %v5708_v63, 0.0 }
 0x519   : > { %v2037_v22 = vpop.f32.mrf.mxu3 }
 0x51a   : > { %v2038_v23 = vadd.f32 %v5022_v30, %v2037_v22 }
 0x51c   : > { %v5710_v7 = vadd.f32 %v2038_v23, %v802_v34 }
 0x51e   : > { %v2061_v26 = vmax.f32 %v5710_v7, 0.0 }
 0x520   : > { %v2075_v11 = vpack.c.bf16 %v2061_v26, %v2060_v32 }
 0x521   : > { %v2040_v25 = vpop.f32.mrf.mxu3 }
 0x522   : > { %4587 = vmatmul.msk.bf16.gmra.mxu0 %vm903_vm1, %v2075_v11  ;;  %v2041_v50 = vadd.f32 %v5022_v30, %v2040_v25 }
 0x524   : > { %v5721_v59 = vadd.f32 %v2041_v50, %v805_v53 }
 0x526   : > { %v2062_v20 = vmax.f32 %v5721_v59, 0.0 }
 0x529   : > { %v2042_v35 = vpop.f32.mrf.mxu3 }
 0x52a   : > { %v2043_v13 = vadd.f32 %v5022_v30, %v2042_v35 }
 0x52c   : > { %v5723_v8 = vadd.f32 %v2043_v13, %v807_v6 }
 0x52e   : > { %v2063_v17 = vmax.f32 %v5723_v8, 0.0 }
 0x530   : > { %v2076_v12 = vpack.c.bf16 %v2063_v17, %v2062_v20 }
 0x531   : > { %v2045_v58 = vpop.f32.mrf.mxu3 }
 0x532   : > { %4588 = vmatmul.msk.bf16.gmra.mxu0 %vm903_vm1, %v2076_v12  ;;  %v2046_v55 = vadd.f32 %v5022_v30, %v2045_v58  ;;  %v4985_v58 = vld [vmem:[%s6487_s7 + $0x58] sm:$0xff] }
 0x534   : > { %v5734_v1 = vadd.f32 %v2046_v55, %v810_v57 }
 0x536   : > { %v2064_v19 = vmax.f32 %v5734_v1, 0.0 }
 0x539   : > { %v2047_v9 = vpop.f32.mrf.mxu3 }
 0x53a   : > { %v2048_v33 = vadd.f32 %v5022_v30, %v2047_v9  ;;  %v5023_v30 = vld [vmem:[%s6489_s9 + $0x1] ss:$0 sm:$0xff] }
 0x53c   : > { %v5736_v0 = vadd.f32 %v2048_v33, %v812_v56 }
 0x53e   : > { %v2065_v36 = vmax.f32 %v5736_v0, 0.0  ;;  %v4998_v0 = vld [vmem:[%s6487_s7 + $0x98] sm:$0xff] }
 0x540   : > { %v2077_v18 = vpack.c.bf16 %v2065_v36, %v2064_v19 }
 0x542   : > { %4589 = vmatmul.msk.bf16.gmra.mxu0 %vm903_vm1, %v2077_v18 }
 0x58f   : > { %v2128_v60 = vpop.f32.mrf.mxu0 }
 0x590   : > { %v2129_v50 = vadd.f32 %v5023_v30, %v2128_v60 }
 0x592   : > { %v2148_v13 = vmax.f32 %v2129_v50, 0.0 }
 0x597   : > { %v2130_v52 = vpop.f32.mrf.mxu0 }
 0x598   : > { %v2131_v23 = vadd.f32 %v5023_v30, %v2130_v52 }
 0x59a   : > { %v2149_v35 = vmax.f32 %v2131_v23, 0.0 }
 0x59c   : > { %v5766_v12 = vpack.c.bf16 %v2149_v35, %v2148_v13 }
 0x59f   : > { %v2133_v10 = vpop.f32.mrf.mxu0 }
 0x5a0   : > { %v2134_v22 = vadd.f32 %v5023_v30, %v2133_v10 }
 0x5a2   : > { %v2150_v53 = vmax.f32 %v2134_v22, 0.0 }
 0x5a7   : > { %v2135_v61 = vpop.f32.mrf.mxu0 }
 0x5a8   : > { %v2136_v38 = vadd.f32 %v5023_v30, %v2135_v61 }
 0x5aa   : > { %v2151_v11 = vmax.f32 %v2136_v38, 0.0 }
 0x5ac   : > { %v5761_v6 = vpack.c.bf16 %v2151_v11, %v2150_v53  ;;  %v6541_v53 = vld [vmem:[#allocation5_spill] sm:$0xff] }
 0x5af   : > { %v2138_v5 = vpop.f32.mrf.mxu0 }
 0x5b0   : > { %v2139_v28 = vadd.f32 %v5023_v30, %v2138_v5 }
 0x5b2   : > { %v2152_v34 = vmax.f32 %v2139_v28, 0.0 }
 0x5b7   : > { %v2140_v2 = vpop.f32.mrf.mxu0 }
 0x5b8   : > { %v2141_v62 = vadd.f32 %v5023_v30, %v2140_v2 }
 0x5ba   : > { %v2153_v47 = vmax.f32 %v2141_v62, 0.0 }
 0x5bc   : > { %v5756_v25 = vpack.c.bf16 %v2153_v47, %v2152_v34  ;;  %v6540_v34 = vld [vmem:[#allocation4_spill] sm:$0xff] }
 0x5bf   : > { %v2143_v3 = vpop.f32.mrf.mxu0 }
 0x5c0   : > { %v2144_v29 = vadd.f32 %v5023_v30, %v2143_v3 }
 0x5c2   : > { %v2154_v16 = vmax.f32 %v2144_v29, 0.0 }
 0x5c7   : > { %v2145_v24 = vpop.f32.mrf.mxu0 }
 0x5c8   : > { %v2146_v27 = vadd.f32 %v5023_v30, %v2145_v24 }
 0x5ca   : > { %v2155_v37 = vmax.f32 %v2146_v27, 0.0 }
 0x5cc   : > { %v5751_v49 = vpack.c.bf16 %v2155_v37, %v2154_v16  ;;  %v6539_v37 = vld [vmem:[#allocation3_spill] sm:$0xff] }
 0x5ce   : > { %2164 = vmatpush.bf16.msrb.mxu1 %v5751_v49  ;;  %2200 = vmatpush.bf16.msra.mxu2 %v5751_v49 }
 0x5cf   : > { %2421 = vmatpush.bf16.msrb.mxu3 %v5751_v49 }
 0x5d2   : > { %2165 = vmatpush.bf16.msrb.mxu1 %v5756_v25  ;;  %2201 = vmatpush.bf16.msra.mxu2 %v5756_v25 }
 0x5d3   : > { %2422 = vmatpush.bf16.msrb.mxu3 %v5756_v25 }
 0x5d6   : > { %2166 = vmatpush.bf16.msrb.mxu1 %v5761_v6  ;;  %2202 = vmatpush.bf16.msra.mxu2 %v5761_v6 }
 0x5d7   : > { %2423 = vmatpush.bf16.msrb.mxu3 %v5761_v6 }
 0x5da   : > { %2167 = vmatpush.bf16.msrb.mxu1 %v5766_v12  ;;  %2203 = vmatpush.bf16.msra.mxu2 %v5766_v12 }
 0x5db   : > { %2424 = vmatpush.bf16.msrb.mxu3 %v5766_v12 }
 0x5dd   : > { %4590 = vmatmul.msk.bf16.vlgmr.msrb.gmra.mxu1 %vm903_vm1, %v5253_v39  ;;  %4596 = vmatmul.msk.bf16.vlgmr.msra.gmra.mxu2 %vm903_vm1, %v5258_v40  ;;  %v4987_v39 = vld [vmem:[%s6487_s7 + $0x68] sm:$0xff] }
 0x5de   : > { %2330 = vmatpush.bf16.msra.mxu1 %v5751_v49  ;;  %2387 = vmatpush.bf16.msrb.mxu2 %v4985_v58  ;;  %v4983_v40 = vld [vmem:[%s6487_s7 + $0x48] sm:$0xff]  ;;  %v6542_v58 = vld [vmem:[#allocation6_spill] sm:$0xff] }
 0x5df   : > { %2304 = vmatpush.bf16.msra.mxu0 %v4983_v40  ;;  %v6543_v40 = vld [vmem:[#allocation7_spill] sm:$0xff] }
 0x5e2   : > { %2570 = vmatpush.bf16.msra.mxu2 %v5751_v49  ;;  %2331 = vmatpush.bf16.msra.mxu1 %v5756_v25 }
 0x5e6   : > { %2571 = vmatpush.bf16.msra.mxu2 %v5756_v25  ;;  %2332 = vmatpush.bf16.msra.mxu1 %v5761_v6 }
 0x5ea   : > { %2572 = vmatpush.bf16.msra.mxu2 %v5761_v6  ;;  %2333 = vmatpush.bf16.msra.mxu1 %v5766_v12 }
 0x5ed   : > { %4591 = vmatmul.msk.bf16.gmra.mxu1 %vm903_vm1, %v5277_v41  ;;  %4597 = vmatmul.msk.bf16.gmra.mxu2 %vm903_vm1, %v5282_v42  ;;  %v4986_v41 = vld [vmem:[%s6487_s7 + $0x60] sm:$0xff] }
 0x5ee   : > { %2573 = vmatpush.bf16.msra.mxu2 %v5766_v12  ;;  %2536 = vmatpush.bf16.msrb.mxu1 %v4987_v39  ;;  %v6538_v42 = vld [vmem:[#allocation2_spill] sm:$0xff] }
 0x5ef   : > { %2478 = vmatpush.bf16.msrb.mxu0 %v4986_v41 }
 0x5fd   : > { %4592 = vmatmul.msk.bf16.gmra.mxu1 %vm903_vm1, %v5292_v43  ;;  %4598 = vmatmul.msk.bf16.gmra.mxu2 %vm903_vm1, %v5297_v44 }
 0x60d   : > { %4593 = vmatmul.msk.bf16.gmra.mxu1 %vm903_vm1, %v5306_v45  ;;  %4599 = vmatmul.msk.bf16.gmra.mxu2 %vm903_vm1, %v5311_v46 }
 0x61d   : > { %4618 = vmatmul.msk.bf16.vlgmr.msra.gmra.mxu1 %vm903_vm1, %v5322_v48 }
 0x62d   : > { %4619 = vmatmul.msk.bf16.gmra.mxu1 %vm903_vm1, %v5333_v51 }
 0x63d   : > { %4620 = vmatmul.msk.bf16.gmra.mxu1 %vm903_vm1, %v5345_v54 }
 0x64d   : > { %4621 = vmatmul.msk.bf16.gmra.mxu1 %vm903_vm1, %v6538_v42 }
 0x65a   : > { %v2169_v43 = vpop.f32.mrf.mxu1 }
 0x65d   : > { %4652 = vmatmul.msk.bf16.vlgmr.msrb.gmra.mxu1 %vm1034_vm2, %v5766_v12 }
 0x660   : > { %v2205_v44 = vpop.f32.mrf.mxu2 }
 0x662   : > { %v2171_v45 = vpop.f32.mrf.mxu1 }
 0x663   : > { %v2192_v46 = vpack.c.bf16 %v2171_v45, %v2169_v43  ;;  %v6544_v45 = vld [vmem:[#allocation8_spill] sm:$0xff] }
 0x665   : > { %4614 = vmatmul.msk.bf16.vlgmr.msra.gmra.mxu0 %vm1034_vm2, %v2192_v46 }
 0x666   : > { %2661 = vmatpush.bf16.msra.mxu0 %v5751_v49 }
 0x668   : > { %v2207_v48 = vpop.f32.mrf.mxu2 }
 0x669   : > { %v2228_v51 = vpack.c.bf16 %v2207_v48, %v2205_v44 }
 0x66a   : > { %2662 = vmatpush.bf16.msra.mxu0 %v5756_v25  ;;  %v2174_v54 = vpop.f32.mrf.mxu1 }
 0x66b   : > { %4606 = vmatmul.msk.bf16.vlgmr.msra.gmra.mxu3 %vm1034_vm2, %v2228_v51 }
 0x66d   : > { %4653 = vmatmul.msk.bf16.gmra.mxu1 %vm1034_vm2, %v5761_v6 }
 0x66e   : > { %2663 = vmatpush.bf16.msra.mxu0 %v5761_v6 }
 0x670   : > { %v2210_v55 = vpop.f32.mrf.mxu2 }
 0x672   : > { %2664 = vmatpush.bf16.msra.mxu0 %v5766_v12  ;;  %v2176_v57 = vpop.f32.mrf.mxu1 }
 0x673   : > { %v2193_v9 = vpack.c.bf16 %v2176_v57, %v2174_v54 }
 0x675   : > { %4615 = vmatmul.msk.bf16.gmra.mxu0 %vm1034_vm2, %v2193_v9 }
 0x678   : > { %v2212_v56 = vpop.f32.mrf.mxu2 }
 0x679   : > { %v2229_v33 = vpack.c.bf16 %v2212_v56, %v2210_v55  ;;  %v6545_v55 = vld [vmem:[#allocation9_spill] sm:$0xff] }
 0x67a   : > { %v2179_v18 = vpop.f32.mrf.mxu1 }
 0x67b   : > { %4607 = vmatmul.msk.bf16.gmra.mxu3 %vm1034_vm2, %v2229_v33 }
 0x67d   : > { %4654 = vmatmul.msk.bf16.gmra.mxu1 %vm1034_vm2, %v5756_v25 }
 0x680   : > { %v2215_v60 = vpop.f32.mrf.mxu2 }
 0x682   : > { %v2181_v52 = vpop.f32.mrf.mxu1 }
 0x683   : > { %v2194_v10 = vpack.c.bf16 %v2181_v52, %v2179_v18 }
 0x685   : > { %4616 = vmatmul.msk.bf16.gmra.mxu0 %vm1034_vm2, %v2194_v10 }
 0x688   : > { %v2217_v61 = vpop.f32.mrf.mxu2 }
 0x689   : > { %v2230_v4 = vpack.c.bf16 %v2217_v61, %v2215_v60  ;;  %v6546_v60 = vld [vmem:[#allocation10_spill] sm:$0xff] }
 0x68a   : > { %v2184_v5 = vpop.f32.mrf.mxu1 }
 0x68b   : > { %4608 = vmatmul.msk.bf16.gmra.mxu3 %vm1034_vm2, %v2230_v4 }
 0x68d   : > { %4655 = vmatmul.msk.bf16.gmra.mxu1 %vm1034_vm2, %v5751_v49 }
 0x690   : > { %v2220_v2 = vpop.f32.mrf.mxu2 }
 0x692   : > { %v2186_v3 = vpop.f32.mrf.mxu1 }
 0x693   : > { %v2195_v30 = vpack.c.bf16 %v2186_v3, %v2184_v5  ;;  %v6547_v5 = vld [vmem:[#allocation11_spill] sm:$0xff] }
 0x695   : > { %4617 = vmatmul.msk.bf16.gmra.mxu0 %vm1034_vm2, %v2195_v30 }
 0x698   : > { %v2222_v29 = vpop.f32.mrf.mxu2 }
 0x699   : > { %v2231_v24 = vpack.c.bf16 %v2222_v29, %v2220_v2 }
 0x69a   : > { %v2335_v62 = vpop.f32.mrf.mxu1 }
 0x69b   : > { %4609 = vmatmul.msk.bf16.gmra.mxu3 %vm1034_vm2, %v2231_v24 }
 0x6a2   : > { %v2337_v27 = vpop.f32.mrf.mxu1 }
 0x6a3   : > { %v2358_v28 = vpack.c.bf16 %v2337_v27, %v2335_v62  ;;  %v6548_v62 = vld [vmem:[#allocation12_spill] sm:$0xff] }
 0x6a5   : > { %4628 = vmatmul.msk.bf16.vlgmr.msrb.gmra.mxu2 %vm1034_vm2, %v2358_v28 }
 0x6a6   : > { %2752 = vmatpush.bf16.msrb.mxu2 %v5751_v49 }
 0x6aa   : > { %2753 = vmatpush.bf16.msrb.mxu2 %v5756_v25  ;;  %v2340_v16 = vpop.f32.mrf.mxu1 }
 0x6ab   : > { %4632 = vmatmul.msk.bf16.vlgmr.msrb.gmra.mxu3 %vm903_vm1, %v6539_v37 }
 0x6ae   : > { %2754 = vmatpush.bf16.msrb.mxu2 %v5761_v6 }
 0x6b2   : > { %2755 = vmatpush.bf16.msrb.mxu2 %v5766_v12  ;;  %v2342_v38 = vpop.f32.mrf.mxu1 }
 0x6b3   : > { %v2359_v47 = vpack.c.bf16 %v2342_v38, %v2340_v16 }
 0x6b5   : > { %4629 = vmatmul.msk.bf16.gmra.mxu2 %vm1034_vm2, %v2359_v47 }
 0x6ba   : > { %v2345_v22 = vpop.f32.mrf.mxu1 }
 0x6bb   : > { %4633 = vmatmul.msk.bf16.gmra.mxu3 %vm903_vm1, %v6540_v34 }
 0x6c2   : > { %v2347_v23 = vpop.f32.mrf.mxu1 }
 0x6c3   : > { %v2360_v11 = vpack.c.bf16 %v2347_v23, %v2345_v22  ;;  %v6549_v22 = vld [vmem:[#allocation14_spill] sm:$0xff] }
 0x6c5   : > { %4630 = vmatmul.msk.bf16.gmra.mxu2 %vm1034_vm2, %v2360_v11 }
 0x6ca   : > { %v2350_v50 = vpop.f32.mrf.mxu1 }
 0x6cb   : > { %4634 = vmatmul.msk.bf16.gmra.mxu3 %vm903_vm1, %v6541_v53 }
 0x6d2   : > { %v2352_v35 = vpop.f32.mrf.mxu1 }
 0x6d3   : > { %v2361_v13 = vpack.c.bf16 %v2352_v35, %v2350_v50 }
 0x6d5   : > { %4631 = vmatmul.msk.bf16.gmra.mxu2 %vm1034_vm2, %v2361_v13 }
 0x6db   : > { %4635 = vmatmul.msk.bf16.gmra.mxu3 %vm903_vm1, %v6542_v58 }
 0x6e2   : > { %v2306_v39 = vpop.f32.mrf.mxu0 }
 0x6e5   : > { %4656 = vmatmul.msk.bf16.vlgmr.msra.gmra.mxu2 %vm903_vm1, %v6543_v40 }
 0x6ea   : > { %v5853_v41 = vpop.f32.mrf.mxu0 }
 0x6ee   : > { %v2259_v42 = vpop.f32.mrf.mxu3 }
 0x6ef   : > { %v2307_v43 = vadd.f32 %v2306_v39, %v2259_v42 }
 0x6f2   : > { %v2311_v44 = vpop.f32.mrf.mxu0 }
 0x6f5   : > { %4657 = vmatmul.msk.bf16.gmra.mxu2 %vm903_vm1, %v6544_v45 }
 0x6f6   : > { %v5857_v46 = vpop.f32.mrf.mxu3 }
 0x6fa   : > { %v5859_v51 = vpop.f32.mrf.mxu0 }
 0x6fe   : > { %v2264_v48 = vpop.f32.mrf.mxu3 }
 0x6ff   : > { %v2312_v54 = vadd.f32 %v2311_v44, %v2264_v48 }
 0x702   : > { %v2316_v9 = vpop.f32.mrf.mxu0 }
 0x705   : > { %4658 = vmatmul.msk.bf16.gmra.mxu2 %vm903_vm1, %v6545_v55  ;;  %v6551_v55 = vld [vmem:[#allocation13_spill] sm:$0xff] }
 0x706   : > { %v5863_v57 = vpop.f32.mrf.mxu3 }
 0x70a   : > { %v5865_v18 = vpop.f32.mrf.mxu0 }
 0x70e   : > { %v2269_v56 = vpop.f32.mrf.mxu3 }
 0x70f   : > { %v2317_v33 = vadd.f32 %v2316_v9, %v2269_v56 }
 0x712   : > { %v2321_v10 = vpop.f32.mrf.mxu0 }
 0x715   : > { %4659 = vmatmul.msk.bf16.gmra.mxu2 %vm903_vm1, %v6546_v60  ;;  %v6552_v60 = vld [vmem:[#allocation15_spill] sm:$0xff] }
 0x716   : > { %v5869_v52 = vpop.f32.mrf.mxu3 }
 0x71e   : > { %v2274_v61 = vpop.f32.mrf.mxu3 }
 0x71f   : > { %v2322_v4 = vadd.f32 %v2321_v10, %v2274_v61 }
 0x725   : > { %4684 = vmatmul.msk.bf16.vlgmr.msrb.gmra.mxu2 %vm903_vm1, %v6547_v5  ;;  %v6553_v5 = vld [vmem:[#allocation17_spill] sm:$0xff] }
 0x726   : > { %v5873_v2 = vpop.f32.mrf.mxu3 }
 0x728   : > { %v2389_v3 = vpop.f32.mrf.mxu2 }
 0x729   : > { %v2409_v30 = vadd.f32 %v2389_v3, %v2307_v43 }
 0x72e   : > { %v2426_v29 = vpop.f32.mrf.mxu3 }
 0x730   : > { %v5875_v24 = vpop.f32.mrf.mxu2 }
 0x735   : > { %4685 = vmatmul.msk.bf16.gmra.mxu2 %vm903_vm1, %v6548_v62  ;;  %v6554_v62 = vld [vmem:[#allocation18_spill] sm:$0xff] }
 0x736   : > { %v2428_v27 = vpop.f32.mrf.mxu3 }
 0x737   : > { %v2449_v28 = vpack.c.bf16 %v2428_v27, %v2426_v29  ;;  %v5912_v27 = vpop.f32.mrf.mxu0 }
 0x738   : > { %v2394_v16 = vpop.f32.mrf.mxu2 }
 0x739   : > { %v2411_v37 = vadd.f32 %v2394_v16, %v2312_v54  ;;  %4642 = vmatmul.msk.bf16.vlgmr.msrb.gmra.mxu0 %vm1034_vm2, %v2449_v28 }
 0x73a   : > { %2843 = vmatpush.bf16.msrb.mxu0 %v5751_v49  ;;  %v4988_v49 = vld [vmem:[%s6487_s7 + $0x70] sm:$0xff] }
 0x73b   : > { %2627 = vmatpush.bf16.msra.mxu3 %v4988_v49  ;;  %v4989_v49 = vld [vmem:[%s6487_s7 + $0x78] sm:$0xff] }
 0x73c   : > { %2718 = vmatpush.bf16.msra.mxu1 %v4989_v49 }
 0x73e   : > { %2844 = vmatpush.bf16.msrb.mxu0 %v5756_v25  ;;  %v2431_v38 = vpop.f32.mrf.mxu3 }
 0x740   : > { %v5882_v47 = vpop.f32.mrf.mxu2 }
 0x742   : > { %2845 = vmatpush.bf16.msrb.mxu0 %v5761_v6  ;;  %v6550_v6 = vld [vmem:[#allocation16_spill] sm:$0xff] }
 0x745   : > { %4686 = vmatmul.msk.bf16.gmra.mxu2 %vm903_vm1, %v6549_v22 }
 0x746   : > { %2846 = vmatpush.bf16.msrb.mxu0 %v5766_v12  ;;  %v2433_v34 = vpop.f32.mrf.mxu3 }
 0x747   : > { %v2450_v23 = vpack.c.bf16 %v2433_v34, %v2431_v38  ;;  %v6555_v38 = vld [vmem:[#allocation19_spill] sm:$0xff] }
 0x748   : > { %v2399_v11 = vpop.f32.mrf.mxu2 }
 0x749   : > { %v2413_v50 = vadd.f32 %v2399_v11, %v2317_v33  ;;  %4643 = vmatmul.msk.bf16.gmra.mxu0 %vm1034_vm2, %v2450_v23  ;;  %v6556_v11 = vld [vmem:[#allocation20_spill] sm:$0xff] }
 0x74e   : > { %v2436_v53 = vpop.f32.mrf.mxu3 }
 0x750   : > { %v5892_v25 = vpop.f32.mrf.mxu2 }
 0x755   : > { %4687 = vmatmul.msk.bf16.gmra.mxu2 %vm903_vm1, %v6550_v6 }
 0x756   : > { %v2438_v35 = vpop.f32.mrf.mxu3 }
 0x757   : > { %v2451_v13 = vpack.c.bf16 %v2438_v35, %v2436_v53 }
 0x758   : > { %v2404_v12 = vpop.f32.mrf.mxu2 }
 0x759   : > { %v2415_v58 = vadd.f32 %v2404_v12, %v2322_v4  ;;  %4644 = vmatmul.msk.bf16.gmra.mxu0 %vm1034_vm2, %v2451_v13  ;;  %v4990_v12 = vld [vmem:[%s6487_s7 + $0x80] sm:$0xff] }
 0x75a   : > { %2809 = vmatpush.bf16.msrb.mxu3 %v4990_v12 }
 0x75e   : > { %v2441_v39 = vpop.f32.mrf.mxu3 }
 0x760   : > { %v5897_v40 = vpop.f32.mrf.mxu2 }
 0x766   : > { %v2443_v42 = vpop.f32.mrf.mxu3 }
 0x767   : > { %v2452_v43 = vpack.c.bf16 %v2443_v42, %v2441_v39 }
 0x768   : > { %v2575_v44 = vpop.f32.mrf.mxu2 }
 0x769   : > { %4645 = vmatmul.msk.bf16.gmra.mxu0 %vm1034_vm2, %v2452_v43 }
 0x770   : > { %v2577_v45 = vpop.f32.mrf.mxu2 }
 0x771   : > { %v2598_v48 = vpack.c.bf16 %v2577_v45, %v2575_v44  ;;  %v2538_v45 = vpop.f32.mrf.mxu1 }
 0x773   : > { %4666 = vmatmul.msk.bf16.vlgmr.msra.gmra.mxu3 %vm1034_vm2, %v2598_v48 }
 0x778   : > { %v2580_v54 = vpop.f32.mrf.mxu2 }
 0x779   : > { %4670 = vmatmul.msk.bf16.vlgmr.msra.gmra.mxu0 %vm903_vm1, %v6551_v55 }
 0x780   : > { %v2582_v9 = vpop.f32.mrf.mxu2 }
 0x781   : > { %v2599_v56 = vpack.c.bf16 %v2582_v9, %v2580_v54  ;;  %v6558_v54 = vld [vmem:[#allocation22_spill] sm:$0xff] }
 0x783   : > { %4667 = vmatmul.msk.bf16.gmra.mxu3 %vm1034_vm2, %v2599_v56  ;;  %v5938_v56 = vpop.f32.mrf.mxu1 }
 0x788   : > { %v2585_v33 = vpop.f32.mrf.mxu2 }
 0x789   : > { %4671 = vmatmul.msk.bf16.gmra.mxu0 %vm903_vm1, %v6552_v60 }
 0x790   : > { %v2587_v10 = vpop.f32.mrf.mxu2 }
 0x791   : > { %v2600_v61 = vpack.c.bf16 %v2587_v10, %v2585_v33 }
 0x793   : > { %4668 = vmatmul.msk.bf16.gmra.mxu3 %vm1034_vm2, %v2600_v61 }
 0x798   : > { %v2590_v4 = vpop.f32.mrf.mxu2 }
 0x799   : > { %4672 = vmatmul.msk.bf16.gmra.mxu0 %vm903_vm1, %v6553_v5 }
 0x7a0   : > { %v2592_v3 = vpop.f32.mrf.mxu2 }
 0x7a1   : > { %v2601_v29 = vpack.c.bf16 %v2592_v3, %v2590_v4 }
 0x7a3   : > { %4669 = vmatmul.msk.bf16.gmra.mxu3 %vm1034_vm2, %v2601_v29  ;;  %v2543_v29 = vpop.f32.mrf.mxu1 }
 0x7a8   : > { %v2757_v6 = vpop.f32.mrf.mxu2 }
 0x7a9   : > { %4673 = vmatmul.msk.bf16.gmra.mxu0 %vm903_vm1, %v6554_v62 }
 0x7b0   : > { %v2759_v13 = vpop.f32.mrf.mxu2 }
 0x7b1   : > { %v2780_v39 = vpack.c.bf16 %v2759_v13, %v2757_v6 }
 0x7b3   : > { %4694 = vmatmul.msk.bf16.vlgmr.msrb.gmra.mxu3 %vm1034_vm2, %v2780_v39 }
 0x7b6   : > { %v2480_v28 = vpop.f32.mrf.mxu0 }
 0x7b7   : > { %v2500_v16 = vadd.f32 %v2480_v28, %v2409_v30 }
 0x7b8   : > { %v2762_v43 = vpop.f32.mrf.mxu2 }
 0x7b9   : > { %4698 = vmatmul.msk.bf16.vlgmr.msrb.gmra.mxu0 %vm903_vm1, %v6555_v38  ;;  %v2558_v60 = vadd.f32 %v2538_v45, %v2500_v16 }
 0x7be   : > { %v5916_v22 = vpop.f32.mrf.mxu0 }
 0x7c6   : > { %v2485_v34 = vpop.f32.mrf.mxu0 }
 0x7c7   : > { %v2502_v23 = vadd.f32 %v2485_v34, %v2411_v37  ;;  %v6557_v37 = vld [vmem:[#allocation21_spill] sm:$0xff]  ;;  %v5944_v34 = vpop.f32.mrf.mxu1 }
 0x7c9   : > { %4699 = vmatmul.msk.bf16.gmra.mxu0 %vm903_vm1, %v6556_v11  ;;  %v2560_v11 = vadd.f32 %v2543_v29, %v2502_v23 }
 0x7ce   : > { %v5920_v53 = vpop.f32.mrf.mxu0 }
 0x7d6   : > { %v2490_v35 = vpop.f32.mrf.mxu0 }
 0x7d7   : > { %v2504_v30 = vadd.f32 %v2490_v35, %v2413_v50  ;;  %v2764_v50 = vpop.f32.mrf.mxu2 }
 0x7d8   : > { %v2781_v55 = vpack.c.bf16 %v2764_v50, %v2762_v43  ;;  %v2548_v43 = vpop.f32.mrf.mxu1 }
 0x7d9   : > { %4700 = vmatmul.msk.bf16.gmra.mxu0 %vm903_vm1, %v6557_v37  ;;  %v2562_v23 = vadd.f32 %v2548_v43, %v2504_v30 }
 0x7da   : > { %4695 = vmatmul.msk.bf16.gmra.mxu3 %vm1034_vm2, %v2781_v55 }
 0x7de   : > { %v5931_v42 = vpop.f32.mrf.mxu0 }
 0x7df   : > { %v2767_v33 = vpop.f32.mrf.mxu2 }
 0x7e0   : > { %v5953_v55 = vpop.f32.mrf.mxu1 }
 0x7e6   : > { %v2495_v44 = vpop.f32.mrf.mxu0 }
 0x7e7   : > { %v2506_v48 = vadd.f32 %v2495_v44, %v2415_v58  ;;  %v2769_v5 = vpop.f32.mrf.mxu2  ;;  %v4991_v44 = vld [vmem:[%s6487_s7 + $0x88] sm:$0xff] }
 0x7e8   : > { %v2782_v3 = vpack.c.bf16 %v2769_v5, %v2767_v33  ;;  %2900 = vmatpush.bf16.msrb.mxu1 %v4991_v44 }
 0x7e9   : > { %4701 = vmatmul.msk.bf16.gmra.mxu0 %vm903_vm1, %v6558_v54 }
 0x7ea   : > { %4696 = vmatmul.msk.bf16.gmra.mxu3 %vm1034_vm2, %v2782_v3 }
 0x7ee   : > { %v5936_v9 = vpop.f32.mrf.mxu0 }
 0x7ef   : > { %v2772_v38 = vpop.f32.mrf.mxu2 }
 0x7f6   : > { %v2629_v10 = vpop.f32.mrf.mxu3  ;;  %v2666_v61 = vpop.f32.mrf.mxu0 }
 0x7f7   : > { %v2649_v4 = vadd.f32 %v2629_v10, %v2558_v60  ;;  %v2774_v35 = vpop.f32.mrf.mxu2 }
 0x7f8   : > { %v2783_v13 = vpack.c.bf16 %v2774_v35, %v2772_v38 }
 0x7fa   : > { %4697 = vmatmul.msk.bf16.gmra.mxu3 %vm1034_vm2, %v2783_v13 }
 0x7fe   : > { %v5941_v58 = vpop.f32.mrf.mxu3  ;;  %v2668_v62 = vpop.f32.mrf.mxu0 }
 0x7ff   : > { %v2689_v28 = vpack.c.bf16 %v2668_v62, %v2666_v61  ;;  %v2553_v61 = vpop.f32.mrf.mxu1 }
 0x800   : > { %v2564_v5 = vadd.f32 %v2553_v61, %v2506_v48 }
 0x801   : > { %4680 = vmatmul.msk.bf16.vlgmr.msra.gmra.mxu1 %vm1034_vm2, %v2689_v28 }
 0x806   : > { %v2634_v49 = vpop.f32.mrf.mxu3  ;;  %v2671_v16 = vpop.f32.mrf.mxu0 }
 0x807   : > { %v2651_v6 = vadd.f32 %v2634_v49, %v2560_v11 }
 0x80e   : > { %v5947_v12 = vpop.f32.mrf.mxu3  ;;  %v2673_v39 = vpop.f32.mrf.mxu0 }
 0x80f   : > { %v2690_v37 = vpack.c.bf16 %v2673_v39, %v2671_v16 }
 0x811   : > { %4681 = vmatmul.msk.bf16.gmra.mxu1 %vm1034_vm2, %v2690_v37 }
 0x816   : > { %v2639_v45 = vpop.f32.mrf.mxu3  ;;  %v2676_v54 = vpop.f32.mrf.mxu0 }
 0x817   : > { %v2653_v50 = vadd.f32 %v2639_v45, %v2562_v23  ;;  %v5963_v45 = vpop.f32.mrf.mxu1 }
 0x81e   : > { %v5955_v33 = vpop.f32.mrf.mxu3  ;;  %v2678_v60 = vpop.f32.mrf.mxu0 }
 0x81f   : > { %v2691_v10 = vpack.c.bf16 %v2678_v60, %v2676_v54 }
 0x821   : > { %4682 = vmatmul.msk.bf16.gmra.mxu1 %vm1034_vm2, %v2691_v10 }
 0x826   : > { %v2644_v3 = vpop.f32.mrf.mxu3  ;;  %v2681_v29 = vpop.f32.mrf.mxu0 }
 0x827   : > { %v2655_v62 = vadd.f32 %v2644_v3, %v2564_v5 }
 0x82e   : > { %v2683_v28 = vpop.f32.mrf.mxu0 }
 0x82f   : > { %v2692_v38 = vpack.c.bf16 %v2683_v28, %v2681_v29 }
 0x831   : > { %4683 = vmatmul.msk.bf16.gmra.mxu1 %vm1034_vm2, %v2692_v38  ;;  %v4992_v38 = vld [vmem:[%s6488_s8 + $0x8] sm:$0xff] }
 0x832   : > { %2988 = vmatpush.bf16.msra.mxu2 %v4992_v38 }
 0x836   : > { %v2848_v30 = vpop.f32.mrf.mxu0  ;;  %3218 = vmatpush.bf16.msrb.mxu2 %v4998_v0 }
 0x83e   : > { %v2850_v11 = vpop.f32.mrf.mxu0 }
 0x83f   : > { %v2871_v49 = vpack.c.bf16 %v2850_v11, %v2848_v30  ;;  %v5968_v30 = vpop.f32.mrf.mxu3 }
 0x841   : > { %4708 = vmatmul.msk.bf16.vlgmr.msrb.gmra.mxu1 %vm1034_vm2, %v2871_v49 }
 0x846   : > { %v2853_v16 = vpop.f32.mrf.mxu0 }
 0x847   : > { %v2811_v49 = vpop.f32.mrf.mxu3 }
 0x84e   : > { %v2855_v35 = vpop.f32.mrf.mxu0 }
 0x84f   : > { %v2872_v13 = vpack.c.bf16 %v2855_v35, %v2853_v16 }
 0x851   : > { %4709 = vmatmul.msk.bf16.gmra.mxu1 %vm1034_vm2, %v2872_v13  ;;  %v2813_v13 = vpop.f32.mrf.mxu3 }
 0x856   : > { %v2858_v39 = vpop.f32.mrf.mxu0 }
 0x85e   : > { %v2860_v37 = vpop.f32.mrf.mxu0 }
 0x85f   : > { %v2873_v48 = vpack.c.bf16 %v2860_v37, %v2858_v39 }
 0x861   : > { %4710 = vmatmul.msk.bf16.gmra.mxu1 %vm1034_vm2, %v2873_v48 }
 0x866   : > { %v2863_v43 = vpop.f32.mrf.mxu0 }
 0x86e   : > { %v2865_v44 = vpop.f32.mrf.mxu0 }
 0x86f   : > { %v2874_v23 = vpack.c.bf16 %v2865_v44, %v2863_v43  ;;  %v2816_v44 = vpop.f32.mrf.mxu3 }
 0x871   : > { %4711 = vmatmul.msk.bf16.gmra.mxu1 %vm1034_vm2, %v2874_v23 }
 0x87e   : > { %v2720_v54 = vpop.f32.mrf.mxu1 }
 0x87f   : > { %v2740_v60 = vadd.f32 %v2720_v54, %v2649_v4  ;;  %v2309_v4 = vadd.f32 %v5853_v41, %v5857_v46  ;;  %v5983_v41 = vld [vmem:[%s6490_s10 + $0x1] ss:$0 sm:$0xff]  ;;  %v2314_v46 = vadd.f32 %v5859_v51, %v5863_v57 }
 0x881   : > { %v2831_v23 = vadd.f32 %v2811_v49, %v2740_v60 }
 0x886   : > { %v2722_v10 = vpop.f32.mrf.mxu1 }
 0x88e   : > { %v2725_v61 = vpop.f32.mrf.mxu1 }
 0x88f   : > { %v2742_v5 = vadd.f32 %v2725_v61, %v2651_v6 }
 0x891   : > { %v2833_v57 = vadd.f32 %v2816_v44, %v2742_v5 }
 0x896   : > { %v2727_v3 = vpop.f32.mrf.mxu1 }
 0x89e   : > { %v2730_v29 = vpop.f32.mrf.mxu1 }
 0x89f   : > { %v2744_v28 = vadd.f32 %v2730_v29, %v2653_v50  ;;  %v2410_v50 = vadd.f32 %v5875_v24, %v2309_v4 }
 0x8a1   : > { %v2501_v39 = vadd.f32 %v5916_v22, %v2410_v50  ;;  %v2412_v22 = vadd.f32 %v5882_v47, %v2314_v46 }
 0x8a3   : > { %v2559_v37 = vadd.f32 %v5938_v56, %v2501_v39 }
 0x8a5   : > { %v2650_v43 = vadd.f32 %v5941_v58, %v2559_v37  ;;  %v2503_v58 = vadd.f32 %v5920_v53, %v2412_v22  ;;  %v2319_v53 = vadd.f32 %v5865_v18, %v5869_v52  ;;  %v2324_v22 = vadd.f32 %v5912_v27, %v5873_v2 }
 0x8a6   : > { %v2732_v11 = vpop.f32.mrf.mxu1 }
 0x8a7   : > { %v2741_v54 = vadd.f32 %v2722_v10, %v2650_v43  ;;  %v2818_v10 = vpop.f32.mrf.mxu3  ;;  %v2414_v43 = vadd.f32 %v5892_v25, %v2319_v53 }
 0x8a9   : > { %v2832_v24 = vadd.f32 %v2813_v13, %v2741_v54  ;;  %v2505_v54 = vadd.f32 %v5931_v42, %v2414_v43 }
 0x8ab   : > { %v2563_v5 = vadd.f32 %v5953_v55, %v2505_v54 }
 0x8ad   : > { %v2654_v18 = vadd.f32 %v5955_v33, %v2563_v5 }
 0x8ae   : > { %v2735_v16 = vpop.f32.mrf.mxu1 }
 0x8af   : > { %v5970_v35 = vadd.f32 %v2735_v16, %v2655_v62  ;;  %v2561_v16 = vadd.f32 %v5944_v34, %v2503_v58  ;;  %v2821_v39 = vpop.f32.mrf.mxu3  ;;  %v2745_v25 = vadd.f32 %v2732_v11, %v2654_v18 }
 0x8b0   : > { %v2835_v52 = vadd.f32 %v2821_v39, %v2744_v28 }
 0x8b1   : > { %v2652_v51 = vadd.f32 %v5947_v12, %v2561_v16 }
 0x8b3   : > { %v2743_v47 = vadd.f32 %v2727_v3, %v2652_v51 }
 0x8b5   : > { %v2834_v37 = vadd.f32 %v2818_v10, %v2743_v47 }
 0x8b6   : > { %v5974_v6 = vpop.f32.mrf.mxu1 }
 0x8b7   : > { %v2823_v44 = vpop.f32.mrf.mxu3 }
 0x8b8   : > { %v2836_v42 = vadd.f32 %v2823_v44, %v2745_v25 }
 0x8be   : > { %v2902_v48 = vpop.f32.mrf.mxu1 }
 0x8bf   : > { %v2922_v62 = vadd.f32 %v2902_v48, %v2831_v23 }
 0x8c1   : > { %v2935_v56 = vadd.f32 %v5983_v41, %v2922_v62 }
 0x8c3   : > { %v2943_v38 = vmax.f32 %v2935_v56, 0.0 }
 0x8c6   : > { %v2904_v61 = vpop.f32.mrf.mxu1 }
 0x8c7   : > { %v2923_v29 = vadd.f32 %v2904_v61, %v2832_v24 }
 0x8c9   : > { %v2936_v60 = vadd.f32 %v5983_v41, %v2923_v29  ;;  %v2416_v29 = vadd.f32 %v5897_v40, %v2324_v22 }
 0x8cb   : > { %v2944_v49 = vmax.f32 %v2936_v60, 0.0  ;;  %v2826_v60 = vpop.f32.mrf.mxu3  ;;  %v2507_v10 = vadd.f32 %v5936_v9, %v2416_v29 }
 0x8cc   : > { %v2837_v40 = vadd.f32 %v2826_v60, %v5970_v35  ;;  %v4995_v35 = vld [vmem:[%s6486_s6 + $0x30] sm:$0xff] }
 0x8cd   : > { %v2954_v4 = vpack.c.bf16 %v2944_v49, %v2943_v38  ;;  %v2565_v28 = vadd.f32 %v5963_v45, %v2507_v10 }
 0x8ce   : > { %v2907_v50 = vpop.f32.mrf.mxu1 }
 0x8cf   : > { %4720 = vmatmul.msk.bf16.vlgmr.msra.gmra.mxu2 %vm1034_vm2, %v2954_v4  ;;  %v2924_v13 = vadd.f32 %v2907_v50, %v2833_v57  ;;  %v2656_v2 = vadd.f32 %v5968_v30, %v2565_v28  ;;  %v4996_v30 = vld [vmem:[%s6486_s6 + $0x38] sm:$0xff] }
 0x8d0   : > { %3084 = vmatpush.bf16.msra.mxu3 %v4996_v30 }
 0x8d1   : > { %v2937_v23 = vadd.f32 %v5983_v41, %v2924_v13  ;;  %v2747_v27 = vadd.f32 %v5974_v6, %v2656_v2  ;;  %v4994_v6 = vld [vmem:[%s6486_s6 + $0x28] sm:$0xff] }
 0x8d3   : > { %v2945_v62 = vmax.f32 %v2937_v23, 0.0  ;;  %v2828_v4 = vpop.f32.mrf.mxu3 }
 0x8d4   : > { %v2838_v51 = vadd.f32 %v2828_v4, %v2747_v27  ;;  %3085 = vmatpush.bf16.msra.mxu3 %v4995_v35 }
 0x8d6   : > { %v2909_v48 = vpop.f32.mrf.mxu1 }
 0x8d7   : > { %v2925_v34 = vadd.f32 %v2909_v48, %v2834_v37  ;;  %v5025_v48 = vld [vmem:[%s6491_s11 + $0x1] ss:$0 sm:$0xff] }
 0x8d8   : > { %3086 = vmatpush.bf16.msra.mxu3 %v4994_v6 }
 0x8d9   : > { %v2938_v12 = vadd.f32 %v5983_v41, %v2925_v34 }
 0x8db   : > { %v2946_v46 = vmax.f32 %v2938_v12, 0.0 }
 0x8dd   : > { %v2955_v3 = vpack.c.bf16 %v2946_v46, %v2945_v62 }
 0x8de   : > { %v2912_v24 = vpop.f32.mrf.mxu1 }
 0x8df   : > { %4721 = vmatmul.msk.bf16.gmra.mxu2 %vm1034_vm2, %v2955_v3  ;;  %v2926_v61 = vadd.f32 %v2912_v24, %v2835_v52 }
 0x8e1   : > { %v2939_v58 = vadd.f32 %v5983_v41, %v2926_v61 }
 0x8e3   : > { %v2947_v38 = vmax.f32 %v2939_v58, 0.0 }
 0x8e6   : > { %v2914_v56 = vpop.f32.mrf.mxu1 }
 0x8e7   : > { %v2927_v55 = vadd.f32 %v2914_v56, %v2836_v42 }
 0x8e9   : > { %v2940_v33 = vadd.f32 %v5983_v41, %v2927_v55 }
 0x8eb   : > { %v2948_v49 = vmax.f32 %v2940_v33, 0.0 }
 0x8ed   : > { %v2956_v11 = vpack.c.bf16 %v2948_v49, %v2947_v38 }
 0x8ee   : > { %v2917_v16 = vpop.f32.mrf.mxu1 }
 0x8ef   : > { %4722 = vmatmul.msk.bf16.gmra.mxu2 %vm1034_vm2, %v2956_v11  ;;  %v2928_v50 = vadd.f32 %v2917_v16, %v2837_v40  ;;  %v5026_v11 = vld [vmem:[%s6489_s9 + $0x2] ss:$0 sm:$0xff] }
 0x8f1   : > { %v2941_v57 = vadd.f32 %v5983_v41, %v2928_v50 }
 0x8f3   : > { %v2949_v45 = vmax.f32 %v2941_v57, 0.0 }
 0x8f6   : > { %v2919_v9 = vpop.f32.mrf.mxu1 }
 0x8f7   : > { %v2929_v47 = vadd.f32 %v2919_v9, %v2838_v51 }
 0x8f9   : > { %v2942_v13 = vadd.f32 %v5983_v41, %v2929_v47  ;;  %v4993_v41 = vld [vmem:[%s6486_s6 + $0x20] sm:$0xff] }
 0x8fa   : > { %3087 = vmatpush.bf16.msra.mxu3 %v4993_v41 }
 0x8fb   : > { %v2950_v39 = vmax.f32 %v2942_v13, 0.0 }
 0x8fd   : > { %v2957_v53 = vpack.c.bf16 %v2950_v39, %v2949_v45 }
 0x8ff   : > { %4723 = vmatmul.msk.bf16.gmra.mxu2 %vm1034_vm2, %v2957_v53 }
 0x952   : > { %v2990_v37 = vpop.f32.mrf.mxu2 }
 0x953   : > { %v2991_v43 = vadd.f32 %v5025_v48, %v2990_v37 }
 0x955   : > { %v6034_v34 = vadd.f32 %v2991_v43, %v2058_v14 }
 0x957   : > { %v3018_v62 = vmax.f32 %v6034_v34, 0.0 }
 0x95a   : > { %v2992_v23 = vpop.f32.mrf.mxu2 }
 0x95b   : > { %v2993_v54 = vadd.f32 %v5025_v48, %v2992_v23  ;;  %v4999_v23 = vld [vmem:[%s6487_s7 + $0xa0] sm:$0xff] }
 0x95d   : > { %v6038_v12 = vadd.f32 %v2993_v54, %v2059_v15  ;;  %v5030_v54 = vld [vmem:[%s6482_s2] sm:$0xff] }
 0x95f   : > { %v3019_v46 = vmax.f32 %v6038_v12, 0.0 }
 0x961   : > { %v3035_v5 = vpack.c.bf16 %v3019_v46, %v3018_v62 }
 0x962   : > { %v2995_v3 = vpop.f32.mrf.mxu2 }
 0x963   : > { %4749 = vmatmul.msk.bf16.vlgmr.msra.gmra.mxu3 %vm903_vm1, %v3035_v5  ;;  %v2996_v31 = vadd.f32 %v5025_v48, %v2995_v3  ;;  %v5031_v5 = vld [vmem:[%s6482_s2 + $0x20] sm:$0xff]  ;;  %v5032_v3 = vld [vmem:[%s6482_s2 + $0x8] sm:$0xff] }
 0x965   : > { %v6049_v44 = vadd.f32 %v2996_v31, %v2060_v32  ;;  %v5033_v31 = vld [vmem:[%s6482_s2 + $0x28] sm:$0xff] }
 0x967   : > { %v3020_v24 = vmax.f32 %v6049_v44, 0.0  ;;  %v3987_v44 = vld [vmem:[%s6483_s3] sm:$0x3] }
 0x96a   : > { %v2997_v14 = vpop.f32.mrf.mxu2 }
 0x96b   : > { %v2998_v21 = vadd.f32 %v5025_v48, %v2997_v14  ;;  %v5034_v14 = vld [vmem:[%s6482_s2 + $0x10] sm:$0xff] }
 0x96d   : > { %v6053_v15 = vadd.f32 %v2998_v21, %v2061_v26  ;;  %v5035_v21 = vld [vmem:[%s6482_s2 + $0x30] sm:$0xff] }
 0x96f   : > { %v3021_v18 = vmax.f32 %v6053_v15, 0.0 }
 0x971   : > { %v3036_v52 = vpack.c.bf16 %v3021_v18, %v3020_v24 }
 0x972   : > { %v3000_v25 = vpop.f32.mrf.mxu2 }
 0x973   : > { %4750 = vmatmul.msk.bf16.gmra.mxu3 %vm903_vm1, %v3036_v52  ;;  %v3001_v63 = vadd.f32 %v5025_v48, %v3000_v25  ;;  %v5036_v52 = vld [vmem:[%s6482_s2 + $0x18] sm:$0xff] }
 0x974   : > { %v5037_v25 = vld [vmem:[%s6482_s2 + $0x38] sm:$0xff] }
 0x975   : > { %v6064_v61 = vadd.f32 %v3001_v63, %v2062_v20  ;;  %v5038_v63 = vld [vmem:[%s6482_s2 + $0x40] sm:$0xff] }
 0x977   : > { %v3022_v22 = vmax.f32 %v6064_v61, 0.0 }
 0x97a   : > { %v3002_v32 = vpop.f32.mrf.mxu2 }
 0x97b   : > { %v3003_v7 = vadd.f32 %v5025_v48, %v3002_v32  ;;  %v5039_v32 = vld [vmem:[%s6482_s2 + $0x48] sm:$0xff] }
 0x97d   : > { %v6068_v26 = vadd.f32 %v3003_v7, %v2063_v17  ;;  %v5001_v7 = vld [vmem:[%s6487_s7 + $0xb0] sm:$0xff] }
 0x97f   : > { %v3023_v42 = vmax.f32 %v6068_v26, 0.0 }
 0x981   : > { %v3037_v56 = vpack.c.bf16 %v3023_v42, %v3022_v22 }
 0x982   : > { %v3005_v29 = vpop.f32.mrf.mxu2 }
 0x983   : > { %4751 = vmatmul.msk.bf16.gmra.mxu3 %vm903_vm1, %v3037_v56  ;;  %v3006_v59 = vadd.f32 %v5025_v48, %v3005_v29  ;;  %v5040_v56 = vld [vmem:[%s6482_s2 + $0x50] sm:$0xff] }
 0x984   : > { %v4997_v29 = vld [vmem:[%s6487_s7 + $0x90] sm:$0xff] }
 0x985   : > { %v6079_v58 = vadd.f32 %v3006_v59, %v2064_v19  ;;  %3265 = vmatpush.bf16.msrb.mxu3 %v4997_v29  ;;  %v5000_v59 = vld [vmem:[%s6487_s7 + $0xa8] sm:$0xff] }
 0x987   : > { %v3024_v55 = vmax.f32 %v6079_v58, 0.0 }
 0x989   : > { %3439 = vmatpush.bf16.msra.mxu3 %v5000_v59 }
 0x98a   : > { %v3007_v20 = vpop.f32.mrf.mxu2 }
 0x98b   : > { %v3008_v8 = vadd.f32 %v5025_v48, %v3007_v20  ;;  %v5041_v20 = vld [vmem:[%s6482_s2 + $0x58] sm:$0xff] }
 0x98d   : > { %v6083_v17 = vadd.f32 %v3008_v8, %v2065_v36 }
 0x98f   : > { %v3025_v60 = vmax.f32 %v6083_v17, 0.0 }
 0x991   : > { %v3038_v10 = vpack.c.bf16 %v3025_v60, %v3024_v55 }
 0x993   : > { %4752 = vmatmul.msk.bf16.gmra.mxu3 %vm903_vm1, %v3038_v10 }
 0x9e6   : > { %v3089_v33 = vpop.f32.mrf.mxu3 }
 0x9e7   : > { %v3090_v35 = vadd.f32 %v5026_v11, %v3089_v33 }
 0x9e9   : > { %v3109_v48 = vmax.f32 %v3090_v35, 0.0 }
 0x9ee   : > { %v3091_v1 = vpop.f32.mrf.mxu3 }
 0x9ef   : > { %v3092_v39 = vadd.f32 %v5026_v11, %v3091_v1 }
 0x9f1   : > { %v3110_v41 = vmax.f32 %v3092_v39, 0.0 }
 0x9f3   : > { %v6113_v43 = vpack.c.bf16 %v3110_v41, %v3109_v48  ;;  %v5042_v48 = vld [vmem:[%s6482_s2 + $0x60] sm:$0xff] }
 0x9f6   : > { %v3094_v19 = vpop.f32.mrf.mxu3 }
 0x9f7   : > { %v3095_v13 = vadd.f32 %v5026_v11, %v3094_v19 }
 0x9f9   : > { %v3111_v6 = vmax.f32 %v3095_v13, 0.0 }
 0x9fe   : > { %v3096_v38 = vpop.f32.mrf.mxu3 }
 0x9ff   : > { %v3097_v9 = vadd.f32 %v5026_v11, %v3096_v38 }
 0xa01   : > { %v3112_v53 = vmax.f32 %v3097_v9, 0.0 }
 0xa03   : > { %v6108_v37 = vpack.c.bf16 %v3112_v53, %v3111_v6 }
 0xa06   : > { %v3099_v36 = vpop.f32.mrf.mxu3 }
 0xa07   : > { %v3100_v4 = vadd.f32 %v5026_v11, %v3099_v36 }
 0xa09   : > { %v3113_v45 = vmax.f32 %v3100_v4, 0.0 }
 0xa0e   : > { %v3101_v49 = vpop.f32.mrf.mxu3 }
 0xa0f   : > { %v3102_v40 = vadd.f32 %v5026_v11, %v3101_v49 }
 0xa11   : > { %v3114_v57 = vmax.f32 %v3102_v40, 0.0 }
 0xa13   : > { %v6103_v30 = vpack.c.bf16 %v3114_v57, %v3113_v45 }
 0xa16   : > { %v3104_v28 = vpop.f32.mrf.mxu3 }
 0xa17   : > { %v3105_v16 = vadd.f32 %v5026_v11, %v3104_v28 }
 0xa19   : > { %v3115_v50 = vmax.f32 %v3105_v16, 0.0 }
 0xa1e   : > { %v3106_v2 = vpop.f32.mrf.mxu3 }
 0xa1f   : > { %v3107_v27 = vadd.f32 %v5026_v11, %v3106_v2 }
 0xa21   : > { %v3116_v51 = vmax.f32 %v3107_v27, 0.0 }
 0xa23   : > { %v6098_v47 = vpack.c.bf16 %v3116_v51, %v3115_v50 }
 0xa25   : > { %3125 = vmatpush.bf16.msra.mxu0 %v6098_v47  ;;  %3161 = vmatpush.bf16.msra.mxu1 %v6098_v47 }
 0xa26   : > { %3382 = vmatpush.bf16.msra.mxu2 %v6098_v47 }
 0xa29   : > { %3126 = vmatpush.bf16.msra.mxu0 %v6103_v30  ;;  %3162 = vmatpush.bf16.msra.mxu1 %v6103_v30 }
 0xa2a   : > { %3383 = vmatpush.bf16.msra.mxu2 %v6103_v30 }
 0xa2d   : > { %3127 = vmatpush.bf16.msra.mxu0 %v6108_v37  ;;  %3163 = vmatpush.bf16.msra.mxu1 %v6108_v37 }
 0xa2e   : > { %3384 = vmatpush.bf16.msra.mxu2 %v6108_v37 }
 0xa31   : > { %3128 = vmatpush.bf16.msra.mxu0 %v6113_v43  ;;  %3164 = vmatpush.bf16.msra.mxu1 %v6113_v43 }
 0xa32   : > { %3385 = vmatpush.bf16.msra.mxu2 %v6113_v43 }
 0xa34   : > { %4753 = vmatmul.msk.bf16.vlgmr.msra.gmra.mxu0 %vm903_vm1, %v5030_v54  ;;  %4759 = vmatmul.msk.bf16.vlgmr.msra.gmra.mxu1 %vm903_vm1, %v5031_v5 }
 0xa35   : > { %3291 = vmatpush.bf16.msrb.mxu0 %v6098_v47  ;;  %3348 = vmatpush.bf16.msrb.mxu1 %v4999_v23 }
 0xa39   : > { %3531 = vmatpush.bf16.msra.mxu1 %v6098_v47  ;;  %3292 = vmatpush.bf16.msrb.mxu0 %v6103_v30 }
 0xa3d   : > { %3532 = vmatpush.bf16.msra.mxu1 %v6103_v30  ;;  %3293 = vmatpush.bf16.msrb.mxu0 %v6108_v37 }
 0xa41   : > { %3533 = vmatpush.bf16.msra.mxu1 %v6108_v37  ;;  %3294 = vmatpush.bf16.msrb.mxu0 %v6113_v43 }
 0xa44   : > { %4754 = vmatmul.msk.bf16.gmra.mxu0 %vm903_vm1, %v5032_v3  ;;  %4760 = vmatmul.msk.bf16.gmra.mxu1 %vm903_vm1, %v5033_v31  ;;  %v5043_v3 = vld [vmem:[%s6482_s2 + $0x68] sm:$0xff] }
 0xa45   : > { %3534 = vmatpush.bf16.msra.mxu1 %v6113_v43  ;;  %3497 = vmatpush.bf16.msra.mxu0 %v5001_v7  ;;  %v5045_v7 = vld [vmem:[%s6482_s2 + $0x78] sm:$0xff] }
 0xa54   : > { %4755 = vmatmul.msk.bf16.gmra.mxu0 %vm903_vm1, %v5034_v14  ;;  %4761 = vmatmul.msk.bf16.gmra.mxu1 %vm903_vm1, %v5035_v21 }
 0xa64   : > { %4756 = vmatmul.msk.bf16.gmra.mxu0 %vm903_vm1, %v5036_v52  ;;  %4762 = vmatmul.msk.bf16.gmra.mxu1 %vm903_vm1, %v5037_v25  ;;  %v5044_v52 = vld [vmem:[%s6482_s2 + $0x70] sm:$0xff] }
 0xa74   : > { %4781 = vmatmul.msk.bf16.vlgmr.msrb.gmra.mxu0 %vm903_vm1, %v5038_v63 }
 0xa84   : > { %4782 = vmatmul.msk.bf16.gmra.mxu0 %vm903_vm1, %v5039_v32 }
 0xa94   : > { %4783 = vmatmul.msk.bf16.gmra.mxu0 %vm903_vm1, %v5040_v56  ;;  %v5046_v56 = vld [vmem:[%s6482_s2 + $0xa0] sm:$0xff] }
 0xaa4   : > { %4784 = vmatmul.msk.bf16.gmra.mxu0 %vm903_vm1, %v5041_v20 }
 0xab1   : > { %v3130_v8 = vpop.f32.mrf.mxu0  ;;  %v3166_v10 = vpop.f32.mrf.mxu1 }
 0xab4   : > { %4815 = vmatmul.msk.bf16.vlgmr.msra.gmra.mxu0 %vm1034_vm2, %v6113_v43 }
 0xab9   : > { %v3132_v33 = vpop.f32.mrf.mxu0  ;;  %v3168_v1 = vpop.f32.mrf.mxu1 }
 0xaba   : > { %v3153_v19 = vpack.c.bf16 %v3132_v33, %v3130_v8  ;;  %v3189_v38 = vpack.c.bf16 %v3168_v1, %v3166_v10  ;;  %v5047_v33 = vld [vmem:[%s6482_s2 + $0xa8] sm:$0xff] }
 0xabc   : > { %4769 = vmatmul.msk.bf16.vlgmr.msrb.gmra.mxu2 %vm1034_vm2, %v3189_v38  ;;  %4777 = vmatmul.msk.bf16.vlgmr.msrb.gmra.mxu3 %vm1034_vm2, %v3153_v19 }
 0xabd   : > { %3622 = vmatpush.bf16.msrb.mxu3 %v6098_v47 }
 0xac1   : > { %3623 = vmatpush.bf16.msrb.mxu3 %v6103_v30  ;;  %v3135_v0 = vpop.f32.mrf.mxu0  ;;  %v3171_v36 = vpop.f32.mrf.mxu1 }
 0xac4   : > { %4816 = vmatmul.msk.bf16.gmra.mxu0 %vm1034_vm2, %v6108_v37 }
 0xac5   : > { %3624 = vmatpush.bf16.msrb.mxu3 %v6108_v37 }
 0xac9   : > { %3625 = vmatpush.bf16.msrb.mxu3 %v6113_v43  ;;  %v3137_v49 = vpop.f32.mrf.mxu0  ;;  %v3173_v28 = vpop.f32.mrf.mxu1 }
 0xaca   : > { %v3154_v11 = vpack.c.bf16 %v3137_v49, %v3135_v0  ;;  %v3190_v16 = vpack.c.bf16 %v3173_v28, %v3171_v36  ;;  %v5048_v49 = vld [vmem:[%s6482_s2 + $0xb0] sm:$0xff] }
 0xacc   : > { %4770 = vmatmul.msk.bf16.gmra.mxu2 %vm1034_vm2, %v3190_v16  ;;  %4778 = vmatmul.msk.bf16.gmra.mxu3 %vm1034_vm2, %v3154_v11 }
 0xad1   : > { %v3140_v2 = vpop.f32.mrf.mxu0  ;;  %v3176_v40 = vpop.f32.mrf.mxu1 }
 0xad4   : > { %4817 = vmatmul.msk.bf16.gmra.mxu0 %vm1034_vm2, %v6103_v30 }
 0xad9   : > { %v3142_v27 = vpop.f32.mrf.mxu0  ;;  %v3178_v4 = vpop.f32.mrf.mxu1 }
 0xada   : > { %v3155_v50 = vpack.c.bf16 %v3142_v27, %v3140_v2  ;;  %v3191_v51 = vpack.c.bf16 %v3178_v4, %v3176_v40  ;;  %v5049_v27 = vld [vmem:[%s6482_s2 + $0xb8] sm:$0xff] }
 0xadc   : > { %4771 = vmatmul.msk.bf16.gmra.mxu2 %vm1034_vm2, %v3191_v51  ;;  %4779 = vmatmul.msk.bf16.gmra.mxu3 %vm1034_vm2, %v3155_v50 }
 0xae1   : > { %v3145_v9 = vpop.f32.mrf.mxu0  ;;  %v3181_v57 = vpop.f32.mrf.mxu1 }
 0xae4   : > { %4818 = vmatmul.msk.bf16.gmra.mxu0 %vm1034_vm2, %v6098_v47 }
 0xae9   : > { %v3147_v13 = vpop.f32.mrf.mxu0  ;;  %v3183_v45 = vpop.f32.mrf.mxu1 }
 0xaea   : > { %v3156_v39 = vpack.c.bf16 %v3147_v13, %v3145_v9  ;;  %v3192_v53 = vpack.c.bf16 %v3183_v45, %v3181_v57  ;;  %v5050_v45 = vld [vmem:[%s6482_s2 + $0xe0] sm:$0xff] }
 0xaec   : > { %4772 = vmatmul.msk.bf16.gmra.mxu2 %vm1034_vm2, %v3192_v53  ;;  %4780 = vmatmul.msk.bf16.gmra.mxu3 %vm1034_vm2, %v3156_v39 }
 0xaf1   : > { %v3296_v35 = vpop.f32.mrf.mxu0 }
 0xaf9   : > { %v3298_v6 = vpop.f32.mrf.mxu0 }
 0xafa   : > { %v3319_v41 = vpack.c.bf16 %v3298_v6, %v3296_v35 }
 0xafc   : > { %4791 = vmatmul.msk.bf16.vlgmr.msrb.gmra.mxu1 %vm1034_vm2, %v3319_v41  ;;  %4795 = vmatmul.msk.bf16.vlgmr.msra.gmra.mxu2 %vm903_vm1, %v5042_v48 }
 0xafd   : > { %3713 = vmatpush.bf16.msrb.mxu1 %v6098_v47 }
 0xb01   : > { %3714 = vmatpush.bf16.msrb.mxu1 %v6103_v30  ;;  %v3301_v23 = vpop.f32.mrf.mxu0 }
 0xb05   : > { %3715 = vmatpush.bf16.msrb.mxu1 %v6108_v37 }
 0xb09   : > { %3716 = vmatpush.bf16.msrb.mxu1 %v6113_v43  ;;  %v3303_v54 = vpop.f32.mrf.mxu0 }
 0xb0a   : > { %v3320_v5 = vpack.c.bf16 %v3303_v54, %v3301_v23  ;;  %v5051_v23 = vld [vmem:[%s6482_s2 + $0xe8] sm:$0xff] }
 0xb0c   : > { %4792 = vmatmul.msk.bf16.gmra.mxu1 %vm1034_vm2, %v3320_v5  ;;  %4796 = vmatmul.msk.bf16.gmra.mxu2 %vm903_vm1, %v5043_v3 }
 0xb11   : > { %v3306_v31 = vpop.f32.mrf.mxu0 }
 0xb19   : > { %v3308_v14 = vpop.f32.mrf.mxu0 }
 0xb1a   : > { %v3321_v21 = vpack.c.bf16 %v3308_v14, %v3306_v31 }
 0xb1c   : > { %4793 = vmatmul.msk.bf16.gmra.mxu1 %vm1034_vm2, %v3321_v21  ;;  %4797 = vmatmul.msk.bf16.gmra.mxu2 %vm903_vm1, %v5044_v52  ;;  %v5002_v52 = vld [vmem:[%s6487_s7 + $0xb8] sm:$0xff] }
 0xb1d   : > { %3588 = vmatpush.bf16.msrb.mxu2 %v5002_v52  ;;  %v5003_v52 = vld [vmem:[%s6487_s7 + $0xc0] sm:$0xff] }
 0xb1e   : > { %3679 = vmatpush.bf16.msrb.mxu0 %v5003_v52 }
 0xb21   : > { %v3311_v25 = vpop.f32.mrf.mxu0 }
 0xb29   : > { %v3313_v63 = vpop.f32.mrf.mxu0 }
 0xb2a   : > { %v3322_v32 = vpack.c.bf16 %v3313_v63, %v3311_v25 }
 0xb2c   : > { %4794 = vmatmul.msk.bf16.gmra.mxu1 %vm1034_vm2, %v3322_v32  ;;  %4798 = vmatmul.msk.bf16.gmra.mxu2 %vm903_vm1, %v5045_v7  ;;  %v5053_v7 = vld [vmem:[%s6482_s2 + $0xf8] sm:$0xff] }
 0xb3c   : > { %4819 = vmatmul.msk.bf16.vlgmr.msra.gmra.mxu1 %vm903_vm1, %v5046_v56 }
 0xb3f   : > { %v3220_v29 = vpop.f32.mrf.mxu2  ;;  %v3267_v59 = vpop.f32.mrf.mxu3 }
 0xb40   : > { %v3268_v20 = vadd.f32 %v3267_v59, %v3220_v29 }
 0xb47   : > { %v6234_v8 = vpop.f32.mrf.mxu2  ;;  %v6236_v10 = vpop.f32.mrf.mxu3 }
 0xb4c   : > { %4820 = vmatmul.msk.bf16.gmra.mxu1 %vm903_vm1, %v5047_v33 }
 0xb4f   : > { %v3225_v1 = vpop.f32.mrf.mxu2  ;;  %v3272_v19 = vpop.f32.mrf.mxu3 }
 0xb50   : > { %v3273_v38 = vadd.f32 %v3272_v19, %v3225_v1 }
 0xb57   : > { %v6242_v0 = vpop.f32.mrf.mxu2  ;;  %v6244_v36 = vpop.f32.mrf.mxu3 }
 0xb5c   : > { %4821 = vmatmul.msk.bf16.gmra.mxu1 %vm903_vm1, %v5048_v49  ;;  %v5054_v49 = vld [vmem:[%s6482_s2 + $0xc0] sm:$0xff] }
 0xb5f   : > { %v3230_v28 = vpop.f32.mrf.mxu2  ;;  %v3277_v11 = vpop.f32.mrf.mxu3 }
 0xb60   : > { %v3278_v16 = vadd.f32 %v3277_v11, %v3230_v28 }
 0xb67   : > { %v6250_v2 = vpop.f32.mrf.mxu2  ;;  %v6252_v40 = vpop.f32.mrf.mxu3 }
 0xb6c   : > { %4822 = vmatmul.msk.bf16.gmra.mxu1 %vm903_vm1, %v5049_v27  ;;  %v5055_v27 = vld [vmem:[%s6482_s2 + $0xc8] sm:$0xff] }
 0xb6f   : > { %v3235_v4 = vpop.f32.mrf.mxu2  ;;  %v3282_v50 = vpop.f32.mrf.mxu3 }
 0xb70   : > { %v3283_v51 = vadd.f32 %v3282_v50, %v3235_v4 }
 0xb77   : > { %v6258_v9 = vpop.f32.mrf.mxu2 }
 0xb79   : > { %v3350_v57 = vpop.f32.mrf.mxu1 }
 0xb7a   : > { %v6260_v13 = vadd.f32 %v3350_v57, %v3268_v20  ;;  %v5056_v57 = vld [vmem:[%s6482_s2 + $0xd0] sm:$0xff] }
 0xb7c   : > { %4847 = vmatmul.msk.bf16.vlgmr.msrb.gmra.mxu1 %vm903_vm1, %v5050_v45 }
 0xb7f   : > { %v3387_v39 = vpop.f32.mrf.mxu2 }
 0xb81   : > { %v6266_v53 = vpop.f32.mrf.mxu1 }
 0xb87   : > { %v3389_v35 = vpop.f32.mrf.mxu2 }
 0xb88   : > { %v3410_v6 = vpack.c.bf16 %v3389_v35, %v3387_v39  ;;  %v5057_v35 = vld [vmem:[%s6482_s2 + $0xd8] sm:$0xff] }
 0xb89   : > { %v3355_v41 = vpop.f32.mrf.mxu1 }
 0xb8a   : > { %v6268_v48 = vadd.f32 %v3355_v41, %v3273_v38  ;;  %4805 = vmatmul.msk.bf16.vlgmr.msra.gmra.mxu3 %vm1034_vm2, %v3410_v6  ;;  %v6319_v6 = vpop.f32.mrf.mxu3  ;;  %v5058_v41 = vld [vmem:[%s6482_s2 + $0x100] sm:$0xff] }
 0xb8b   : > { %3804 = vmatpush.bf16.msra.mxu3 %v6098_v47  ;;  %v5052_v47 = vld [vmem:[%s6482_s2 + $0xf0] sm:$0xff] }
 0xb8c   : > { %4848 = vmatmul.msk.bf16.gmra.mxu1 %vm903_vm1, %v5051_v23 }
 0xb8f   : > { %3805 = vmatpush.bf16.msra.mxu3 %v6103_v30  ;;  %v3392_v54 = vpop.f32.mrf.mxu2 }
 0xb91   : > { %v6277_v5 = vpop.f32.mrf.mxu1 }
 0xb93   : > { %3806 = vmatpush.bf16.msra.mxu3 %v6108_v37 }
 0xb97   : > { %3807 = vmatpush.bf16.msra.mxu3 %v6113_v43  ;;  %v3394_v3 = vpop.f32.mrf.mxu2 }
 0xb98   : > { %v3411_v31 = vpack.c.bf16 %v3394_v3, %v3392_v54 }
 0xb99   : > { %v3360_v14 = vpop.f32.mrf.mxu1 }
 0xb9a   : > { %v3374_v21 = vadd.f32 %v3360_v14, %v3278_v16  ;;  %4806 = vmatmul.msk.bf16.gmra.mxu3 %vm1034_vm2, %v3411_v31  ;;  %v5059_v31 = vld [vmem:[%s6482_s2 + $0x108] sm:$0xff] }
 0xb9c   : > { %4849 = vmatmul.msk.bf16.gmra.mxu1 %vm903_vm1, %v5052_v47 }
 0xb9f   : > { %v3397_v30 = vpop.f32.mrf.mxu2 }
 0xba1   : > { %v6289_v37 = vpop.f32.mrf.mxu1 }
 0xba7   : > { %v3399_v43 = vpop.f32.mrf.mxu2 }
 0xba8   : > { %v3412_v25 = vpack.c.bf16 %v3399_v43, %v3397_v30 }
 0xba9   : > { %v3365_v63 = vpop.f32.mrf.mxu1 }
 0xbaa   : > { %v3376_v32 = vadd.f32 %v3365_v63, %v3283_v51  ;;  %4807 = vmatmul.msk.bf16.gmra.mxu3 %vm1034_vm2, %v3412_v25 }
 0xbac   : > { %4850 = vmatmul.msk.bf16.gmra.mxu1 %vm903_vm1, %v5053_v7 }
 0xbaf   : > { %v3402_v56 = vpop.f32.mrf.mxu2 }
 0xbb1   : > { %v6296_v29 = vpop.f32.mrf.mxu1 }
 0xbb7   : > { %v3404_v59 = vpop.f32.mrf.mxu2 }
 0xbb8   : > { %v3413_v20 = vpack.c.bf16 %v3404_v59, %v3402_v56 }
 0xbb9   : > { %v3536_v33 = vpop.f32.mrf.mxu1 }
 0xbba   : > { %4808 = vmatmul.msk.bf16.gmra.mxu3 %vm1034_vm2, %v3413_v20 }
 0xbc1   : > { %v3538_v1 = vpop.f32.mrf.mxu1 }
 0xbc2   : > { %v3559_v19 = vpack.c.bf16 %v3538_v1, %v3536_v33  ;;  %v3499_v33 = vpop.f32.mrf.mxu0  ;;  %v5061_v1 = vld [vmem:[%s6482_s2 + $0x118] sm:$0xff] }
 0xbc4   : > { %4829 = vmatmul.msk.bf16.vlgmr.msrb.gmra.mxu2 %vm1034_vm2, %v3559_v19 }
 0xbc9   : > { %v3541_v38 = vpop.f32.mrf.mxu1 }
 0xbca   : > { %4833 = vmatmul.msk.bf16.vlgmr.msrb.gmra.mxu3 %vm903_vm1, %v5054_v49 }
 0xbd1   : > { %v3543_v28 = vpop.f32.mrf.mxu1 }
 0xbd2   : > { %v3560_v11 = vpack.c.bf16 %v3543_v28, %v3541_v38  ;;  %v6352_v28 = vpop.f32.mrf.mxu0 }
 0xbd4   : > { %4830 = vmatmul.msk.bf16.gmra.mxu2 %vm1034_vm2, %v3560_v11 }
 0xbd9   : > { %v3546_v16 = vpop.f32.mrf.mxu1 }
 0xbda   : > { %4834 = vmatmul.msk.bf16.gmra.mxu3 %vm903_vm1, %v5055_v27 }
 0xbe1   : > { %v3548_v4 = vpop.f32.mrf.mxu1 }
 0xbe2   : > { %v3561_v50 = vpack.c.bf16 %v3548_v4, %v3546_v16 }
 0xbe4   : > { %4831 = vmatmul.msk.bf16.gmra.mxu2 %vm1034_vm2, %v3561_v50 }
 0xbe9   : > { %v3551_v51 = vpop.f32.mrf.mxu1 }
 0xbea   : > { %4835 = vmatmul.msk.bf16.gmra.mxu3 %vm903_vm1, %v5056_v57 }
 0xbf1   : > { %v3553_v45 = vpop.f32.mrf.mxu1 }
 0xbf2   : > { %v3562_v39 = vpack.c.bf16 %v3553_v45, %v3551_v51  ;;  %v3504_v51 = vpop.f32.mrf.mxu0 }
 0xbf4   : > { %4832 = vmatmul.msk.bf16.gmra.mxu2 %vm1034_vm2, %v3562_v39 }
 0xbf9   : > { %v3718_v43 = vpop.f32.mrf.mxu1 }
 0xbfa   : > { %4836 = vmatmul.msk.bf16.gmra.mxu3 %vm903_vm1, %v5057_v35 }
 0xc01   : > { %v3720_v7 = vpop.f32.mrf.mxu1 }
 0xc02   : > { %v3741_v56 = vpack.c.bf16 %v3720_v7, %v3718_v43 }
 0xc09   : > { %v3723_v20 = vpop.f32.mrf.mxu1 }
 0xc0a   : > { %4861 = vmatmul.msk.bf16.vlgmr.msra.gmra.mxu3 %vm903_vm1, %v5058_v41 }
 0xc0d   : > { %v3441_v23 = vpop.f32.mrf.mxu3 }
 0xc0e   : > { %v3461_v54 = vadd.f32 %v3441_v23, %v6260_v13  ;;  %v5060_v13 = vld [vmem:[%s6482_s2 + $0x110] sm:$0xff] }
 0xc10   : > { %v3519_v16 = vadd.f32 %v3499_v33, %v3461_v54 }
 0xc11   : > { %v3725_v38 = vpop.f32.mrf.mxu1 }
 0xc12   : > { %v3742_v49 = vpack.c.bf16 %v3725_v38, %v3723_v20 }
 0xc15   : > { %v6326_v3 = vpop.f32.mrf.mxu3 }
 0xc19   : > { %v3728_v50 = vpop.f32.mrf.mxu1 }
 0xc1a   : > { %4862 = vmatmul.msk.bf16.gmra.mxu3 %vm903_vm1, %v5059_v31  ;;  %v6360_v31 = vpop.f32.mrf.mxu0 }
 0xc1d   : > { %v3446_v14 = vpop.f32.mrf.mxu3 }
 0xc1e   : > { %v3463_v47 = vadd.f32 %v3446_v14, %v6268_v48  ;;  %v5004_v48 = vld [vmem:[%s6487_s7 + $0xc8] sm:$0xff] }
 0xc1f   : > { %3770 = vmatpush.bf16.msra.mxu2 %v5004_v48 }
 0xc20   : > { %v3521_v23 = vadd.f32 %v3504_v51, %v3463_v47 }
 0xc21   : > { %v3730_v39 = vpop.f32.mrf.mxu1 }
 0xc22   : > { %4857 = vmatmul.msk.bf16.vlgmr.msra.gmra.mxu2 %vm1034_vm2, %v3741_v56  ;;  %v3743_v35 = vpack.c.bf16 %v3730_v39, %v3728_v50  ;;  %v3509_v7 = vpop.f32.mrf.mxu0 }
 0xc25   : > { %v6333_v30 = vpop.f32.mrf.mxu3 }
 0xc29   : > { %v3733_v54 = vpop.f32.mrf.mxu1 }
 0xc2a   : > { %4863 = vmatmul.msk.bf16.gmra.mxu3 %vm903_vm1, %v5060_v13  ;;  %v6370_v38 = vpop.f32.mrf.mxu0 }
 0xc2d   : > { %v3451_v25 = vpop.f32.mrf.mxu3 }
 0xc2e   : > { %v3465_v63 = vadd.f32 %v3451_v25, %v3374_v21 }
 0xc30   : > { %v3523_v33 = vadd.f32 %v3509_v7, %v3465_v63 }
 0xc31   : > { %v3735_v25 = vpop.f32.mrf.mxu1 }
 0xc32   : > { %4858 = vmatmul.msk.bf16.gmra.mxu2 %vm1034_vm2, %v3742_v49  ;;  %v3744_v48 = vpack.c.bf16 %v3735_v25, %v3733_v54 }
 0xc35   : > { %v6345_v59 = vpop.f32.mrf.mxu3 }
 0xc3a   : > { %4864 = vmatmul.msk.bf16.gmra.mxu3 %vm903_vm1, %v5061_v1 }
 0xc3d   : > { %v3456_v21 = vpop.f32.mrf.mxu3 }
 0xc3e   : > { %v3467_v19 = vadd.f32 %v3456_v21, %v3376_v32  ;;  %v5005_v21 = vld [vmem:[%s6487_s7 + $0xd0] sm:$0xff] }
 0xc3f   : > { %3861 = vmatpush.bf16.msra.mxu0 %v5005_v21 }
 0xc42   : > { %4859 = vmatmul.msk.bf16.gmra.mxu2 %vm1034_vm2, %v3743_v35 }
 0xc45   : > { %v6354_v11 = vpop.f32.mrf.mxu3 }
 0xc47   : > { %v3590_v27 = vpop.f32.mrf.mxu2 }
 0xc48   : > { %v3610_v4 = vadd.f32 %v3590_v27, %v3519_v16  ;;  %v3514_v27 = vpop.f32.mrf.mxu0 }
 0xc4d   : > { %v3627_v57 = vpop.f32.mrf.mxu3 }
 0xc4f   : > { %v6357_v45 = vpop.f32.mrf.mxu2 }
 0xc50   : > { %v6380_v21 = vpop.f32.mrf.mxu0 }
 0xc52   : > { %4860 = vmatmul.msk.bf16.gmra.mxu2 %vm1034_vm2, %v3744_v48 }
 0xc55   : > { %v3629_v41 = vpop.f32.mrf.mxu3 }
 0xc56   : > { %v3650_v32 = vpack.c.bf16 %v3629_v41, %v3627_v57  ;;  %v3525_v57 = vadd.f32 %v3514_v27, %v3467_v19 }
 0xc57   : > { %v3595_v14 = vpop.f32.mrf.mxu2 }
 0xc58   : > { %v3612_v52 = vadd.f32 %v3595_v14, %v3521_v23  ;;  %4843 = vmatmul.msk.bf16.vlgmr.msrb.gmra.mxu0 %vm1034_vm2, %v3650_v32 }
 0xc5d   : > { %v3632_v43 = vpop.f32.mrf.mxu3 }
 0xc5f   : > { %v6363_v13 = vpop.f32.mrf.mxu2 }
 0xc65   : > { %v3634_v56 = vpop.f32.mrf.mxu3 }
 0xc66   : > { %v3651_v20 = vpack.c.bf16 %v3634_v56, %v3632_v43 }
 0xc67   : > { %v3600_v1 = vpop.f32.mrf.mxu2 }
 0xc68   : > { %v3614_v47 = vadd.f32 %v3600_v1, %v3523_v33  ;;  %4844 = vmatmul.msk.bf16.gmra.mxu0 %vm1034_vm2, %v3651_v20 }
 0xc6d   : > { %v3637_v49 = vpop.f32.mrf.mxu3 }
 0xc6f   : > { %v6372_v16 = vpop.f32.mrf.mxu2 }
 0xc75   : > { %v3639_v50 = vpop.f32.mrf.mxu3 }
 0xc76   : > { %v3652_v51 = vpack.c.bf16 %v3639_v50, %v3637_v49 }
 0xc77   : > { %v3605_v39 = vpop.f32.mrf.mxu2 }
 0xc78   : > { %v3616_v63 = vadd.f32 %v3605_v39, %v3525_v57  ;;  %4845 = vmatmul.msk.bf16.gmra.mxu0 %vm1034_vm2, %v3652_v51 }
 0xc7d   : > { %v3642_v35 = vpop.f32.mrf.mxu3 }
 0xc85   : > { %v3644_v41 = vpop.f32.mrf.mxu3 }
 0xc86   : > { %v3653_v32 = vpack.c.bf16 %v3644_v41, %v3642_v35 }
 0xc88   : > { %4846 = vmatmul.msk.bf16.gmra.mxu0 %vm1034_vm2, %v3653_v32  ;;  %v5006_v32 = vld [vmem:[%s6488_s8 + $0x10] sm:$0xff] }
 0xc89   : > { %3949 = vmatpush.bf16.msra.mxu1 %v5006_v32 }
 0xc8d   : > { %v3809_v23 = vpop.f32.mrf.mxu3 }
 0xc95   : > { %v3811_v14 = vpop.f32.mrf.mxu3 }
 0xc96   : > { %v3832_v54 = vpack.c.bf16 %v3811_v14, %v3809_v23  ;;  %v6385_v23 = vpop.f32.mrf.mxu2 }
 0xc98   : > { %4871 = vmatmul.msk.bf16.vlgmr.msra.gmra.mxu0 %vm1034_vm2, %v3832_v54 }
 0xc9d   : > { %v3814_v43 = vpop.f32.mrf.mxu3 }
 0xca5   : > { %v3816_v25 = vpop.f32.mrf.mxu3  ;;  %v3772_v54 = vpop.f32.mrf.mxu2 }
 0xca6   : > { %v3833_v7 = vpack.c.bf16 %v3816_v25, %v3814_v43 }
 0xca8   : > { %4872 = vmatmul.msk.bf16.gmra.mxu0 %vm1034_vm2, %v3833_v7 }
 0xcad   : > { %v3819_v19 = vpop.f32.mrf.mxu3  ;;  %v3774_v7 = vpop.f32.mrf.mxu2 }
 0xcb5   : > { %v3821_v48 = vpop.f32.mrf.mxu3 }
 0xcb6   : > { %v3834_v56 = vpack.c.bf16 %v3821_v48, %v3819_v19 }
 0xcb8   : > { %4873 = vmatmul.msk.bf16.gmra.mxu0 %vm1034_vm2, %v3834_v56 }
 0xcbd   : > { %v3824_v20 = vpop.f32.mrf.mxu3 }
 0xcc5   : > { %v3826_v33 = vpop.f32.mrf.mxu3 }
 0xcc6   : > { %v3835_v1 = vpack.c.bf16 %v3826_v33, %v3824_v20  ;;  %v3777_v33 = vpop.f32.mrf.mxu2 }
 0xcc8   : > { %4874 = vmatmul.msk.bf16.gmra.mxu0 %vm1034_vm2, %v3835_v1 }
 0xcd5   : > { %v3681_v49 = vpop.f32.mrf.mxu0 }
 0xcd6   : > { %v3701_v27 = vadd.f32 %v3681_v49, %v3610_v4  ;;  %v3270_v4 = vadd.f32 %v6236_v10, %v6234_v8  ;;  %v6400_v8 = vld [vmem:[%s6490_s10 + $0x2] ss:$0 sm:$0xff]  ;;  %v3275_v10 = vadd.f32 %v6244_v36, %v6242_v0 }
 0xcd8   : > { %v3792_v1 = vadd.f32 %v3772_v54, %v3701_v27 }
 0xcdd   : > { %v3683_v50 = vpop.f32.mrf.mxu0 }
 0xce5   : > { %v3686_v51 = vpop.f32.mrf.mxu0 }
 0xce6   : > { %v3703_v57 = vadd.f32 %v3686_v51, %v3612_v52 }
 0xce8   : > { %v3794_v36 = vadd.f32 %v3777_v33, %v3703_v57 }
 0xced   : > { %v3688_v39 = vpop.f32.mrf.mxu0 }
 0xcf5   : > { %v3691_v35 = vpop.f32.mrf.mxu0 }
 0xcf6   : > { %v3705_v41 = vadd.f32 %v3691_v35, %v3614_v47  ;;  %v3371_v47 = vadd.f32 %v6266_v53, %v3270_v4 }
 0xcf8   : > { %v3462_v19 = vadd.f32 %v6326_v3, %v3371_v47  ;;  %v3373_v3 = vadd.f32 %v6277_v5, %v3275_v10 }
 0xcfa   : > { %v3520_v48 = vadd.f32 %v6352_v28, %v3462_v19 }
 0xcfc   : > { %v3611_v20 = vadd.f32 %v6357_v45, %v3520_v48  ;;  %v3464_v45 = vadd.f32 %v6333_v30, %v3373_v3  ;;  %v3280_v30 = vadd.f32 %v6252_v40, %v6250_v2  ;;  %v3285_v3 = vadd.f32 %v6319_v6, %v6258_v9 }
 0xcfd   : > { %v3693_v14 = vpop.f32.mrf.mxu0 }
 0xcfe   : > { %v3702_v49 = vadd.f32 %v3683_v50, %v3611_v20  ;;  %v3779_v50 = vpop.f32.mrf.mxu2  ;;  %v3375_v20 = vadd.f32 %v6289_v37, %v3280_v30 }
 0xd00   : > { %v3793_v53 = vadd.f32 %v3774_v7, %v3702_v49  ;;  %v3466_v49 = vadd.f32 %v6345_v59, %v3375_v20 }
 0xd02   : > { %v3524_v57 = vadd.f32 %v6370_v38, %v3466_v49  ;;  %v5028_v49 = vld [vmem:[%s6491_s11 + $0x2] ss:$0 sm:$0xff] }
 0xd04   : > { %v3615_v2 = vadd.f32 %v6372_v16, %v3524_v57 }
 0xd05   : > { %v3696_v43 = vpop.f32.mrf.mxu0 }
 0xd06   : > { %v6387_v25 = vadd.f32 %v3696_v43, %v3616_v63  ;;  %v3522_v43 = vadd.f32 %v6360_v31, %v3464_v45  ;;  %v3782_v19 = vpop.f32.mrf.mxu2  ;;  %v3706_v37 = vadd.f32 %v3693_v14, %v3615_v2  ;;  %v5007_v2 = vld [vmem:[%s6493_s13] sm:$0xff] }
 0xd07   : > { %v3796_v40 = vadd.f32 %v3782_v19, %v3705_v41 }
 0xd08   : > { %v3613_v0 = vadd.f32 %v6363_v13, %v3522_v43 }
 0xd0a   : > { %v3704_v5 = vadd.f32 %v3688_v39, %v3613_v0 }
 0xd0c   : > { %v3795_v48 = vadd.f32 %v3779_v50, %v3704_v5 }
 0xd0d   : > { %v6391_v52 = vpop.f32.mrf.mxu0 }
 0xd0e   : > { %v3784_v33 = vpop.f32.mrf.mxu2 }
 0xd0f   : > { %v3797_v59 = vadd.f32 %v3784_v33, %v3706_v37 }
 0xd15   : > { %v3863_v56 = vpop.f32.mrf.mxu0 }
 0xd16   : > { %v3883_v63 = vadd.f32 %v3863_v56, %v3792_v1 }
 0xd18   : > { %v3896_v28 = vadd.f32 %v6400_v8, %v3883_v63 }
 0xd1a   : > { %v3904_v32 = vmax.f32 %v3896_v28, 0.0 }
 0xd1d   : > { %v3865_v51 = vpop.f32.mrf.mxu0 }
 0xd1e   : > { %v3884_v35 = vadd.f32 %v3865_v51, %v3793_v53 }
 0xd20   : > { %v3897_v27 = vadd.f32 %v6400_v8, %v3884_v35  ;;  %v3377_v35 = vadd.f32 %v6296_v29, %v3285_v3 }
 0xd22   : > { %v3905_v54 = vmax.f32 %v3897_v27, 0.0  ;;  %v3787_v27 = vpop.f32.mrf.mxu2  ;;  %v3468_v50 = vadd.f32 %v6354_v11, %v3377_v35 }
 0xd23   : > { %v3798_v29 = vadd.f32 %v3787_v27, %v6387_v25 }
 0xd24   : > { %v3915_v4 = vpack.c.bf16 %v3905_v54, %v3904_v32  ;;  %v3526_v41 = vadd.f32 %v6380_v21, %v3468_v50 }
 0xd25   : > { %v3868_v47 = vpop.f32.mrf.mxu0 }
 0xd26   : > { %4883 = vmatmul.msk.bf16.vlgmr.msra.gmra.mxu1 %vm1034_vm2, %v3915_v4  ;;  %v3885_v7 = vadd.f32 %v3868_v47, %v3794_v36  ;;  %v3617_v9 = vadd.f32 %v6385_v23, %v3526_v41 }
 0xd28   : > { %v3898_v1 = vadd.f32 %v6400_v8, %v3885_v7  ;;  %v3708_v6 = vadd.f32 %v6391_v52, %v3617_v9 }
 0xd2a   : > { %v3906_v63 = vmax.f32 %v3898_v1, 0.0  ;;  %v3789_v4 = vpop.f32.mrf.mxu2 }
 0xd2b   : > { %v3799_v0 = vadd.f32 %v3789_v4, %v3708_v6 }
 0xd2d   : > { %v3870_v56 = vpop.f32.mrf.mxu0 }
 0xd2e   : > { %v3886_v31 = vadd.f32 %v3870_v56, %v3795_v48 }
 0xd30   : > { %v3899_v13 = vadd.f32 %v6400_v8, %v3886_v31  ;;  %v5010_v31 = vld [vmem:[%s6493_s13 + $0x18] sm:$0xff] }
 0xd31   : > { %4052 = vmatpush.bf16.msrb.mxu3 %v5010_v31 }
 0xd32   : > { %v3907_v10 = vmax.f32 %v3899_v13, 0.0 }
 0xd34   : > { %v3916_v39 = vpack.c.bf16 %v3907_v10, %v3906_v63  ;;  %v5008_v63 = vld [vmem:[%s6493_s13 + $0x8] sm:$0xff] }
 0xd35   : > { %v3873_v53 = vpop.f32.mrf.mxu0 }
 0xd36   : > { %4884 = vmatmul.msk.bf16.gmra.mxu1 %vm1034_vm2, %v3916_v39  ;;  %v3887_v51 = vadd.f32 %v3873_v53, %v3796_v40 }
 0xd38   : > { %v3900_v45 = vadd.f32 %v6400_v8, %v3887_v51 }
 0xd3a   : > { %v3908_v32 = vmax.f32 %v3900_v45, 0.0 }
 0xd3d   : > { %v3875_v28 = vpop.f32.mrf.mxu0 }
 0xd3e   : > { %v3888_v38 = vadd.f32 %v3875_v28, %v3797_v59 }
 0xd40   : > { %v3901_v16 = vadd.f32 %v6400_v8, %v3888_v38 }
 0xd42   : > { %v3909_v54 = vmax.f32 %v3901_v16, 0.0 }
 0xd44   : > { %v3917_v14 = vpack.c.bf16 %v3909_v54, %v3908_v32 }
 0xd45   : > { %v3878_v43 = vpop.f32.mrf.mxu0 }
 0xd46   : > { %4885 = vmatmul.msk.bf16.gmra.mxu1 %vm1034_vm2, %v3917_v14  ;;  %v3889_v47 = vadd.f32 %v3878_v43, %v3798_v29 }
 0xd48   : > { %v3902_v36 = vadd.f32 %v6400_v8, %v3889_v47 }
 0xd4a   : > { %v3910_v21 = vmax.f32 %v3902_v36, 0.0 }
 0xd4d   : > { %v3880_v11 = vpop.f32.mrf.mxu0 }
 0xd4e   : > { %v3890_v5 = vadd.f32 %v3880_v11, %v3799_v0 }
 0xd50   : > { %v3903_v7 = vadd.f32 %v6400_v8, %v3890_v5  ;;  %v5009_v8 = vld [vmem:[%s6493_s13 + $0x10] sm:$0xff] }
 0xd51   : > { %4053 = vmatpush.bf16.msrb.mxu3 %v5009_v8 }
 0xd52   : > { %v3911_v19 = vmax.f32 %v3903_v7, 0.0 }
 0xd54   : > { %v3918_v30 = vpack.c.bf16 %v3911_v19, %v3910_v21 }
 0xd55   : > { %4054 = vmatpush.bf16.msrb.mxu3 %v5008_v63 }
 0xd56   : > { %4886 = vmatmul.msk.bf16.gmra.mxu1 %vm1034_vm2, %v3918_v30 }
 0xd59   : > { %4055 = vmatpush.bf16.msrb.mxu3 %v5007_v2 }
 0xda3   : > { %v3951_v23 = vpop.f32.mrf.mxu1 }
 0xda4   : > { %v3952_v27 = vadd.f32 %v5028_v49, %v3951_v23 }
 0xdab   : > { %v3953_v48 = vpop.f32.mrf.mxu1 }
 0xdb3   : > { %v3956_v56 = vpop.f32.mrf.mxu1 }
 0xdb4   : > { %v3957_v3 = vadd.f32 %v5028_v49, %v3956_v56 }
 0xdb6   : > { %v3973_v26 = vadd.f32 %v3957_v3, %v3020_v24 }
 0xdb8   : > { %v3981_v50 = vmax.f32 %v3973_v26, 0.0 }
 0xdbb   : > { %v3958_v25 = vpop.f32.mrf.mxu1 }
 0xdbc   : > { %v3959_v40 = vadd.f32 %v5028_v49, %v3958_v25 }
 0xdbe   : > { %v3974_v35 = vadd.f32 %v3959_v40, %v3021_v18 }
 0xdc0   : > { %v3982_v61 = vmax.f32 %v3974_v35, 0.0 }
 0xdc2   : > { %v3989_v18 = vpack.c.bf16 %v3982_v61, %v3981_v50 }
 0xdc3   : > { %v3961_v20 = vpop.f32.mrf.mxu1 }
 0xdc4   : > { %v3962_v39 = vadd.f32 %v5028_v49, %v3961_v20 }
 0xdc6   : > { %v3975_v59 = vadd.f32 %v3962_v39, %v3022_v22 }
 0xdcb   : > { %v3963_v52 = vpop.f32.mrf.mxu1 }
 0xdcc   : > { %v3964_v10 = vadd.f32 %v5028_v49, %v3963_v52 }
 0xdce   : > { %v3976_v37 = vadd.f32 %v3964_v10, %v3023_v42  ;;  %v3983_v42 = vmax.f32 %v3975_v59, 0.0 }
 0xdd0   : > { %v3984_v45 = vmax.f32 %v3976_v37, 0.0 }
 0xdd2   : > { %v3990_v22 = vpack.c.bf16 %v3984_v45, %v3983_v42 }
 0xdd3   : > { %v3966_v1 = vpop.f32.mrf.mxu1 }
 0xdd4   : > { %v3967_v13 = vadd.f32 %v5028_v49, %v3966_v1 }
 0xdd6   : > { %v3977_v33 = vadd.f32 %v3967_v13, %v3024_v55  ;;  %v3954_v55 = vadd.f32 %v5028_v49, %v3953_v48 }
 0xdd8   : > { %v3985_v28 = vmax.f32 %v3977_v33, 0.0  ;;  %v3972_v17 = vadd.f32 %v3954_v55, %v3019_v46 }
 0xdda   : > { %v3980_v15 = vmax.f32 %v3972_v17, 0.0 }
 0xddb   : > { %v3968_v57 = vpop.f32.mrf.mxu1 }
 0xddc   : > { %v3969_v53 = vadd.f32 %v5028_v49, %v3968_v57 }
 0xdde   : > { %v3978_v51 = vadd.f32 %v3969_v53, %v3025_v60  ;;  %v3971_v60 = vadd.f32 %v3952_v27, %v3018_v62  ;;  %v5029_v62 = vld [vmem:[%s6494_s14] ss:$0 sm:$0xff] }
 0xde0   : > { %v3986_v58 = vmax.f32 %v3978_v51, 0.0  ;;  %v3979_v16 = vmax.f32 %v3971_v60, 0.0 }
 0xde2   : > { %v3991_v38 = vpack.c.bf16 %v3986_v58, %v3985_v28  ;;  %v3988_v32 = vpack.c.bf16 %v3980_v15, %v3979_v16 }
 0xde4   : > { %3999 = vmatpush.bf16.msrb.mxu2 %v3991_v38 }
 0xde8   : > { %4000 = vmatpush.bf16.msrb.mxu2 %v3990_v22 }
 0xdec   : > { %4001 = vmatpush.bf16.msrb.mxu2 %v3989_v18 }
 0xdf0   : > { %4002 = vmatpush.bf16.msrb.mxu2 %v3988_v32 }
 0xdf3   : > { %4887 = vmatmul.msk.bf16.vlgmr.msrb.gmra.mxu2 %vm903_vm1, %v3987_v44 }
 0xe76   : > { %v4004_v12 = vpop.f32.mrf.mxu2 }
 0xe77   : > { %v4016_v46 = vpack.c.bf16 %v4004_v12, %v4004_v12 }
 0xe79   : > { %4904 = vmatmul.msk.bf16.vlgmr.msrb.gmra.mxu3 %vm903_vm1, %v4016_v46 }
 0xe7e   : > { %v4006_v34 = vpop.f32.mrf.mxu2 }
 0xefc   : > { %v4057_v24 = vpop.f32.mrf.mxu3 }
 0xefd   : > { %v4058_v54 = vadd.f32 %v5029_v62, %v4057_v24 }
 0xeff   : > { %4061 = vst [vmem:[%s512_s28] sm:$0xf] %v4058_v54 }
 0xf04   : > { %v4059_v41 = vpop.f32.mrf.mxu3 }
 0xf05 PF: > { %s25_s18 = sadd.s32 1, %s5068_s18  }
 0xf06   : > { %p22_p4 = scmp.ge.s32.totalorder %s25_s18, 4  }
 0xf08   :  { %24 = sbr.rel (!%p22_p4) target bundleno = 1 (0x1), region = 155 }

</bundles_post_ra>
